<compile_context>
chip_gen: v7x
topology: tpu7x:2x2x1
jax: 0.10.0
libtpu: 0.0.40
codegen_flags: <defaults>
</compile_context>

<pallas_src>
import functools

import jax
import jax.numpy as jnp
from jax.experimental import pallas as pl
from jax.experimental.pallas import tpu as pltpu

LANE = 128  # TPU lane width; all channel dims are padded to this.


def _pad_to(x, axis, size):
    if x.shape[axis] == size:
        return x
    pad = [(0, 0)] * x.ndim
    pad[axis] = (0, size - x.shape[axis])
    return jnp.pad(x, pad)


# ----------------- fused conv (+bias +residual +ReLU) kernel -----------------

def _conv_kernel(x_ref, w_ref, b_ref, *rest, kh, kw, ho, wo, act, has_res):
    if has_res:
        res_ref, o_ref = rest
    else:
        (o_ref,) = rest
    c_in = x_ref.shape[-1]
    c_out = o_ref.shape[-1]
    x = x_ref[0]                                       # (Hp, Wp, Cin) bf16, VMEM
    acc = jnp.zeros((ho * wo, c_out), jnp.float32)
    # kh*kw shifted matmuls on the MXU -- no im2col materialization in HBM.
    for di in range(kh):
        for dj in range(kw):
            xs = x[di:di + ho, dj:dj + wo, :].reshape(ho * wo, c_in)
            acc = acc + jnp.dot(xs, w_ref[di * kw + dj],
                                preferred_element_type=jnp.float32)
    acc = acc + b_ref[...]
    if has_res:
        acc = acc + res_ref[0].reshape(ho * wo, c_out).astype(jnp.float32)
    if act == "relu":
        acc = jnp.maximum(acc, 0.0)
    o_ref[...] = acc.reshape(1, ho, wo, c_out).astype(o_ref.dtype)


def conv2d_fused(x_nhwc, w_taps, b, act="none", residual=None):
    """stride-1 conv (3x3 or 1x1) + bias (+residual) (+ReLU); one grid step/image.

    x_nhwc:   (B, H, W, C)     channel dim already padded to LANE
    w_taps:   (kh*kw, C, Cout) bf16, prepared once
    b:        (1, Cout)        f32
    residual: optional (B, H, W, Cout) fused into the epilogue before ReLU
    """
    B, H, W, C = x_nhwc.shape
    khkw, C2, Cout = w_taps.shape
    assert C == C2
    kh = kw = int(round(khkw ** 0.5))
    pad = (kh - 1) // 2
    xp = jnp.pad(x_nhwc, ((0, 0), (pad, pad), (pad, pad), (0, 0)))
    xp = xp.astype(jnp.bfloat16)
    Hp, Wp = H + 2 * pad, W + 2 * pad

    has_res = residual is not None
    in_specs = [
        pl.BlockSpec((1, Hp, Wp, C), lambda bi: (bi, 0, 0, 0)),
        pl.BlockSpec((khkw, C, Cout), lambda bi: (0, 0, 0)),   # resident weights
        pl.BlockSpec((1, Cout), lambda bi: (0, 0)),
    ]
    inputs = [xp, w_taps, b]
    if has_res:
        in_specs.append(pl.BlockSpec((1, H, W, Cout), lambda bi: (bi, 0, 0, 0)))
        inputs.append(residual.astype(jnp.bfloat16))

    return pl.pallas_call(
        functools.partial(_conv_kernel, kh=kh, kw=kw, ho=H, wo=W,
                          act=act, has_res=has_res),
        out_shape=jax.ShapeDtypeStruct((B, H, W, Cout), jnp.bfloat16),
        grid_spec=pltpu.PrefetchScalarGridSpec(
            num_scalar_prefetch=0, grid=(B,),
            in_specs=in_specs,
            out_specs=pl.BlockSpec((1, H, W, Cout), lambda bi: (bi, 0, 0, 0)),
        ),
        compiler_params=pltpu.CompilerParams(dimension_semantics=("parallel",)),
    )(*inputs)


# ---- fused 1x1 projection + ReLU + global-average-pool (+ Linear classifier) ----

def _proj_gap_kernel(x_ref, w_ref, b_ref, *rest, inv_hw, has_fc):
    if has_fc:
        fcw_ref, fcb_ref, o_ref, acc_ref = rest
    else:
        o_ref, acc_ref = rest

    @pl.when(pl.program_id(1) == 0)
    def _():
        acc_ref[...] = jnp.zeros_like(acc_ref)

    y = jnp.dot(x_ref[0], w_ref[...], preferred_element_type=jnp.float32)
    y = jnp.maximum(y + b_ref[...], 0.0)                 # 1x1 conv + bias + ReLU
    acc_ref[...] += jnp.sum(y, axis=0, keepdims=True)    # running spatial sum

    @pl.when(pl.program_id(1) == pl.num_programs(1) - 1)
    def _():
        pooled = acc_ref[...] * inv_hw                   # (1, Cproj) f32
        if has_fc:
            out = jnp.dot(pooled.astype(jnp.bfloat16), fcw_ref[...],
                          preferred_element_type=jnp.float32) + fcb_ref[...]
        else:
            out = pooled
        o_ref[...] = out.reshape(1, 1, -1).astype(o_ref.dtype)


def proj_gap(x_nhwc, w, b, fc_w=None, fc_b=None):
    """Fused 1x1 conv -> ReLU -> GAP (-> Linear).  Returns (B, Nout) f32."""
    B, H, W, C = x_nhwc.shape
    C2, Cp = w.shape
    assert C == C2
    HW = H * W
    ts = 128 if HW % 128 == 0 else HW
    n_s = HW // ts
    has_fc = fc_w is not None
    n_out = fc_w.shape[1] if has_fc else Cp
    x = x_nhwc.reshape(B, HW, C).astype(jnp.bfloat16)

    in_specs = [
        pl.BlockSpec((1, ts, C), lambda bi, si: (bi, si, 0)),
        pl.BlockSpec((C, Cp), lambda bi, si: (0, 0)),
        pl.BlockSpec((1, Cp), lambda bi, si: (0, 0)),
    ]
    inputs = [x, w.astype(jnp.bfloat16), b.astype(jnp.float32)]
    if has_fc:
        in_specs += [
            pl.BlockSpec((Cp, n_out), lambda bi, si: (0, 0)),
            pl.BlockSpec((1, n_out), lambda bi, si: (0, 0)),
        ]
        inputs += [fc_w.astype(jnp.bfloat16), fc_b.astype(jnp.float32)]

    out = pl.pallas_call(
        functools.partial(_proj_gap_kernel, inv_hw=1.0 / HW, has_fc=has_fc),
        out_shape=jax.ShapeDtypeStruct((B, 1, n_out), jnp.float32),
        grid_spec=pltpu.PrefetchScalarGridSpec(
            num_scalar_prefetch=0, grid=(B, n_s),
            in_specs=in_specs,
            out_specs=pl.BlockSpec((1, 1, n_out), lambda bi, si: (bi, 0, 0)),
            scratch_shapes=[pltpu.VMEM((1, Cp), jnp.float32)],
        ),
        compiler_params=pltpu.CompilerParams(
            dimension_semantics=("parallel", "arbitrary")),
    )(*inputs)
    return out.reshape(B, n_out)


# ----------------------- parameter preparation (once) ------------------------

def prepare_params(raw):
    """Reorganize / zero-pad PyTorch-layout weights once, outside the forward."""
    def conv_w(w):  # (Cout, Cin, kh, kw) -> (kh*kw, LANE, LANE) bf16
        cout, cin, kh, kw = w.shape
        wt = jnp.transpose(w, (2, 3, 1, 0)).reshape(kh * kw, cin, cout)
        wt = _pad_to(_pad_to(wt, 1, LANE), 2, LANE)
        return wt.astype(jnp.bfloat16)

    def bias(b):
        return _pad_to(b.reshape(1, -1), 1, LANE).astype(jnp.float32)

    fc_w = raw["fc_w"].T                                    # (emb, n_classes)
    fc_w = _pad_to(_pad_to(fc_w, 0, LANE), 1, LANE).astype(jnp.bfloat16)
    return {
        "stem_w": conv_w(raw["stem_w"]), "stem_b": bias(raw["stem_b"]),
        "b1_w1": conv_w(raw["b1_w1"]),   "b1_b1": bias(raw["b1_b1"]),
        "b1_w2": conv_w(raw["b1_w2"]),   "b1_b2": bias(raw["b1_b2"]),
        "proj_w": conv_w(raw["proj_w"])[0],  # 1x1 -> (LANE, LANE)
        "proj_b": bias(raw["proj_b"]),
        "fc_w": fc_w, "fc_b": bias(raw["fc_b"]),
    }


# ------------------------------ model forward --------------------------------

def _backbone_convs(x_nchw, p):
    x = jnp.transpose(x_nchw, (0, 2, 3, 1)).astype(jnp.float32)   # NCHW -> NHWC
    x = _pad_to(x, 3, LANE)                                       # lane-dense C
    # TODO(synk): BatchNorm assumed folded into conv weights/bias (inference).
    h = conv2d_fused(x, p["stem_w"], p["stem_b"], act="relu")
    y = conv2d_fused(h, p["b1_w1"], p["b1_b1"], act="relu")
    h = conv2d_fused(y, p["b1_w2"], p["b1_b2"], act="relu", residual=h)
    return h


def resnet_forward(x_nchw, params, *, n_classes):
    """Equivalent of ResNet.forward: logits = classifier(backbone(x))."""
    h = _backbone_convs(x_nchw, params)
    logits = proj_gap(h, params["proj_w"], params["proj_b"],
                      fc_w=params["fc_w"], fc_b=params["fc_b"])
    return logits[:, :n_classes]


def forward_seq(x_nchw, params, *, emb_size):
    """Equivalent of ResNet.forward_seq: returns backbone features."""
    h = _backbone_convs(x_nchw, params)
    feats = proj_gap(h, params["proj_w"], params["proj_b"])
    return feats[:, :emb_size]


# --------------------------- pure-JAX f32 reference --------------------------

def _ref_forward(x_nchw, raw):
    x = jnp.transpose(x_nchw, (0, 2, 3, 1)).astype(jnp.float32)

    def conv(x, w, b, pad):
        y = jax.lax.conv_general_dilated(
            x, w, window_strides=(1, 1), padding=[(pad, pad), (pad, pad)],
            dimension_numbers=("NHWC", "OIHW", "NHWC"))
        return y + b.reshape(1, 1, 1, -1)

    h = jax.nn.relu(conv(x, raw["stem_w"], raw["stem_b"], 1))
    y = jax.nn.relu(conv(h, raw["b1_w1"], raw["b1_b1"], 1))
    y = conv(y, raw["b1_w2"], raw["b1_b2"], 1)
    h = jax.nn.relu(y + h)
    h = jax.nn.relu(conv(h, raw["proj_w"], raw["proj_b"], 0))
    feats = h.mean(axis=(1, 2))
    return feats @ raw["fc_w"].T + raw["fc_b"]


# --------------------------------- main ---------------------------------------

if __name__ == "__main__":
    B, Cin, H, W = 2, 3, 16, 16
    width, emb_size, n_classes = 16, 32, 10

    key = jax.random.PRNGKey(0)
    keys = jax.random.split(key, 11)

    def init(k, shape, scale=0.1):
        return scale * jax.random.normal(k, shape, dtype=jnp.float32)

    raw = {
        "stem_w": init(keys[0], (width, Cin, 3, 3)),
        "stem_b": init(keys[1], (width,)),
        "b1_w1":  init(keys[2], (width, width, 3, 3)),
        "b1_b1":  init(keys[3], (width,)),
        "b1_w2":  init(keys[4], (width, width, 3, 3)),
        "b1_b2":  init(keys[5], (width,)),
        "proj_w": init(keys[6], (emb_size, width, 1, 1)),
        "proj_b": init(keys[7], (emb_size,)),
        "fc_w":   init(keys[8], (n_classes, emb_size)),   # PyTorch Linear layout
        "fc_b":   init(keys[9], (n_classes,)),
    }
    params = prepare_params(raw)
    x = jax.random.normal(keys[10], (B, Cin, H, W), dtype=jnp.float32)

    fwd = jax.jit(functools.partial(resnet_forward, n_classes=n_classes))
    logits = fwd(x, params)
    jax.block_until_ready(logits)
    assert logits.shape == (B, n_classes), logits.shape
    assert logits.dtype == jnp.float32

    fseq = jax.jit(functools.partial(forward_seq, emb_size=emb_size))
    feats = fseq(x, params)
    jax.block_until_ready(feats)
    assert feats.shape == (B, emb_size), feats.shape

    # loose sanity check vs an f32 XLA reference (Pallas path uses bf16 operands)
    ref = _ref_forward(x, raw)
    err = float(jnp.max(jnp.abs(logits - ref)))
    assert err < 1e-1, f"max abs diff vs f32 reference: {err}"

    print("KERNEL_OK")
</pallas_src>

<mosaic_0001>
module attributes {stable_mosaic.version = 11 : i64} {
  func.func @_conv_kernel(%arg0: i32, %arg1: memref<1x18x18x128xbf16, #tpu.memory_space<vmem>>, %arg2: memref<9x128x128xbf16, #tpu.memory_space<vmem>>, %arg3: memref<1x128xf32, #tpu.memory_space<vmem>>, %arg4: memref<1x16x16x128xbf16, #tpu.memory_space<vmem>>) attributes {dimension_semantics = [#tpu.dimension_semantics<parallel>], iteration_bounds = array<i64: 2>, scalar_prefetch = 0 : i64, scratch_operands = 0 : i64, tpu.core_type = #tpu.core_type<tc>, window_params = [{transform_indices = @transform_0, window_bounds = array<i64: 1, 18, 18, 128>}, {pipeline_mode = #tpu.pipeline_mode<synchronous>, transform_indices = @transform_1, window_bounds = array<i64: 9, 128, 128>}, {pipeline_mode = #tpu.pipeline_mode<synchronous>, transform_indices = @transform_2, window_bounds = array<i64: 1, 128>}, {transform_indices = @transform_3, window_bounds = array<i64: 1, 16, 16, 128>}]} {
    %c0 = arith.constant 0 : index
    %c0_0 = arith.constant 0 : index
    %c0_1 = arith.constant 0 : index
    %c0_2 = arith.constant 0 : index
    %0 = vector.load %arg1[%c0, %c0_0, %c0_1, %c0_2] : memref<1x18x18x128xbf16, #tpu.memory_space<vmem>>, vector<1x18x18x128xbf16>
    %1 = vector.shape_cast %0 : vector<1x18x18x128xbf16> to vector<18x18x128xbf16>
    %cst = arith.constant 0.000000e+00 : f32
    %2 = vector.broadcast %cst : f32 to vector<256x128xf32>
    %3 = vector.extract_strided_slice %1 {offsets = [0, 0, 0], sizes = [16, 16, 128], strides = [1, 1, 1]} : vector<18x18x128xbf16> to vector<16x16x128xbf16>
    %4 = vector.shape_cast %3 : vector<16x16x128xbf16> to vector<256x128xbf16>
    %c0_3 = arith.constant 0 : index
    %c0_4 = arith.constant 0 : index
    %c0_5 = arith.constant 0 : index
    %5 = vector.load %arg2[%c0_3, %c0_4, %c0_5] : memref<9x128x128xbf16, #tpu.memory_space<vmem>>, vector<1x128x128xbf16>
    %6 = vector.shape_cast %5 : vector<1x128x128xbf16> to vector<128x128xbf16>
    %cst_6 = arith.constant dense<0.000000e+00> : vector<256x128xf32>
    %7 = tpu.matmul %4, %6, %cst_6 {dimension_numbers = #tpu.dot_dimension_numbers<[1], [0], [0], [1], [0, 0, 1, 1], [], []>} : vector<256x128xbf16>, vector<128x128xbf16>, vector<256x128xf32> -> vector<256x128xf32>
    %8 = arith.addf %2, %7 : vector<256x128xf32>
    %9 = vector.extract_strided_slice %1 {offsets = [0, 1, 0], sizes = [16, 16, 128], strides = [1, 1, 1]} : vector<18x18x128xbf16> to vector<16x16x128xbf16>
    %10 = vector.shape_cast %9 : vector<16x16x128xbf16> to vector<256x128xbf16>
    %c1 = arith.constant 1 : index
    %c0_7 = arith.constant 0 : index
    %c0_8 = arith.constant 0 : index
    %11 = vector.load %arg2[%c1, %c0_7, %c0_8] : memref<9x128x128xbf16, #tpu.memory_space<vmem>>, vector<1x128x128xbf16>
    %12 = vector.shape_cast %11 : vector<1x128x128xbf16> to vector<128x128xbf16>
    %cst_9 = arith.constant dense<0.000000e+00> : vector<256x128xf32>
    %13 = tpu.matmul %10, %12, %cst_9 {dimension_numbers = #tpu.dot_dimension_numbers<[1], [0], [0], [1], [0, 0, 1, 1], [], []>} : vector<256x128xbf16>, vector<128x128xbf16>, vector<256x128xf32> -> vector<256x128xf32>
    %14 = arith.addf %8, %13 : vector<256x128xf32>
    %15 = vector.extract_strided_slice %1 {offsets = [0, 2, 0], sizes = [16, 16, 128], strides = [1, 1, 1]} : vector<18x18x128xbf16> to vector<16x16x128xbf16>
    %16 = vector.shape_cast %15 : vector<16x16x128xbf16> to vector<256x128xbf16>
    %c2 = arith.constant 2 : index
    %c0_10 = arith.constant 0 : index
    %c0_11 = arith.constant 0 : index
    %17 = vector.load %arg2[%c2, %c0_10, %c0_11] : memref<9x128x128xbf16, #tpu.memory_space<vmem>>, vector<1x128x128xbf16>
    %18 = vector.shape_cast %17 : vector<1x128x128xbf16> to vector<128x128xbf16>
    %cst_12 = arith.constant dense<0.000000e+00> : vector<256x128xf32>
    %19 = tpu.matmul %16, %18, %cst_12 {dimension_numbers = #tpu.dot_dimension_numbers<[1], [0], [0], [1], [0, 0, 1, 1], [], []>} : vector<256x128xbf16>, vector<128x128xbf16>, vector<256x128xf32> -> vector<256x128xf32>
    %20 = arith.addf %14, %19 : vector<256x128xf32>
    %21 = vector.extract_strided_slice %1 {offsets = [1, 0, 0], sizes = [16, 16, 128], strides = [1, 1, 1]} : vector<18x18x128xbf16> to vector<16x16x128xbf16>
    %22 = vector.shape_cast %21 : vector<16x16x128xbf16> to vector<256x128xbf16>
    %c3 = arith.constant 3 : index
    %c0_13 = arith.constant 0 : index
    %c0_14 = arith.constant 0 : index
    %23 = vector.load %arg2[%c3, %c0_13, %c0_14] : memref<9x128x128xbf16, #tpu.memory_space<vmem>>, vector<1x128x128xbf16>
    %24 = vector.shape_cast %23 : vector<1x128x128xbf16> to vector<128x128xbf16>
    %cst_15 = arith.constant dense<0.000000e+00> : vector<256x128xf32>
    %25 = tpu.matmul %22, %24, %cst_15 {dimension_numbers = #tpu.dot_dimension_numbers<[1], [0], [0], [1], [0, 0, 1, 1], [], []>} : vector<256x128xbf16>, vector<128x128xbf16>, vector<256x128xf32> -> vector<256x128xf32>
    %26 = arith.addf %20, %25 : vector<256x128xf32>
    %27 = vector.extract_strided_slice %1 {offsets = [1, 1, 0], sizes = [16, 16, 128], strides = [1, 1, 1]} : vector<18x18x128xbf16> to vector<16x16x128xbf16>
    %28 = vector.shape_cast %27 : vector<16x16x128xbf16> to vector<256x128xbf16>
    %c4 = arith.constant 4 : index
    %c0_16 = arith.constant 0 : index
    %c0_17 = arith.constant 0 : index
    %29 = vector.load %arg2[%c4, %c0_16, %c0_17] : memref<9x128x128xbf16, #tpu.memory_space<vmem>>, vector<1x128x128xbf16>
    %30 = vector.shape_cast %29 : vector<1x128x128xbf16> to vector<128x128xbf16>
    %cst_18 = arith.constant dense<0.000000e+00> : vector<256x128xf32>
    %31 = tpu.matmul %28, %30, %cst_18 {dimension_numbers = #tpu.dot_dimension_numbers<[1], [0], [0], [1], [0, 0, 1, 1], [], []>} : vector<256x128xbf16>, vector<128x128xbf16>, vector<256x128xf32> -> vector<256x128xf32>
    %32 = arith.addf %26, %31 : vector<256x128xf32>
    %33 = vector.extract_strided_slice %1 {offsets = [1, 2, 0], sizes = [16, 16, 128], strides = [1, 1, 1]} : vector<18x18x128xbf16> to vector<16x16x128xbf16>
    %34 = vector.shape_cast %33 : vector<16x16x128xbf16> to vector<256x128xbf16>
    %c5 = arith.constant 5 : index
    %c0_19 = arith.constant 0 : index
    %c0_20 = arith.constant 0 : index
    %35 = vector.load %arg2[%c5, %c0_19, %c0_20] : memref<9x128x128xbf16, #tpu.memory_space<vmem>>, vector<1x128x128xbf16>
    %36 = vector.shape_cast %35 : vector<1x128x128xbf16> to vector<128x128xbf16>
    %cst_21 = arith.constant dense<0.000000e+00> : vector<256x128xf32>
    %37 = tpu.matmul %34, %36, %cst_21 {dimension_numbers = #tpu.dot_dimension_numbers<[1], [0], [0], [1], [0, 0, 1, 1], [], []>} : vector<256x128xbf16>, vector<128x128xbf16>, vector<256x128xf32> -> vector<256x128xf32>
    %38 = arith.addf %32, %37 : vector<256x128xf32>
    %39 = vector.extract_strided_slice %1 {offsets = [2, 0, 0], sizes = [16, 16, 128], strides = [1, 1, 1]} : vector<18x18x128xbf16> to vector<16x16x128xbf16>
    %40 = vector.shape_cast %39 : vector<16x16x128xbf16> to vector<256x128xbf16>
    %c6 = arith.constant 6 : index
    %c0_22 = arith.constant 0 : index
    %c0_23 = arith.constant 0 : index
    %41 = vector.load %arg2[%c6, %c0_22, %c0_23] : memref<9x128x128xbf16, #tpu.memory_space<vmem>>, vector<1x128x128xbf16>
    %42 = vector.shape_cast %41 : vector<1x128x128xbf16> to vector<128x128xbf16>
    %cst_24 = arith.constant dense<0.000000e+00> : vector<256x128xf32>
    %43 = tpu.matmul %40, %42, %cst_24 {dimension_numbers = #tpu.dot_dimension_numbers<[1], [0], [0], [1], [0, 0, 1, 1], [], []>} : vector<256x128xbf16>, vector<128x128xbf16>, vector<256x128xf32> -> vector<256x128xf32>
    %44 = arith.addf %38, %43 : vector<256x128xf32>
    %45 = vector.extract_strided_slice %1 {offsets = [2, 1, 0], sizes = [16, 16, 128], strides = [1, 1, 1]} : vector<18x18x128xbf16> to vector<16x16x128xbf16>
    %46 = vector.shape_cast %45 : vector<16x16x128xbf16> to vector<256x128xbf16>
    %c7 = arith.constant 7 : index
    %c0_25 = arith.constant 0 : index
    %c0_26 = arith.constant 0 : index
    %47 = vector.load %arg2[%c7, %c0_25, %c0_26] : memref<9x128x128xbf16, #tpu.memory_space<vmem>>, vector<1x128x128xbf16>
    %48 = vector.shape_cast %47 : vector<1x128x128xbf16> to vector<128x128xbf16>
    %cst_27 = arith.constant dense<0.000000e+00> : vector<256x128xf32>
    %49 = tpu.matmul %46, %48, %cst_27 {dimension_numbers = #tpu.dot_dimension_numbers<[1], [0], [0], [1], [0, 0, 1, 1], [], []>} : vector<256x128xbf16>, vector<128x128xbf16>, vector<256x128xf32> -> vector<256x128xf32>
    %50 = arith.addf %44, %49 : vector<256x128xf32>
    %51 = vector.extract_strided_slice %1 {offsets = [2, 2, 0], sizes = [16, 16, 128], strides = [1, 1, 1]} : vector<18x18x128xbf16> to vector<16x16x128xbf16>
    %52 = vector.shape_cast %51 : vector<16x16x128xbf16> to vector<256x128xbf16>
    %c8 = arith.constant 8 : index
    %c0_28 = arith.constant 0 : index
    %c0_29 = arith.constant 0 : index
    %53 = vector.load %arg2[%c8, %c0_28, %c0_29] : memref<9x128x128xbf16, #tpu.memory_space<vmem>>, vector<1x128x128xbf16>
    %54 = vector.shape_cast %53 : vector<1x128x128xbf16> to vector<128x128xbf16>
    %cst_30 = arith.constant dense<0.000000e+00> : vector<256x128xf32>
    %55 = tpu.matmul %52, %54, %cst_30 {dimension_numbers = #tpu.dot_dimension_numbers<[1], [0], [0], [1], [0, 0, 1, 1], [], []>} : vector<256x128xbf16>, vector<128x128xbf16>, vector<256x128xf32> -> vector<256x128xf32>
    %56 = arith.addf %50, %55 : vector<256x128xf32>
    %c0_31 = arith.constant 0 : index
    %c0_32 = arith.constant 0 : index
    %57 = vector.load %arg3[%c0_31, %c0_32] : memref<1x128xf32, #tpu.memory_space<vmem>>, vector<1x128xf32>
    %58 = vector.broadcast %57 : vector<1x128xf32> to vector<256x128xf32>
    %59 = arith.addf %56, %58 : vector<256x128xf32>
    %cst_33 = arith.constant 0.000000e+00 : f32
    %60 = vector.broadcast %cst_33 : f32 to vector<256x128xf32>
    %61 = arith.maximumf %59, %60 : vector<256x128xf32>
    %62 = vector.shape_cast %61 : vector<256x128xf32> to vector<1x16x16x128xf32>
    %63 = arith.truncf %62 : vector<1x16x16x128xf32> to vector<1x16x16x128xbf16>
    %c0_34 = arith.constant 0 : index
    %c0_35 = arith.constant 0 : index
    %c0_36 = arith.constant 0 : index
    %c0_37 = arith.constant 0 : index
    %64 = vector.load %arg4[%c0_34, %c0_35, %c0_36, %c0_37] : memref<1x16x16x128xbf16, #tpu.memory_space<vmem>>, vector<1x16x16x128xbf16>
    tpu.vector_store %arg4[%c0_34, %c0_35, %c0_36, %c0_37], %63 {strides = array<i32>} : memref<1x16x16x128xbf16, #tpu.memory_space<vmem>>, vector<1x16x16x128xbf16>,
    return
  }
  func.func @transform_0(%arg0: i32) -> (i32, i32, i32, i32) {
    %c0_i32 = arith.constant 0 : i32
    %c0_i32_0 = arith.constant 0 : i32
    %c0_i32_1 = arith.constant 0 : i32
    %c0_i32_2 = arith.constant 0 : i32
    return %arg0, %c0_i32, %c0_i32_0, %c0_i32_1 : i32, i32, i32, i32
  }
  func.func @transform_1(%arg0: i32) -> (i32, i32, i32) {
    %c0_i32 = arith.constant 0 : i32
    %c0_i32_0 = arith.constant 0 : i32
    %c0_i32_1 = arith.constant 0 : i32
    %c0_i32_2 = arith.constant 0 : i32
    return %c0_i32, %c0_i32_0, %c0_i32_1 : i32, i32, i32
  }
  func.func @transform_2(%arg0: i32) -> (i32, i32) {
    %c0_i32 = arith.constant 0 : i32
    %c0_i32_0 = arith.constant 0 : i32
    %c0_i32_1 = arith.constant 0 : i32
    return %c0_i32, %c0_i32_0 : i32, i32
  }
  func.func @transform_3(%arg0: i32) -> (i32, i32, i32, i32) {
    %c0_i32 = arith.constant 0 : i32
    %c0_i32_0 = arith.constant 0 : i32
    %c0_i32_1 = arith.constant 0 : i32
    %c0_i32_2 = arith.constant 0 : i32
    return %arg0, %c0_i32, %c0_i32_0, %c0_i32_1 : i32, i32, i32, i32
  }
}

module attributes {stable_mosaic.version = 11 : i64} {
  func.func @_conv_kernel(%arg0: i32, %arg1: memref<1x18x18x128xbf16, #tpu.memory_space<vmem>>, %arg2: memref<9x128x128xbf16, #tpu.memory_space<vmem>>, %arg3: memref<1x128xf32, #tpu.memory_space<vmem>>, %arg4: memref<1x16x16x128xbf16, #tpu.memory_space<vmem>>, %arg5: memref<1x16x16x128xbf16, #tpu.memory_space<vmem>>) attributes {dimension_semantics = [#tpu.dimension_semantics<parallel>], iteration_bounds = array<i64: 2>, scalar_prefetch = 0 : i64, scratch_operands = 0 : i64, tpu.core_type = #tpu.core_type<tc>, window_params = [{transform_indices = @transform_0, window_bounds = array<i64: 1, 18, 18, 128>}, {pipeline_mode = #tpu.pipeline_mode<synchronous>, transform_indices = @transform_1, window_bounds = array<i64: 9, 128, 128>}, {pipeline_mode = #tpu.pipeline_mode<synchronous>, transform_indices = @transform_2, window_bounds = array<i64: 1, 128>}, {transform_indices = @transform_3, window_bounds = array<i64: 1, 16, 16, 128>}, {transform_indices = @transform_4, window_bounds = array<i64: 1, 16, 16, 128>}]} {
    %c0 = arith.constant 0 : index
    %c0_0 = arith.constant 0 : index
    %c0_1 = arith.constant 0 : index
    %c0_2 = arith.constant 0 : index
    %0 = vector.load %arg1[%c0, %c0_0, %c0_1, %c0_2] : memref<1x18x18x128xbf16, #tpu.memory_space<vmem>>, vector<1x18x18x128xbf16>
    %1 = vector.shape_cast %0 : vector<1x18x18x128xbf16> to vector<18x18x128xbf16>
    %cst = arith.constant 0.000000e+00 : f32
    %2 = vector.broadcast %cst : f32 to vector<256x128xf32>
    %3 = vector.extract_strided_slice %1 {offsets = [0, 0, 0], sizes = [16, 16, 128], strides = [1, 1, 1]} : vector<18x18x128xbf16> to vector<16x16x128xbf16>
    %4 = vector.shape_cast %3 : vector<16x16x128xbf16> to vector<256x128xbf16>
    %c0_3 = arith.constant 0 : index
    %c0_4 = arith.constant 0 : index
    %c0_5 = arith.constant 0 : index
    %5 = vector.load %arg2[%c0_3, %c0_4, %c0_5] : memref<9x128x128xbf16, #tpu.memory_space<vmem>>, vector<1x128x128xbf16>
    %6 = vector.shape_cast %5 : vector<1x128x128xbf16> to vector<128x128xbf16>
    %cst_6 = arith.constant dense<0.000000e+00> : vector<256x128xf32>
    %7 = tpu.matmul %4, %6, %cst_6 {dimension_numbers = #tpu.dot_dimension_numbers<[1], [0], [0], [1], [0, 0, 1, 1], [], []>} : vector<256x128xbf16>, vector<128x128xbf16>, vector<256x128xf32> -> vector<256x128xf32>
    %8 = arith.addf %2, %7 : vector<256x128xf32>
    %9 = vector.extract_strided_slice %1 {offsets = [0, 1, 0], sizes = [16, 16, 128], strides = [1, 1, 1]} : vector<18x18x128xbf16> to vector<16x16x128xbf16>
    %10 = vector.shape_cast %9 : vector<16x16x128xbf16> to vector<256x128xbf16>
    %c1 = arith.constant 1 : index
    %c0_7 = arith.constant 0 : index
    %c0_8 = arith.constant 0 : index
    %11 = vector.load %arg2[%c1, %c0_7, %c0_8] : memref<9x128x128xbf16, #tpu.memory_space<vmem>>, vector<1x128x128xbf16>
    %12 = vector.shape_cast %11 : vector<1x128x128xbf16> to vector<128x128xbf16>
    %cst_9 = arith.constant dense<0.000000e+00> : vector<256x128xf32>
    %13 = tpu.matmul %10, %12, %cst_9 {dimension_numbers = #tpu.dot_dimension_numbers<[1], [0], [0], [1], [0, 0, 1, 1], [], []>} : vector<256x128xbf16>, vector<128x128xbf16>, vector<256x128xf32> -> vector<256x128xf32>
    %14 = arith.addf %8, %13 : vector<256x128xf32>
    %15 = vector.extract_strided_slice %1 {offsets = [0, 2, 0], sizes = [16, 16, 128], strides = [1, 1, 1]} : vector<18x18x128xbf16> to vector<16x16x128xbf16>
    %16 = vector.shape_cast %15 : vector<16x16x128xbf16> to vector<256x128xbf16>
    %c2 = arith.constant 2 : index
    %c0_10 = arith.constant 0 : index
    %c0_11 = arith.constant 0 : index
    %17 = vector.load %arg2[%c2, %c0_10, %c0_11] : memref<9x128x128xbf16, #tpu.memory_space<vmem>>, vector<1x128x128xbf16>
    %18 = vector.shape_cast %17 : vector<1x128x128xbf16> to vector<128x128xbf16>
    %cst_12 = arith.constant dense<0.000000e+00> : vector<256x128xf32>
    %19 = tpu.matmul %16, %18, %cst_12 {dimension_numbers = #tpu.dot_dimension_numbers<[1], [0], [0], [1], [0, 0, 1, 1], [], []>} : vector<256x128xbf16>, vector<128x128xbf16>, vector<256x128xf32> -> vector<256x128xf32>
    %20 = arith.addf %14, %19 : vector<256x128xf32>
    %21 = vector.extract_strided_slice %1 {offsets = [1, 0, 0], sizes = [16, 16, 128], strides = [1, 1, 1]} : vector<18x18x128xbf16> to vector<16x16x128xbf16>
    %22 = vector.shape_cast %21 : vector<16x16x128xbf16> to vector<256x128xbf16>
    %c3 = arith.constant 3 : index
    %c0_13 = arith.constant 0 : index
    %c0_14 = arith.constant 0 : index
    %23 = vector.load %arg2[%c3, %c0_13, %c0_14] : memref<9x128x128xbf16, #tpu.memory_space<vmem>>, vector<1x128x128xbf16>
    %24 = vector.shape_cast %23 : vector<1x128x128xbf16> to vector<128x128xbf16>
    %cst_15 = arith.constant dense<0.000000e+00> : vector<256x128xf32>
    %25 = tpu.matmul %22, %24, %cst_15 {dimension_numbers = #tpu.dot_dimension_numbers<[1], [0], [0], [1], [0, 0, 1, 1], [], []>} : vector<256x128xbf16>, vector<128x128xbf16>, vector<256x128xf32> -> vector<256x128xf32>
    %26 = arith.addf %20, %25 : vector<256x128xf32>
    %27 = vector.extract_strided_slice %1 {offsets = [1, 1, 0], sizes = [16, 16, 128], strides = [1, 1, 1]} : vector<18x18x128xbf16> to vector<16x16x128xbf16>
    %28 = vector.shape_cast %27 : vector<16x16x128xbf16> to vector<256x128xbf16>
    %c4 = arith.constant 4 : index
    %c0_16 = arith.constant 0 : index
    %c0_17 = arith.constant 0 : index
    %29 = vector.load %arg2[%c4, %c0_16, %c0_17] : memref<9x128x128xbf16, #tpu.memory_space<vmem>>, vector<1x128x128xbf16>
    %30 = vector.shape_cast %29 : vector<1x128x128xbf16> to vector<128x128xbf16>
    %cst_18 = arith.constant dense<0.000000e+00> : vector<256x128xf32>
    %31 = tpu.matmul %28, %30, %cst_18 {dimension_numbers = #tpu.dot_dimension_numbers<[1], [0], [0], [1], [0, 0, 1, 1], [], []>} : vector<256x128xbf16>, vector<128x128xbf16>, vector<256x128xf32> -> vector<256x128xf32>
    %32 = arith.addf %26, %31 : vector<256x128xf32>
    %33 = vector.extract_strided_slice %1 {offsets = [1, 2, 0], sizes = [16, 16, 128], strides = [1, 1, 1]} : vector<18x18x128xbf16> to vector<16x16x128xbf16>
    %34 = vector.shape_cast %33 : vector<16x16x128xbf16> to vector<256x128xbf16>
    %c5 = arith.constant 5 : index
    %c0_19 = arith.constant 0 : index
    %c0_20 = arith.constant 0 : index
    %35 = vector.load %arg2[%c5, %c0_19, %c0_20] : memref<9x128x128xbf16, #tpu.memory_space<vmem>>, vector<1x128x128xbf16>
    %36 = vector.shape_cast %35 : vector<1x128x128xbf16> to vector<128x128xbf16>
    %cst_21 = arith.constant dense<0.000000e+00> : vector<256x128xf32>
    %37 = tpu.matmul %34, %36, %cst_21 {dimension_numbers = #tpu.dot_dimension_numbers<[1], [0], [0], [1], [0, 0, 1, 1], [], []>} : vector<256x128xbf16>, vector<128x128xbf16>, vector<256x128xf32> -> vector<256x128xf32>
    %38 = arith.addf %32, %37 : vector<256x128xf32>
    %39 = vector.extract_strided_slice %1 {offsets = [2, 0, 0], sizes = [16, 16, 128], strides = [1, 1, 1]} : vector<18x18x128xbf16> to vector<16x16x128xbf16>
    %40 = vector.shape_cast %39 : vector<16x16x128xbf16> to vector<256x128xbf16>
    %c6 = arith.constant 6 : index
    %c0_22 = arith.constant 0 : index
    %c0_23 = arith.constant 0 : index
    %41 = vector.load %arg2[%c6, %c0_22, %c0_23] : memref<9x128x128xbf16, #tpu.memory_space<vmem>>, vector<1x128x128xbf16>
    %42 = vector.shape_cast %41 : vector<1x128x128xbf16> to vector<128x128xbf16>
    %cst_24 = arith.constant dense<0.000000e+00> : vector<256x128xf32>
    %43 = tpu.matmul %40, %42, %cst_24 {dimension_numbers = #tpu.dot_dimension_numbers<[1], [0], [0], [1], [0, 0, 1, 1], [], []>} : vector<256x128xbf16>, vector<128x128xbf16>, vector<256x128xf32> -> vector<256x128xf32>
    %44 = arith.addf %38, %43 : vector<256x128xf32>
    %45 = vector.extract_strided_slice %1 {offsets = [2, 1, 0], sizes = [16, 16, 128], strides = [1, 1, 1]} : vector<18x18x128xbf16> to vector<16x16x128xbf16>
    %46 = vector.shape_cast %45 : vector<16x16x128xbf16> to vector<256x128xbf16>
    %c7 = arith.constant 7 : index
    %c0_25 = arith.constant 0 : index
    %c0_26 = arith.constant 0 : index
    %47 = vector.load %arg2[%c7, %c0_25, %c0_26] : memref<9x128x128xbf16, #tpu.memory_space<vmem>>, vector<1x128x128xbf16>
    %48 = vector.shape_cast %47 : vector<1x128x128xbf16> to vector<128x128xbf16>
    %cst_27 = arith.constant dense<0.000000e+00> : vector<256x128xf32>
    %49 = tpu.matmul %46, %48, %cst_27 {dimension_numbers = #tpu.dot_dimension_numbers<[1], [0], [0], [1], [0, 0, 1, 1], [], []>} : vector<256x128xbf16>, vector<128x128xbf16>, vector<256x128xf32> -> vector<256x128xf32>
    %50 = arith.addf %44, %49 : vector<256x128xf32>
    %51 = vector.extract_strided_slice %1 {offsets = [2, 2, 0], sizes = [16, 16, 128], strides = [1, 1, 1]} : vector<18x18x128xbf16> to vector<16x16x128xbf16>
    %52 = vector.shape_cast %51 : vector<16x16x128xbf16> to vector<256x128xbf16>
    %c8 = arith.constant 8 : index
    %c0_28 = arith.constant 0 : index
    %c0_29 = arith.constant 0 : index
    %53 = vector.load %arg2[%c8, %c0_28, %c0_29] : memref<9x128x128xbf16, #tpu.memory_space<vmem>>, vector<1x128x128xbf16>
    %54 = vector.shape_cast %53 : vector<1x128x128xbf16> to vector<128x128xbf16>
    %cst_30 = arith.constant dense<0.000000e+00> : vector<256x128xf32>
    %55 = tpu.matmul %52, %54, %cst_30 {dimension_numbers = #tpu.dot_dimension_numbers<[1], [0], [0], [1], [0, 0, 1, 1], [], []>} : vector<256x128xbf16>, vector<128x128xbf16>, vector<256x128xf32> -> vector<256x128xf32>
    %56 = arith.addf %50, %55 : vector<256x128xf32>
    %c0_31 = arith.constant 0 : index
    %c0_32 = arith.constant 0 : index
    %57 = vector.load %arg3[%c0_31, %c0_32] : memref<1x128xf32, #tpu.memory_space<vmem>>, vector<1x128xf32>
    %58 = vector.broadcast %57 : vector<1x128xf32> to vector<256x128xf32>
    %59 = arith.addf %56, %58 : vector<256x128xf32>
    %c0_33 = arith.constant 0 : index
    %c0_34 = arith.constant 0 : index
    %c0_35 = arith.constant 0 : index
    %c0_36 = arith.constant 0 : index
    %60 = vector.load %arg4[%c0_33, %c0_34, %c0_35, %c0_36] : memref<1x16x16x128xbf16, #tpu.memory_space<vmem>>, vector<1x16x16x128xbf16>
    %61 = vector.shape_cast %60 : vector<1x16x16x128xbf16> to vector<16x16x128xbf16>
    %62 = vector.shape_cast %61 : vector<16x16x128xbf16> to vector<256x128xbf16>
    %63 = arith.extf %62 : vector<256x128xbf16> to vector<256x128xf32>
    %64 = arith.addf %59, %63 : vector<256x128xf32>
    %cst_37 = arith.constant 0.000000e+00 : f32
    %65 = vector.broadcast %cst_37 : f32 to vector<256x128xf32>
    %66 = arith.maximumf %64, %65 : vector<256x128xf32>
    %67 = vector.shape_cast %66 : vector<256x128xf32> to vector<1x16x16x128xf32>
    %68 = arith.truncf %67 : vector<1x16x16x128xf32> to vector<1x16x16x128xbf16>
    %c0_38 = arith.constant 0 : index
    %c0_39 = arith.constant 0 : index
    %c0_40 = arith.constant 0 : index
    %c0_41 = arith.constant 0 : index
    %69 = vector.load %arg5[%c0_38, %c0_39, %c0_40, %c0_41] : memref<1x16x16x128xbf16, #tpu.memory_space<vmem>>, vector<1x16x16x128xbf16>
    tpu.vector_store %arg5[%c0_38, %c0_39, %c0_40, %c0_41], %68 {strides = array<i32>} : memref<1x16x16x128xbf16, #tpu.memory_space<vmem>>, vector<1x16x16x128xbf16>,
    return
  }
  func.func @transform_0(%arg0: i32) -> (i32, i32, i32, i32) {
    %c0_i32 = arith.constant 0 : i32
    %c0_i32_0 = arith.constant 0 : i32
    %c0_i32_1 = arith.constant 0 : i32
    %c0_i32_2 = arith.constant 0 : i32
    return %arg0, %c0_i32, %c0_i32_0, %c0_i32_1 : i32, i32, i32, i32
  }
  func.func @transform_1(%arg0: i32) -> (i32, i32, i32) {
    %c0_i32 = arith.constant 0 : i32
    %c0_i32_0 = arith.constant 0 : i32
    %c0_i32_1 = arith.constant 0 : i32
    %c0_i32_2 = arith.constant 0 : i32
    return %c0_i32, %c0_i32_0, %c0_i32_1 : i32, i32, i32
  }
  func.func @transform_2(%arg0: i32) -> (i32, i32) {
    %c0_i32 = arith.constant 0 : i32
    %c0_i32_0 = arith.constant 0 : i32
    %c0_i32_1 = arith.constant 0 : i32
    return %c0_i32, %c0_i32_0 : i32, i32
  }
  func.func @transform_3(%arg0: i32) -> (i32, i32, i32, i32) {
    %c0_i32 = arith.constant 0 : i32
    %c0_i32_0 = arith.constant 0 : i32
    %c0_i32_1 = arith.constant 0 : i32
    %c0_i32_2 = arith.constant 0 : i32
    return %arg0, %c0_i32, %c0_i32_0, %c0_i32_1 : i32, i32, i32, i32
  }
  func.func @transform_4(%arg0: i32) -> (i32, i32, i32, i32) {
    %c0_i32 = arith.constant 0 : i32
    %c0_i32_0 = arith.constant 0 : i32
    %c0_i32_1 = arith.constant 0 : i32
    %c0_i32_2 = arith.constant 0 : i32
    return %arg0, %c0_i32, %c0_i32_0, %c0_i32_1 : i32, i32, i32, i32
  }
}

module attributes {stable_mosaic.version = 11 : i64} {
  func.func @_proj_gap_kernel(%arg0: i32, %arg1: i32, %arg2: memref<1x128x128xbf16, #tpu.memory_space<vmem>>, %arg3: memref<128x128xbf16, #tpu.memory_space<vmem>>, %arg4: memref<1x128xf32, #tpu.memory_space<vmem>>, %arg5: memref<128x128xbf16, #tpu.memory_space<vmem>>, %arg6: memref<1x128xf32, #tpu.memory_space<vmem>>, %arg7: memref<1x1x128xf32, #tpu.memory_space<vmem>>, %arg8: memref<1x128xf32, #tpu.memory_space<vmem>>) attributes {dimension_semantics = [#tpu.dimension_semantics<parallel>, #tpu.dimension_semantics<arbitrary>], iteration_bounds = array<i64: 2, 2>, scalar_prefetch = 0 : i64, scratch_operands = 1 : i64, tpu.core_type = #tpu.core_type<tc>, window_params = [{transform_indices = @transform_0, window_bounds = array<i64: 1, 128, 128>}, {pipeline_mode = #tpu.pipeline_mode<synchronous>, transform_indices = @transform_1, window_bounds = array<i64: 128, 128>}, {pipeline_mode = #tpu.pipeline_mode<synchronous>, transform_indices = @transform_2, window_bounds = array<i64: 1, 128>}, {pipeline_mode = #tpu.pipeline_mode<synchronous>, transform_indices = @transform_3, window_bounds = array<i64: 128, 128>}, {pipeline_mode = #tpu.pipeline_mode<synchronous>, transform_indices = @transform_4, window_bounds = array<i64: 1, 128>}, {transform_indices = @transform_5, window_bounds = array<i64: 1, 1, 128>}]} {
    %c0_i32 = arith.constant 0 : i32
    %0 = arith.cmpi eq, %arg1, %c0_i32 : i32
    %1 = arith.extui %0 : i1 to i32
    %c0_i32_0 = arith.constant 0 : i32
    %2 = arith.cmpi ne, %1, %c0_i32_0 : i32
    scf.if %2 {
      %cst_14 = arith.constant 0.000000e+00 : f32
      %20 = vector.broadcast %cst_14 : f32 to vector<1x128xf32>
      %c0_15 = arith.constant 0 : index
      %c0_16 = arith.constant 0 : index
      %21 = vector.load %arg8[%c0_15, %c0_16] : memref<1x128xf32, #tpu.memory_space<vmem>>, vector<1x128xf32>
      tpu.vector_store %arg8[%c0_15, %c0_16], %20 {strides = array<i32>} : memref<1x128xf32, #tpu.memory_space<vmem>>, vector<1x128xf32>,
    } else {
    }
    %c0 = arith.constant 0 : index
    %c0_1 = arith.constant 0 : index
    %c0_2 = arith.constant 0 : index
    %3 = vector.load %arg2[%c0, %c0_1, %c0_2] : memref<1x128x128xbf16, #tpu.memory_space<vmem>>, vector<1x128x128xbf16>
    %4 = vector.shape_cast %3 : vector<1x128x128xbf16> to vector<128x128xbf16>
    %c0_3 = arith.constant 0 : index
    %c0_4 = arith.constant 0 : index
    %5 = vector.load %arg3[%c0_3, %c0_4] : memref<128x128xbf16, #tpu.memory_space<vmem>>, vector<128x128xbf16>
    %cst = arith.constant dense<0.000000e+00> : vector<128x128xf32>
    %6 = tpu.matmul %4, %5, %cst {dimension_numbers = #tpu.dot_dimension_numbers<[1], [0], [0], [1], [0, 0, 1, 1], [], []>} : vector<128x128xbf16>, vector<128x128xbf16>, vector<128x128xf32> -> vector<128x128xf32>
    %c0_5 = arith.constant 0 : index
    %c0_6 = arith.constant 0 : index
    %7 = vector.load %arg4[%c0_5, %c0_6] : memref<1x128xf32, #tpu.memory_space<vmem>>, vector<1x128xf32>
    %8 = vector.broadcast %7 : vector<1x128xf32> to vector<128x128xf32>
    %9 = arith.addf %6, %8 : vector<128x128xf32>
    %cst_7 = arith.constant 0.000000e+00 : f32
    %10 = vector.broadcast %cst_7 : f32 to vector<128x128xf32>
    %11 = arith.maximumf %9, %10 : vector<128x128xf32>
    %c0_8 = arith.constant 0 : index
    %c0_9 = arith.constant 0 : index
    %12 = vector.load %arg8[%c0_8, %c0_9] : memref<1x128xf32, #tpu.memory_space<vmem>>, vector<1x128xf32>
    %cst_10 = arith.constant dense<0.000000e+00> : vector<128xf32>
    %13 = vector.multi_reduction <add>, %11, %cst_10 [0] : vector<128x128xf32> to vector<128xf32>
    %14 = vector.shape_cast %13 : vector<128xf32> to vector<1x128xf32>
    %15 = arith.addf %12, %14 : vector<1x128xf32>
    %c0_11 = arith.constant 0 : index
    %c0_12 = arith.constant 0 : index
    %16 = vector.load %arg8[%c0_11, %c0_12] : memref<1x128xf32, #tpu.memory_space<vmem>>, vector<1x128xf32>
    tpu.vector_store %arg8[%c0_11, %c0_12], %15 {strides = array<i32>} : memref<1x128xf32, #tpu.memory_space<vmem>>, vector<1x128xf32>,
    %c1_i32 = arith.constant 1 : i32
    %17 = arith.cmpi eq, %arg1, %c1_i32 : i32
    %18 = arith.extui %17 : i1 to i32
    %c0_i32_13 = arith.constant 0 : i32
    %19 = arith.cmpi ne, %18, %c0_i32_13 : i32
    scf.if %19 {
      %c0_14 = arith.constant 0 : index
      %c0_15 = arith.constant 0 : index
      %20 = vector.load %arg8[%c0_14, %c0_15] : memref<1x128xf32, #tpu.memory_space<vmem>>, vector<1x128xf32>
      %cst_16 = arith.constant 3.906250e-03 : f32
      %21 = vector.broadcast %cst_16 : f32 to vector<1x128xf32>
      %22 = arith.mulf %20, %21 : vector<1x128xf32>
      %23 = arith.truncf %22 : vector<1x128xf32> to vector<1x128xbf16>
      %c0_17 = arith.constant 0 : index
      %c0_18 = arith.constant 0 : index
      %24 = vector.load %arg5[%c0_17, %c0_18] : memref<128x128xbf16, #tpu.memory_space<vmem>>, vector<128x128xbf16>
      %cst_19 = arith.constant dense<0.000000e+00> : vector<1x128xf32>
      %25 = tpu.matmul %23, %24, %cst_19 {dimension_numbers = #tpu.dot_dimension_numbers<[1], [0], [0], [1], [0, 0, 1, 1], [], []>} : vector<1x128xbf16>, vector<128x128xbf16>, vector<1x128xf32> -> vector<1x128xf32>
      %c0_20 = arith.constant 0 : index
      %c0_21 = arith.constant 0 : index
      %26 = vector.load %arg6[%c0_20, %c0_21] : memref<1x128xf32, #tpu.memory_space<vmem>>, vector<1x128xf32>
      %27 = arith.addf %25, %26 : vector<1x128xf32>
      %28 = vector.shape_cast %27 : vector<1x128xf32> to vector<1x1x128xf32>
      %c0_22 = arith.constant 0 : index
      %c0_23 = arith.constant 0 : index
      %c0_24 = arith.constant 0 : index
      %29 = vector.load %arg7[%c0_22, %c0_23, %c0_24] : memref<1x1x128xf32, #tpu.memory_space<vmem>>, vector<1x1x128xf32>
      tpu.vector_store %arg7[%c0_22, %c0_23, %c0_24], %28 {strides = array<i32>} : memref<1x1x128xf32, #tpu.memory_space<vmem>>, vector<1x1x128xf32>,
    } else {
    }
    return
  }
  func.func @transform_0(%arg0: i32, %arg1: i32) -> (i32, i32, i32) {
    %c0_i32 = arith.constant 0 : i32
    %c0_i32_0 = arith.constant 0 : i32
    return %arg0, %arg1, %c0_i32 : i32, i32, i32
  }
  func.func @transform_1(%arg0: i32, %arg1: i32) -> (i32, i32) {
    %c0_i32 = arith.constant 0 : i32
    %c0_i32_0 = arith.constant 0 : i32
    %c0_i32_1 = arith.constant 0 : i32
    return %c0_i32, %c0_i32_0 : i32, i32
  }
  func.func @transform_2(%arg0: i32, %arg1: i32) -> (i32, i32) {
    %c0_i32 = arith.constant 0 : i32
    %c0_i32_0 = arith.constant 0 : i32
    %c0_i32_1 = arith.constant 0 : i32
    return %c0_i32, %c0_i32_0 : i32, i32
  }
  func.func @transform_3(%arg0: i32, %arg1: i32) -> (i32, i32) {
    %c0_i32 = arith.constant 0 : i32
    %c0_i32_0 = arith.constant 0 : i32
    %c0_i32_1 = arith.constant 0 : i32
    return %c0_i32, %c0_i32_0 : i32, i32
  }
  func.func @transform_4(%arg0: i32, %arg1: i32) -> (i32, i32) {
    %c0_i32 = arith.constant 0 : i32
    %c0_i32_0 = arith.constant 0 : i32
    %c0_i32_1 = arith.constant 0 : i32
    return %c0_i32, %c0_i32_0 : i32, i32
  }
  func.func @transform_5(%arg0: i32, %arg1: i32) -> (i32, i32, i32) {
    %c0_i32 = arith.constant 0 : i32
    %c0_i32_0 = arith.constant 0 : i32
    %c0_i32_1 = arith.constant 0 : i32
    return %arg0, %c0_i32, %c0_i32_0 : i32, i32, i32
  }
}

</mosaic_0001>

<bundles_post_ra>
// kernel: resnet_forward.7
= control target key start
LH: loop header
LB: loop body
LE: loop exit
PB: predicated region body
PF: predicated region fallthrough
CT: control target
= control target key end

     0   :  { %10 = vsyncpa [#allocation4], 0  ;;  %s1286_s0 = inlined_call_operand.vmem [shape: bf16[2,256,128], index: 0, kind: input, shape index: {}]   ;;  %s1287_s1 = inlined_call_operand.vmem [shape: bf16[128,128], index: 1, kind: input, shape index: {}]   ;;  %s1288_s2 = inlined_call_operand.vmem [shape: f32[1,128], index: 2, kind: input, shape index: {}]   ;;  %s1289_s3 = inlined_call_operand.vmem [shape: bf16[128,128], index: 3, kind: input, shape index: {}]   ;;  %s1290_s4 = inlined_call_operand.vmem [shape: f32[1,128], index: 4, kind: input, shape index: {}]   ;;  %s1291_s5 = inlined_call_operand.hbm [shape: f32[2,1,128], index: 5, kind: output, shape index: {}]  }
   0x1   :  { %12 = vsyncpa [#allocation4 + $0x1], 0  ;;  %s1085_s18 = smov 0   ;;  %s1087_s19 = smov 0  }
   0x2   :  { %s1089_s20 = smov 0   ;;  %s1091_s21 = smov 0  }
   0x3   :  { %s1093_s22 = smov 0   ;;  %s1095_s23 = smov 0  }
   0x4   :  { %s1097_s24 = smov 0   ;;  %s1099_s25 = smov 0  }
   0x5 LB: > { %s726_s26 = sadd.s32 4294967295, %s1049_s25   ;;  %s727_s27 = sadd.s32 4294967294, %s1049_s25   ;;  %s1049_s25 = sphi %s1099_s25, %s18_s25   ;;  %s1045_s24 = sphi %s1097_s24, %s1300_s24   ;;  %s1041_s23 = sphi %s1095_s23, %s1299_s23   ;;  %s1037_s22 = sphi %s1093_s22, %s1298_s22   ;;  %s1033_s21 = sphi %s1091_s21, %s1297_s21   ;;  %s1029_s20 = sphi %s1089_s20, %s1296_s20   ;;  %s1025_s19 = sphi %s1087_s19, %s1295_s19   ;;  %s1021_s18 = sphi %s1085_s18, %s1294_s18  }
   0x6   : > { %s27_s28 = sadd.s32 1, %s1041_s23  ;;  %s30_s29 = sadd.s32 1, %s1045_s24 }
   0x7   : > { %p28_p0 = scmp.ge.s32.totalorder %s27_s28, 2  ;;  %p159_p1 = scmp.ne.s32.totalorder %s1029_s20, %s1025_s19 }
   0x8   : > { %p160_p2 = scmp.eq.s32.totalorder %s726_s26, 3  ;;  %p165_p4 = scmp.ne.s32.totalorder %s1025_s19, %s1021_s18 }
   0x9   : > { %s1302_s28 = smov (%p28_p0, %s27_s28), 0  ;;  %s1304_s29 = smov (!%p28_p0, %s30_s29), %s1045_s24 }
   0xa   : > { %p1134_p3 = por %p160_p2, %p159_p1  ;;  %p32_p5 = scmp.ge.s32.totalorder %s1304_s29, 2 }
   0xb   : > { %p166_p6 = scmp.eq.s32.totalorder %s727_s27, 3  ;;  %p730_p7 = scmp.ge.s32.totalorder %s1049_s25, 1 }
   0xc   : > { %p209_p8 = scmp.lt.s32.totalorder %s1049_s25, 5  ;;  %s1306_s29 = smov (%p32_p5, %s1304_s29), 0 }
   0xd   : > { %p1144_p9 = por %p166_p6, %p165_p4  ;;  %s146_s7 = ssub.s32 %s1045_s24, %s1306_s29 }
   0xe   : > { %p210_p10 = pnand %p730_p7, %p209_p8  ;;  %s149_s8 = sadd.s32 1, %s1029_s20 }
   0xf   : > { %p147_p11 = scmp.eq.s32.totalorder %s146_s7, 0  ;;  %s238_s10 = sand.u32 (!%p210_p10), 1, %s1025_s19  }
  0x10   : > { %213 = sbr.rel (%p210_p10) target bundleno = 578 (0x242), region = 40  ;;  %s731_s11 = sshll.u32 (!%p210_p10), %s1033_s21, 4 }
  0x11   : > { %s1152_s9 = scalar_select %p147_p11, %s1029_s20, %s149_s8  }
  0x12   : > { %p241_p12 = scmp.lt.s32.totalorder (!%p210_p10), %s1037_s22, 1  ;;  %p243_p13 = scmp.lt.s32.totalorder (!%p210_p10), %s731_s11, 31 }
  0x13   : > { %s1165_s27 = scalar_lea.vmem (!%p210_p10), [#allocation3], %s238_s10  ;;  %p734_p0 = scmp.ne.s32.totalorder (!%p210_p10), %s1033_s21, 0 }
  0x17   : > { %s242_s12 = scalar_select %p241_p12, %s1037_s22, 1 }
  0x18   : > { %s1308_s11 = smov (!%p243_p13, %s731_s11), 31  ;;  %254 = sbr.rel (%p734_p0) target bundleno = 31 (0x1f), region = 44 }
  0x19   : > { %s732_s13 = sshll.u32 %s242_s12, 5  ;;  %v1051_v0 = vmov (!%p734_p0), 0.0  }
  0x1a   : > { %s246_s14 = sadd.s32 %s732_s13, %s1308_s11  ;;  %255 = vst [vmem:[#allocation2] sm:$0x1] (!%p734_p0), %v1051_v0 }
  0x1b   : > { %s733_s15 = sshll.u32 %s246_s14, 2 }
  0x1c   : > { %s1161_s26 = scalar_lea.vmem %s1286_s0, %s733_s15 }
  0x1f PF: > { %v931_v1 = vld [vmem:[%s1287_s1] sm:$0xff]   ;;  %v932_v2 = vld [vmem:[%s1287_s1 + $0x8] sm:$0xff]   ;;  %v933_v3 = vld [vmem:[%s1287_s1 + $0x10] sm:$0xff]   ;;  %p752_p1 = scmp.ne.s32.totalorder %s1033_s21, 1 }
  0x20   : > { %789 = vmatprep.subr.bf16.mxu0 %v931_v1  ;;  %841 = vmatprep.subr.bf16.mxu1 %v931_v1  ;;  %v934_v4 = vld [vmem:[%s1287_s1 + $0x18] sm:$0xff]   ;;  %v939_v5 = vld [vmem:[%s1161_s26] sm:$0xff]   ;;  %v936_v8 = vld [vmem:[%s1287_s1 + $0x28] sm:$0xff]   ;;  %vm1053_vm0 = vmmov (!%p752_p1), 0  }
  0x21   : > { %790 = vmatpush3.bf16.msra.mxu0 %v931_v1  ;;  %849 = vmatpush3.bf16.msra.mxu1 %v931_v1  ;;  %v935_v6 = vld [vmem:[%s1287_s1 + $0x20] sm:$0xff]   ;;  %v937_v9 = vld [vmem:[%s1287_s1 + $0x30] sm:$0xff]   ;;  %v938_v10 = vld [vmem:[%s1287_s1 + $0x38] sm:$0xff]  }
  0x22   : > { %791 = vmatprep.subr.bf16.mxu0 %v932_v2  ;;  %842 = vmatprep.subr.bf16.mxu1 %v932_v2  ;;  %v943_v7 = vld [vmem:[%s1161_s26 + $0x20] sm:$0xff]   ;;  %v940_v11 = vld [vmem:[%s1161_s26 + $0x8] sm:$0xff]   ;;  %v941_v13 = vld [vmem:[%s1161_s26 + $0x10] sm:$0xff]  }
  0x23   : > { %805 = vmatprep.mubr.bf16.mxu0 %v939_v5  ;;  %813 = vmatprep.mubr.bf16.mxu1 %v943_v7  ;;  %v944_v12 = vld [vmem:[%s1161_s26 + $0x28] sm:$0xff]   ;;  %v945_v14 = vld [vmem:[%s1161_s26 + $0x30] sm:$0xff]   ;;  %v942_v15 = vld [vmem:[%s1161_s26 + $0x18] sm:$0xff]  }
  0x24   : > { %v946_v16 = vld [vmem:[%s1161_s26 + $0x38] sm:$0xff]   ;;  %v735_v17 = vld [vmem:[%s1288_s2] ss:$0 sm:$0xff] }
  0x25   : > { %792 = vmatpush3.bf16.msra.mxu0 %v932_v2  ;;  %850 = vmatpush3.bf16.msra.mxu1 %v932_v2 }
  0x26   : > { %793 = vmatprep.subr.bf16.mxu0 %v933_v3  ;;  %843 = vmatprep.subr.bf16.mxu1 %v933_v3 }
  0x29   : > { %794 = vmatpush3.bf16.msra.mxu0 %v933_v3  ;;  %851 = vmatpush3.bf16.msra.mxu1 %v933_v3 }
  0x2a   : > { %795 = vmatprep.subr.bf16.mxu0 %v934_v4  ;;  %844 = vmatprep.subr.bf16.mxu1 %v934_v4 }
  0x2d   : > { %796 = vmatpush3.bf16.msra.mxu0 %v934_v4  ;;  %852 = vmatpush3.bf16.msra.mxu1 %v934_v4 }
  0x2e   : > { %797 = vmatprep.subr.bf16.mxu0 %v935_v6  ;;  %845 = vmatprep.subr.bf16.mxu1 %v935_v6 }
  0x31   : > { %798 = vmatpush3.bf16.msra.mxu0 %v935_v6  ;;  %853 = vmatpush3.bf16.msra.mxu1 %v935_v6 }
  0x32   : > { %799 = vmatprep.subr.bf16.mxu0 %v936_v8  ;;  %846 = vmatprep.subr.bf16.mxu1 %v936_v8 }
  0x35   : > { %800 = vmatpush3.bf16.msra.mxu0 %v936_v8  ;;  %854 = vmatpush3.bf16.msra.mxu1 %v936_v8 }
  0x36   : > { %801 = vmatprep.subr.bf16.mxu0 %v937_v9  ;;  %847 = vmatprep.subr.bf16.mxu1 %v937_v9 }
  0x39   : > { %802 = vmatpush3.bf16.msra.mxu0 %v937_v9  ;;  %855 = vmatpush3.bf16.msra.mxu1 %v937_v9 }
  0x3a   : > { %803 = vmatprep.subr.bf16.mxu0 %v938_v10  ;;  %848 = vmatprep.subr.bf16.mxu1 %v938_v10 }
  0x3d   : > { %804 = vmatpush3.bf16.msra.mxu0 %v938_v10  ;;  %856 = vmatpush3.bf16.msra.mxu1 %v938_v10 }
  0x40   : > { %806 = vmatmul.mubr.bf16.vlgmr.msra.gmra.mrb[0].mxu0 %v940_v11  ;;  %814 = vmatmul.mubr.bf16.vlgmr.msra.gmra.mrb[0].mxu1 %v944_v12 }
  0x41   : > { %809 = vmatprep.mubr.bf16.mxu0 %v941_v13  ;;  %817 = vmatprep.mubr.bf16.mxu1 %v945_v14 }
  0x48   : > { %810 = vmatmul.mubr.bf16.gmra.mrb[4].mxu0 %v942_v15  ;;  %818 = vmatmul.mubr.bf16.gmra.mrb[4].mxu1 %v946_v16 }
 0x113   : > { %v807_v18 = vpop.f32.mrb[0].mxu0  ;;  %v815_v19 = vpop.f32.mrb[0].mxu1 }
 0x114   : > { %v425_v20 = vpop.f32.mrb[1].mxu0  ;;  %v457_v21 = vpop.f32.mrb[1].mxu1  ;;  %v434_v27 = vadd.f32 %v807_v18, %v735_v17  ;;  %v466_v59 = vadd.f32 %v815_v19, %v735_v17 }
 0x115   : > { %v426_v22 = vadd.f32 %v735_v17, %v425_v20  ;;  %v808_v23 = vpop.f32.mrb[2].mxu0  ;;  %v816_v24 = vpop.f32.mrb[2].mxu1  ;;  %v458_v52 = vadd.f32 %v735_v17, %v457_v21 }
 0x116   : > { %v428_v25 = vpop.f32.mrb[3].mxu0  ;;  %v460_v26 = vpop.f32.mrb[3].mxu1  ;;  %v437_v30 = vadd.f32 %v808_v23, %v735_v17  ;;  %v490_v32 = vmax.f32 %v434_v27, 0.0  ;;  %v469_v62 = vadd.f32 %v816_v24, %v735_v17  ;;  %v498_v1 = vmax.f32 %v466_v59, 0.0  ;;  %v504_v23 = vld [vmem:[#allocation2] sm:$0x1] }
 0x117   : > { %v429_v28 = vadd.f32 %v735_v17, %v428_v25  ;;  %v488_v29 = vmax.f32 %v426_v22, 0.0  ;;  %v496_v57 = vmax.f32 %v458_v52, 0.0  ;;  %v461_v58 = vadd.f32 %v735_v17, %v460_v26  ;;  %v948_v27 = vld [vmem:[%s1289_s3 + $0x8] sm:$0xff] (!%p752_p1)  }
 0x118   : > { %v491_v38 = vmax.f32 %v437_v30, 0.0  ;;  %v499_v3 = vmax.f32 %v469_v62, 0.0  ;;  %v1052_v26 = vmov (!%p752_p1), 0.0   ;;  %v951_v30 = vld [vmem:[%s1289_s3 + $0x20] sm:$0xff] (!%p752_p1)  }
 0x119   : > { %v489_v31 = vmax.f32 %v429_v28, 0.0  ;;  %v497_v63 = vmax.f32 %v461_v58, 0.0  ;;  %821 = vmatprep.subr.bf16.mxu0 (!%p752_p1), %v1052_v26  ;;  %837 = vmatprep.mubr.msk.bf16.mxu0 (!%p752_p1), %vm1053_vm0, %v1052_v26  ;;  %v949_v28 = vld [vmem:[%s1289_s3 + $0x10] sm:$0xff] (!%p752_p1)  }
 0x11b   : > { %v505_v33 = vadd.f32 %v489_v31, %v488_v29  ;;  %v811_v34 = vpop.f32.mrb[4].mxu0  ;;  %v819_v35 = vpop.f32.mrb[4].mxu1  ;;  %v950_v29 = vld [vmem:[%s1289_s3 + $0x18] sm:$0xff] (!%p752_p1)   ;;  %v952_v31 = vld [vmem:[%s1289_s3 + $0x28] sm:$0xff] (!%p752_p1)  }
 0x11c   : > { %v441_v36 = vpop.f32.mrb[5].mxu0  ;;  %v473_v37 = vpop.f32.mrb[5].mxu1  ;;  %v450_v45 = vadd.f32 %v811_v34, %v735_v17  ;;  %v482_v7 = vadd.f32 %v819_v35, %v735_v17  ;;  %v954_v35 = vld [vmem:[%s1289_s3 + $0x38] sm:$0xff] (!%p752_p1)  }
 0x11d   : > { %v506_v39 = vadd.f32 %v505_v33, %v490_v32  ;;  %v442_v40 = vadd.f32 %v735_v17, %v441_v36  ;;  %v812_v41 = vpop.f32.mrb[6].mxu0  ;;  %v820_v42 = vpop.f32.mrb[6].mxu1  ;;  %v474_v0 = vadd.f32 %v735_v17, %v473_v37  ;;  %v953_v32 = vld [vmem:[%s1289_s3 + $0x30] sm:$0xff] (!%p752_p1)   ;;  %v551_v37 = vld [vmem:[%s1290_s4] sm:$0x1] (!%p752_p1) }
 0x11e   : > { %v444_v43 = vpop.f32.mrb[7].mxu0  ;;  %v476_v44 = vpop.f32.mrb[7].mxu1  ;;  %v453_v50 = vadd.f32 %v812_v41, %v735_v17  ;;  %v494_v53 = vmax.f32 %v450_v45, 0.0  ;;  %v485_v10 = vadd.f32 %v820_v42, %v735_v17  ;;  %v502_v12 = vmax.f32 %v482_v7, 0.0 }
 0x11f   : > { %v492_v46 = vmax.f32 %v442_v40, 0.0  ;;  %v507_v47 = vadd.f32 %v506_v39, %v491_v38  ;;  %v445_v48 = vadd.f32 %v735_v17, %v444_v43  ;;  %v500_v5 = vmax.f32 %v474_v0, 0.0 }
 0x120   : > { %v495_v55 = vmax.f32 %v453_v50, 0.0  ;;  %v477_v6 = vadd.f32 %v735_v17, %v476_v44  ;;  %v503_v14 = vmax.f32 %v485_v10, 0.0  ;;  %v947_v17 = vld [vmem:[%s1289_s3] sm:$0xff] (!%p752_p1)  }
 0x121   : > { %v508_v49 = vadd.f32 %v507_v47, %v492_v46  ;;  %v493_v51 = vmax.f32 %v445_v48, 0.0  ;;  %822 = vmatpush3.bf16.msra.mxu0 (!%p752_p1), %v947_v17 }
 0x122   : > { %v501_v11 = vmax.f32 %v477_v6, 0.0  ;;  %823 = vmatprep.subr.bf16.mxu0 (!%p752_p1), %v1052_v26 }
 0x123   : > { %v509_v54 = vadd.f32 %v508_v49, %v493_v51 }
 0x125   : > { %v510_v56 = vadd.f32 %v509_v54, %v494_v53  ;;  %824 = vmatpush3.bf16.msra.mxu0 (!%p752_p1), %v948_v27 }
 0x126   : > { %825 = vmatprep.subr.bf16.mxu0 (!%p752_p1), %v1052_v26 }
 0x127   : > { %v511_v60 = vadd.f32 %v510_v56, %v495_v55 }
 0x129   : > { %v512_v61 = vadd.f32 %v511_v60, %v496_v57  ;;  %826 = vmatpush3.bf16.msra.mxu0 (!%p752_p1), %v949_v28 }
 0x12a   : > { %827 = vmatprep.subr.bf16.mxu0 (!%p752_p1), %v1052_v26 }
 0x12b   : > { %v513_v2 = vadd.f32 %v512_v61, %v497_v63 }
 0x12d   : > { %v514_v4 = vadd.f32 %v513_v2, %v498_v1  ;;  %828 = vmatpush3.bf16.msra.mxu0 (!%p752_p1), %v950_v29 }
 0x12e   : > { %829 = vmatprep.subr.bf16.mxu0 (!%p752_p1), %v1052_v26 }
 0x12f   : > { %v515_v8 = vadd.f32 %v514_v4, %v499_v3 }
 0x131   : > { %v516_v9 = vadd.f32 %v515_v8, %v500_v5  ;;  %830 = vmatpush3.bf16.msra.mxu0 (!%p752_p1), %v951_v30 }
 0x132   : > { %831 = vmatprep.subr.bf16.mxu0 (!%p752_p1), %v1052_v26 }
 0x133   : > { %v517_v13 = vadd.f32 %v516_v9, %v501_v11 }
 0x135   : > { %v518_v15 = vadd.f32 %v517_v13, %v502_v12  ;;  %832 = vmatpush3.bf16.msra.mxu0 (!%p752_p1), %v952_v31 }
 0x136   : > { %833 = vmatprep.subr.bf16.mxu0 (!%p752_p1), %v1052_v26 }
 0x137   : > { %v519_v16 = vadd.f32 %v518_v15, %v503_v14 }
 0x139   : > { %v520_v18 = vrot.slane %v519_v16, 4  ;;  %834 = vmatpush3.bf16.msra.mxu0 (!%p752_p1), %v953_v32 }
 0x13a   : > { %835 = vmatprep.subr.bf16.mxu0 (!%p752_p1), %v1052_v26 }
 0x13b   : > { %v521_v19 = vadd.f32 %v520_v18, %v519_v16 }
 0x13d   : > { %v522_v20 = vrot.slane %v521_v19, 2  ;;  %836 = vmatpush3.bf16.msra.mxu0 (!%p752_p1), %v954_v35 }
 0x13f   : > { %v523_v21 = vadd.f32 %v522_v20, %v521_v19 }
 0x141   : > { %v524_v22 = vrot.slane %v523_v21, 1  ;;  %531 = sbr.rel (%p752_p1) target bundleno = 554 (0x22a), region = 48 }
 0x143   : > { %v525_v24 = vadd.f32 %v524_v22, %v523_v21 }
 0x145   : > { %v526_v25 = vadd.f32 %v525_v24, %v504_v23 }
 0x147   : > { %527 = vst [vmem:[#allocation2] sm:$0x1] %v526_v25 }
 0x14e   : > { %v532_v33 = vld [vmem:[#allocation2] sm:$0x1] }
 0x14f   : > { %v533_v34 = vmul.f32 0.00390625, %v532_v33 }
 0x151   : > { %v534_v36 = vpack.c.bf16 %v533_v34, %v533_v34 }
 0x153   : > { %838 = vmatmul.mubr.bf16.vlgmr.msra.gmra.mrb[0].mxu0 %v534_v36 }
 0x226   : > { %v634_v38 = vpop.f32.mrb[0].mxu0 }
 0x227   : > { %v635_v39 = vadd.f32 %v634_v38, %v551_v37  ;;  %v839_v40 = vpop.f32.mrb[1].mxu0 }
 0x228   : > { %v637_v41 = vpop.f32.mrb[2].mxu0 }
 0x229   : > { %640 = vst [vmem:[%s1165_s27] sm:$0x1] %v635_v39  ;;  %v840_v42 = vpop.f32.mrb[3].mxu0 }
 0x22a PF: > { %s761_s14 = sshll.u32 %s1037_s22, 4  ;;  %s654_s26 = sshll.u32 %s1165_s27, 4  ;;  %s655_s26 = int_to_ptr.vmem [resolvable:$true] %s654_s26 }
 0x22b   : > { %s1236_s17 = scalar_lea.hbm %s1291_s5, %s761_s14  ;;  %s642_s7 = scalar_lea.sflag [#allocation4], %s238_s10 }
 0x22c   : > { %s955_s8 = scalar_lea.vmem %s655_s26, 16  ;;  %s1054_s11 = smov [#allocation3]  }
 0x22d   : > { %p956_p2 = scmp.ne.s32.totalorder %s655_s26, %s955_s8  ;;  %s959_s12 = sshll.u32 %s1054_s11, 4  ;;  %s960_s12 = int_to_ptr.vmem [resolvable:$false] %s959_s12 }
 0x22e   : > { %s961_s13 = scalar_lea.vmem %s960_s12, 32  ;;  %p962_p6 = scmp.lt.s32.totalorder %s655_s26, %s960_s12 }
 0x22f   : > { %p957_p4 = pnand %p956_p2, %p1134_p3  ;;  %p963_p7 = scmp.lt.s32.totalorder %s961_s13, %s955_s8 }
 0x231   : > { %p958_p5 = pneg %p957_p4  ;;  %p964_p8 = por %p963_p7, %p962_p6 }
 0x233   : > { %p965_p10 = pnand %p964_p8, %p958_p5 }
 0x235   : > { %968 = shalt.err (!%p965_p10)
}
 0x236   : > { %s969_s22 = scalar_lea.hbm %s1236_s17, 16  ;;  %s973_s21 = scalar_lea.hbm %s1291_s5, 32 }
 0x237   : > { %p970_p11 = scmp.ne.s32.totalorder %s1236_s17, %s969_s22  ;;  %p974_p0 = scmp.lt.u32.totalorder %s1236_s17, %s1291_s5 }
 0x238   : > { %p975_p1 = scmp.lt.u32.totalorder %s973_s21, %s969_s22  ;;  %p977_p4 = scmp.lt.u32.totalorder %s969_s22, %s1236_s17 }
 0x239   : > { %p971_p12 = pnand %p970_p11, %p1134_p3 }
 0x23a   : > { %p976_p2 = por %p975_p1, %p974_p0 }
 0x23b   : > { %p972_p13 = pneg %p971_p12 }
 0x23c   : > { %p978_p5 = por %p977_p4, %p976_p2 }
 0x23e   : > { %p979_p6 = pnand %p978_p5, %p972_p13 }
 0x240   : > { %982 = shalt.err (!%p979_p6)
}
 0x241   : > { %857 = dma.vmem_to_hbm [thread:$0]  (%p1134_p3), %s655_s26, 16, %s1236_s17, %s642_s7  }
 0x242 PF: > { %p863_p7 = scmp.ge.s32.totalorder %s1049_s25, 2  ;;  %s666_s16 = sand.u32 1, %s1021_s18  }
 0x243   : > { %s667_s8 = scalar_lea.sflag [#allocation4], %s666_s16 }
 0x244   : > { %p860_p8 = pnand %p863_p7, %p1144_p9 }
 0x246   : > { %1016 = dma.done.wait (!%p860_p8), %s667_s8, 16  }
 0x247   : > { %1018 = vsyncadd (!%p860_p8), %s667_s8, 4294967280  ;;  %s18_s25 = sadd.s32 1, %s1049_s25   ;;  %s1294_s18 = smov %s1025_s19 }
 0x248   : > { %p15_p10 = scmp.ge.s32.totalorder %s18_s25, 6   ;;  %s1295_s19 = smov %s1029_s20 }
 0x249   : > { %s1296_s20 = smov %s1152_s9  ;;  %s1297_s21 = smov %s1041_s23 }
 0x24a   : > { %s1298_s22 = smov %s1045_s24  ;;  %s1299_s23 = smov %s1302_s28 }
 0x24b   : > { %s1300_s24 = smov %s1306_s29  ;;  %17 = sbr.rel (!%p15_p10) target bundleno = 5 (0x5), region = 83 }
 0x252   :  { %671 = vsyncpa [#allocation4], 1 }
 0x253   :  { %673 = vsyncpa [#allocation4 + $0x1], 1 }

// kernel: resnet_forward.4
= control target key start
LH: loop header
LB: loop body
LE: loop exit
PB: predicated region body
PF: predicated region fallthrough
CT: control target
= control target key end

     0   :  { %s5110_s12 = smov 0   ;;  %s6174_s0 = inlined_call_operand.vmem [shape: bf16[2,18,18,128], index: 0, kind: input, shape index: {}]   ;;  %s6175_s1 = inlined_call_operand.vmem [shape: bf16[9,128,128], index: 1, kind: input, shape index: {}]   ;;  %s6176_s2 = inlined_call_operand.vmem [shape: f32[1,128], index: 2, kind: input, shape index: {}]   ;;  %s6177_s3 = inlined_call_operand.vmem [shape: bf16[2,16,16,128], index: 3, kind: output, shape index: {}]  }
   0x1 LB: > { %s3603_s13 = sadd.s32 4294967295, %s5088_s12   ;;  %p3607_p0 = scmp.ge.s32.totalorder %s5088_s12, 1  ;;  %s5088_s12 = sphi %s5110_s12, %s13_s12  }
   0x2   : > { %p137_p1 = scmp.lt.s32.totalorder %s5088_s12, 3 }
   0x4   : > { %p138_p2 = pnand %p3607_p0, %p137_p1 }
   0x6   : > { %141 = sbr.rel (%p138_p2) target bundleno = 561 (0x231), region = 32 }
   0xd   : > { %v4975_v0 = vld [vmem:[%s6175_s1 + $0x40] sm:$0xff]   ;;  %p161_p3 = scmp.lt.s32.totalorder %s3603_s13, 1  ;;  %v4977_v2 = vld [vmem:[%s6175_s1 + $0x48] sm:$0xff]   ;;  %v4979_v4 = vld [vmem:[%s6175_s1 + $0x50] sm:$0xff]   ;;  %vm242_vm0 = vsmask.f32 3328 }
   0xe   : > { %v4976_v1 = vld [vmem:[%s6175_s1 + $0x100] sm:$0xff]   ;;  %4262 = vmatprep.subr.bf16.mxu1 %v4975_v0  ;;  %v4978_v3 = vld [vmem:[%s6175_s1 + $0x108] sm:$0xff]   ;;  %v4980_v5 = vld [vmem:[%s6175_s1 + $0x110] sm:$0xff]   ;;  %vm243_vm1 = vsmask.f32 7440  ;;  %vm1240_vm3 = vcmask 1042432  }
   0xf   : > { %4454 = vmatprep.subr.bf16.mxu0 %v4976_v1  ;;  %4263 = vmatpush3.bf16.msra.mxu1 %v4975_v0  ;;  %s6222_s13 = smov (!%p161_p3, %s3603_s13), 1  ;;  %v4981_v6 = vld [vmem:[%s6175_s1 + $0x58] sm:$0xff]   ;;  %v4983_v8 = vld [vmem:[%s6175_s1 + $0x60] sm:$0xff]   ;;  %v4985_v10 = vld [vmem:[%s6175_s1 + $0x68] sm:$0xff]   ;;  %vm1241_vm4 = vcmask 1046532  }
  0x10   : > { %4455 = vmatpush3.bf16.msra.mxu0 %v4976_v1  ;;  %4264 = vmatprep.subr.bf16.mxu1 %v4977_v2  ;;  %v4982_v7 = vld [vmem:[%s6175_s1 + $0x118] sm:$0xff]   ;;  %s4966_s30 = smul.u32 216, %s6222_s13  ;;  %v4984_v9 = vld [vmem:[%s6175_s1 + $0x120] sm:$0xff]   ;;  %v4986_v11 = vld [vmem:[%s6175_s1 + $0x128] sm:$0xff]   ;;  %s3918_s7 = sshll.u32 %s6222_s13, 7 }
  0x11   : > { %4456 = vmatprep.subr.bf16.mxu0 %v4978_v3  ;;  %v4987_v17 = vld [vmem:[%s6175_s1 + $0x70] sm:$0xff]   ;;  %v4989_v36 = vld [vmem:[%s6175_s1 + $0x78] sm:$0xff]   ;;  %vm5199_vm2 = vmor %vm242_vm0, %vm243_vm1  ;;  %s6121_s11 = scalar_lea.vmem %s6177_s3, %s3918_s7 }
  0x12   : > { %s5154_s10 = scalar_lea.vmem %s6174_s0, %s4966_s30  ;;  %v4988_v31 = vld [vmem:[%s6175_s1 + $0x130] sm:$0xff]   ;;  %v4990_v53 = vld [vmem:[%s6175_s1 + $0x138] sm:$0xff]   ;;  %v4991_v1 = vld [vmem:[%s6175_s1] sm:$0xff]  }
  0x13   : > { %4265 = vmatpush3.bf16.msra.mxu1 %v4977_v2  ;;  %v5163_v12 = vld [vmem:[%s5154_s10] sm:$0xf]  ;;  %v5166_v13 = vld [vmem:[%s5154_s10 + $0x4] sm:$0xf]  ;;  %v174_v14 = vld [vmem:[%s5154_s10 + $0x8] sm:$0x1] }
  0x14   : > { %4457 = vmatpush3.bf16.msra.mxu0 %v4978_v3  ;;  %4266 = vmatprep.subr.bf16.mxu1 %v4979_v4  ;;  %v246_v15 = vshrl.u32 %v5163_v12, 16  ;;  %v249_v16 = vshll.u32 %v5163_v12, 16  ;;  %v255_v18 = vshll.u32 %v5166_v13, 16  ;;  %v259_v19 = vshrl.u32 %v5166_v13, 16  ;;  %v5177_v21 = vld [vmem:[%s5154_s10 + $0xc] sm:$0xf]  ;;  %vm5406_vm5 = vmor %vm1240_vm3, %vm1241_vm4 }
  0x15   : > { %4458 = vmatprep.subr.bf16.mxu0 %v4980_v5  ;;  %v265_v20 = vshll.u32 %v174_v14, 16  ;;  %v5180_v24 = vld [vmem:[%s5154_s10 + $0x10] sm:$0xf]  ;;  %v5183_v25 = vld [vmem:[%s5154_s10 + $0x14] sm:$0x1]  ;;  %v270_v30 = vshrl.u32 %v5177_v21, 16 }
  0x16   : > { %v248_v22 = vrot.slane %v246_v15, 4  ;;  %v251_v23 = vrot.slane %v249_v16, 5  ;;  %v257_v27 = vrot.slane %v255_v18, 5  ;;  %v261_v28 = vrot.slane %v259_v19, 4  ;;  %v5205_v41 = vld [vmem:[%s5154_s10 + $0x18] sm:$0xf] }
  0x17   : > { %4267 = vmatpush3.bf16.msra.mxu1 %v4979_v4  ;;  %v267_v29 = vrot.slane %v265_v20, 5  ;;  %v273_v33 = vshll.u32 %v5177_v21, 16  ;;  %v279_v34 = vshll.u32 %v5180_v24, 16  ;;  %v283_v35 = vshrl.u32 %v5180_v24, 16  ;;  %v5208_v42 = vld [vmem:[%s5154_s10 + $0x1c] sm:$0xf] }
  0x18   : > { %4459 = vmatpush3.bf16.msra.mxu0 %v4980_v5  ;;  %4268 = vmatprep.subr.bf16.mxu1 %v4981_v6  ;;  %v252_v32 = vor.u32 %v251_v23, %v248_v22  ;;  %v262_v38 = vor.u32 %v261_v28, %v257_v27  ;;  %v272_v39 = vrot.slane %v270_v30, 4  ;;  %v289_v40 = vshll.u32 %v5183_v25, 16  ;;  %v5215_v48 = vld [vmem:[%s5154_s10 + $0x20] sm:$0x1]  ;;  %v5232_v3 = vld [vmem:[%s5154_s10 + $0x24] sm:$0xf] }
  0x19   : > { %4460 = vmatprep.subr.bf16.mxu0 %v4982_v7  ;;  %v5212_v43 = vcombine.low %v5177_v21, %v5180_v24  ;;  %v275_v45 = vrot.slane %v273_v33, 5  ;;  %v281_v46 = vrot.slane %v279_v34, 5  ;;  %v285_v47 = vrot.slane %v283_v35, 4  ;;  %v5247_v14 = vld [vmem:[%s5154_s10 + $0x2c] sm:$0x1]  ;;  %v5081_v37 = vld [vmem:[%s6175_s1 + $0x138] sm:$0xff]  }
  0x1a   : > { %v253_v44 = vrot.slane %v252_v32, 4  ;;  %v263_v49 = vrot.slane %v262_v38, 4  ;;  %v291_v50 = vrot.slane %v289_v40, 5  ;;  %v294_v51 = vshrl.u32 %v5205_v41, 16  ;;  %v5252_v22 = vld [vmem:[%s5154_s10 + $0x30] sm:$0xf] }
  0x1b   : > { %4269 = vmatpush3.bf16.msra.mxu1 %v4981_v6  ;;  %v297_v52 = vshll.u32 %v5205_v41, 16  ;;  %v276_v55 = vor.u32 %v275_v45, %v272_v39  ;;  %v286_v56 = vor.u32 %v285_v47, %v281_v46  ;;  %v303_v57 = vshll.u32 %v5208_v42, 16  ;;  %v5257_v30 = vld [vmem:[%s5154_s10 + $0x34] sm:$0xf]  ;;  %v4994_v34 = vld [vmem:[%s6175_s1 + $0x8] sm:$0xff]  }
  0x1c   : > { %4461 = vmatpush3.bf16.msra.mxu0 %v4982_v7  ;;  %4270 = vmatprep.subr.bf16.mxu1 %v4983_v8  ;;  %v258_v54 = vsel %vm5199_vm2, %v253_v44, %v257_v27  ;;  %v268_v58 = vsel %vm5199_vm2, %v263_v49, %v267_v29  ;;  %v296_v59 = vrot.slane %v294_v51, 4  ;;  %v307_v61 = vshrl.u32 %v5208_v42, 16  ;;  %v5266_v35 = vld [vmem:[%s5154_s10 + $0x38] sm:$0x1] }
  0x1d   : > { %4462 = vmatprep.subr.bf16.mxu0 %v4984_v9  ;;  %v299_v60 = vrot.slane %v297_v52, 5  ;;  %v3627_v62 = vcombine.low %v258_v54, %v268_v58  ;;  %v277_v63 = vrot.slane %v276_v55, 4  ;;  %v287_v0 = vrot.slane %v286_v56, 4  ;;  %v5281_v58 = vld [vmem:[%s5154_s10 + $0x3c] sm:$0xf] }
  0x1e   : > { %v305_v2 = vrot.slane %v303_v57, 5  ;;  %v309_v5 = vrot.slane %v307_v61, 4  ;;  %v313_v6 = vshll.u32 %v5215_v48, 16  ;;  %v1262_v7 = vrot.slane %v5215_v48, 5 }
  0x1f   : > { %4271 = vmatpush3.bf16.msra.mxu1 %v4983_v8  ;;  %v300_v4 = vor.u32 %v299_v60, %v296_v59  ;;  %v4992_v8 = vld [vmem:[%s6175_s1 + $0x140] sm:$0xff]   ;;  %4278 = vmatprep.mubr.bf16.mxu1 %v3627_v62  ;;  %v318_v15 = vshrl.u32 %v5232_v3, 16  ;;  %v321_v16 = vshll.u32 %v5232_v3, 16  ;;  %v337_v33 = vshll.u32 %v5247_v14, 16  ;;  %v4997_v59 = vld [vmem:[%s6175_s1 + $0x10] sm:$0xff]  }
  0x20   : > { %4463 = vmatpush3.bf16.msra.mxu0 %v4984_v9  ;;  %4272 = vmatprep.subr.bf16.mxu1 %v4985_v10  ;;  %v5240_v9 = vld [vmem:[%s5154_s10 + $0x28] sm:$0xf]  ;;  %v310_v19 = vor.u32 %v309_v5, %v305_v2  ;;  %v315_v20 = vrot.slane %v313_v6, 5  ;;  %v345_v44 = vshll.u32 %v5252_v22, 16  ;;  %v355_v56 = vshrl.u32 %v5257_v30, 16 }
  0x21   : > { %4464 = vmatprep.subr.bf16.mxu0 %v4986_v11  ;;  %v301_v18 = vrot.slane %v300_v4, 4  ;;  %v320_v23 = vrot.slane %v318_v15, 4  ;;  %v323_v27 = vrot.slane %v321_v16, 5  ;;  %v327_v28 = vshll.u32 %v5240_v9, 16  ;;  %v4995_v16 = vld [vmem:[%s6175_s1 + $0x150] sm:$0xff]  }
  0x22   : > { %v331_v29 = vshrl.u32 %v5240_v9, 16  ;;  %v311_v32 = vrot.slane %v310_v19, 4  ;;  %v339_v47 = vrot.slane %v337_v33, 5  ;;  %v347_v54 = vrot.slane %v345_v44, 5  ;;  %v5321_v33 = vld [vmem:[%s5154_s10 + $0x50] sm:$0x1] }
  0x23   : > { %4273 = vmatpush3.bf16.msra.mxu1 %v4985_v10  ;;  %v282_v10 = vsel %vm5199_vm2, %v277_v63, %v281_v46  ;;  %v324_v38 = vor.u32 %v323_v27, %v320_v23  ;;  %v329_v39 = vrot.slane %v327_v28, 5  ;;  %v4993_v46 = vld [vmem:[%s6175_s1 + $0x148] sm:$0xff]   ;;  %v361_v57 = vshll.u32 %v5266_v35, 16 }
  0x24   : > { %4465 = vmatpush3.bf16.msra.mxu0 %v4986_v11  ;;  %4274 = vmatprep.subr.bf16.mxu1 %v4987_v17  ;;  %v292_v11 = vsel %vm5199_vm2, %v287_v0, %v291_v50  ;;  %v333_v40 = vrot.slane %v331_v29, 4  ;;  %v316_v45 = vsel %vm5199_vm2, %v311_v32, %v315_v20  ;;  %v351_v50 = vshll.u32 %v5257_v30, 16  ;;  %v5295_v0 = vld [vmem:[%s5154_s10 + $0x40] sm:$0xf]  ;;  %v5312_v27 = vld [vmem:[%s5154_s10 + $0x48] sm:$0xf] }
  0x25   : > { %4466 = vmatprep.subr.bf16.mxu0 %v4988_v31  ;;  %v325_v52 = vrot.slane %v324_v38, 4  ;;  %v5288_v60 = vcombine.low %v5205_v41, %v5208_v42  ;;  %v357_v4 = vrot.slane %v355_v56, 4  ;;  %v363_v5 = vrot.slane %v361_v57, 5  ;;  %v5315_v28 = vld [vmem:[%s5154_s10 + $0x4c] sm:$0xf] }
  0x26   : > { %v353_v55 = vrot.slane %v351_v50, 5  ;;  %v369_v6 = vshll.u32 %v5281_v58, 16  ;;  %v399_v44 = vshll.u32 %v5315_v28, 16  ;;  %v403_v50 = vshrl.u32 %v5315_v28, 16 }
  0x27   : > { %4275 = vmatpush3.bf16.msra.mxu1 %v4987_v17  ;;  %v3628_v17 = vcombine.low %v282_v10, %v292_v11  ;;  %v330_v61 = vsel %vm5199_vm2, %v325_v52, %v329_v39  ;;  %v375_v10 = vshll.u32 %v5295_v0, 16 }
  0x28   : > { %4467 = vmatpush3.bf16.msra.mxu0 %v4988_v31  ;;  %4276 = vmatprep.subr.bf16.mxu1 %v4989_v36  ;;  %v306_v31 = vsel %vm5199_vm2, %v301_v18, %v305_v2  ;;  %v366_v2 = vshrl.u32 %v5281_v58, 16  ;;  %v358_v19 = vor.u32 %v357_v4, %v353_v55  ;;  %v371_v20 = vrot.slane %v369_v6, 5  ;;  %v5352_v6 = vld [vmem:[%s5154_s10 + $0x58] sm:$0xf] }
  0x29   : > { %4468 = vmatprep.subr.bf16.mxu0 %v4990_v53  ;;  %4470 = vmatprep.mubr.bf16.mxu0 %v3628_v17  ;;  %v5276_v51 = vcombine.low %v306_v31, %v316_v45  ;;  %v377_v23 = vrot.slane %v375_v10, 5  ;;  %v4996_v45 = vld [vmem:[%s6175_s1 + $0x158] sm:$0xff]  }
  0x2a   : > { %v359_v38 = vrot.slane %v358_v19, 4  ;;  %v5355_v10 = vld [vmem:[%s5154_s10 + $0x5c] sm:$0x1] }
  0x2b   : > { %4277 = vmatpush3.bf16.msra.mxu1 %v4989_v36  ;;  %v342_v36 = vshrl.u32 %v5252_v22, 16 }
  0x2c   : > { %4469 = vmatpush3.bf16.msra.mxu0 %v4990_v53  ;;  %4310 = vmatprep.subr.bf16.mxu1 %v4991_v1  ;;  %v334_v53 = vor.u32 %v333_v40, %v329_v39  ;;  %v393_v40 = vshll.u32 %v5312_v27, 16  ;;  %v364_v52 = vsel %vm5199_vm2, %v359_v38, %v363_v5  ;;  %v5349_v5 = vld [vmem:[%s5154_s10 + $0x54] sm:$0xf] }
  0x2d   : > { %4502 = vmatprep.subr.bf16.mxu0 %v4992_v8  ;;  %v344_v49 = vrot.slane %v342_v36, 4  ;;  %v5000_v36 = vld [vmem:[%s6175_s1 + $0x18] sm:$0xff]   ;;  %v414_v19 = vshrl.u32 %v5349_v5, 16 }
  0x2e   : > { %4279 = vmatmul.mubr.bf16.vlgmr.msra.gmra.mrb[0].mxu1 %v3628_v17  ;;  %v335_v62 = vrot.slane %v334_v53, 4  ;;  %v379_v17 = vshrl.u32 %v5295_v0, 16 }
  0x2f   : > { %4311 = vmatpush3.bf16.msra.mxu1 %v4991_v1  ;;  %4471 = vmatmul.mubr.bf16.vlgmr.msra.gmra.mrb[0].mxu0 %v5276_v51  ;;  %v348_v63 = vor.u32 %v347_v54, %v344_v49  ;;  %v5298_v1 = vld [vmem:[%s5154_s10 + $0x44] sm:$0x1]  ;;  %v395_v54 = vrot.slane %v393_v40, 5  ;;  %v427_v40 = vshrl.u32 %v5352_v6, 16 }
  0x30   : > { %4312 = vmatprep.subr.bf16.mxu1 %v4994_v34  ;;  %4282 = vmatprep.mubr.bf16.mxu1 %v5276_v51  ;;  %v340_v11 = vsel %vm5199_vm2, %v335_v62, %v339_v47  ;;  %v381_v31 = vrot.slane %v379_v17, 4  ;;  %v385_v32 = vshll.u32 %v5298_v1, 16  ;;  %v409_v62 = vshll.u32 %v5321_v33, 16 }
  0x31   : > { %4503 = vmatpush3.bf16.msra.mxu0 %v4992_v8  ;;  %v349_v15 = vrot.slane %v348_v63, 4  ;;  %v368_v8 = vrot.slane %v366_v2, 4  ;;  %v5309_v18 = vcombine.low %v330_v61, %v340_v11  ;;  %v405_v61 = vrot.slane %v403_v50, 4  ;;  %v4998_v63 = vld [vmem:[%s6175_s1 + $0x160] sm:$0xff]   ;;  %v5389_v50 = vld [vmem:[%s5154_s10 + $0x68] sm:$0x1] }
  0x32   : > { %4504 = vmatprep.subr.bf16.mxu0 %v4993_v46  ;;  %v382_v47 = vor.u32 %v381_v31, %v377_v23  ;;  %v387_v49 = vrot.slane %v385_v32, 5  ;;  %v5003_v2 = vld [vmem:[%s6175_s1 + $0x20] sm:$0xff]   ;;  %v5359_v11 = vcombine.low %v5232_v3, %v5240_v9  ;;  %v411_v17 = vrot.slane %v409_v62, 5 }
  0x33   : > { %4313 = vmatpush3.bf16.msra.mxu1 %v4994_v34  ;;  %6196 = vst [vmem:[#allocation2_spill] sm:$0xff] %v5309_v18  ;;  %v354_v29 = vsel %vm5199_vm2, %v349_v15, %v353_v55  ;;  %v390_v34 = vshrl.u32 %v5312_v27, 16  ;;  %4474 = vmatprep.mubr.bf16.mxu0 %v5309_v18  ;;  %v372_v39 = vor.u32 %v371_v20, %v368_v8  ;;  %v401_v55 = vrot.slane %v399_v44, 5  ;;  %v5375_v32 = vld [vmem:[%s5154_s10 + $0x60] sm:$0xf] }
  0x34   : > { %4314 = vmatprep.subr.bf16.mxu1 %v4997_v59  ;;  %v5337_v56 = vcombine.low %v354_v29, %v364_v52  ;;  %v383_v57 = vrot.slane %v382_v47, 4  ;;  %v5363_v15 = vcombine.low %v5252_v22, %v5257_v30  ;;  %v417_v29 = vshll.u32 %v5349_v5, 16  ;;  %v5383_v47 = vld [vmem:[%s5154_s10 + $0x64] sm:$0xf] }
  0x35   : > { %4505 = vmatpush3.bf16.msra.mxu0 %v4993_v46  ;;  %v392_v46 = vrot.slane %v390_v34, 4  ;;  %v373_v53 = vrot.slane %v372_v39, 4  ;;  %v406_v8 = vor.u32 %v405_v61, %v401_v55  ;;  %v423_v31 = vshll.u32 %v5352_v6, 16  ;;  %v5005_v34 = vld [vmem:[%s6175_s1 + $0x28] sm:$0xff]  }
  0x36   : > { %4283 = vmatmul.mubr.bf16.gmra.mrb[4].mxu1 %v5309_v18  ;;  %4506 = vmatprep.subr.bf16.mxu0 %v4995_v16  ;;  %6197 = vst [vmem:[#allocation3_spill] sm:$0xff] %v5337_v56  ;;  %v416_v39 = vrot.slane %v414_v19, 4  ;;  %v433_v44 = vshll.u32 %v5355_v10, 16  ;;  %v438_v52 = vshrl.u32 %v5375_v32, 16  ;;  %v457_v19 = vshll.u32 %v5389_v50, 16 }
  0x37   : > { %4315 = vmatpush3.bf16.msra.mxu1 %v4997_v59  ;;  %v378_v4 = vsel %vm5199_vm2, %v373_v53, %v377_v23  ;;  %v396_v59 = vor.u32 %v395_v54, %v392_v46  ;;  %4475 = vmatmul.mubr.bf16.gmra.mrb[4].mxu0 %v5337_v56  ;;  %v407_v38 = vrot.slane %v406_v8, 4  ;;  %v425_v46 = vrot.slane %v423_v31, 5 }
  0x38   : > { %4316 = vmatprep.subr.bf16.mxu1 %v5000_v36  ;;  %4286 = vmatprep.mubr.bf16.mxu1 %v5337_v56  ;;  %v429_v54 = vrot.slane %v427_v40, 4  ;;  %v5417_v40 = vld [vmem:[%s5154_s10 + $0x6c] sm:$0xf] }
  0x39   : > { %4507 = vmatpush3.bf16.msra.mxu0 %v4995_v16  ;;  %v388_v16 = vsel %vm5199_vm2, %v383_v57, %v387_v49  ;;  %v397_v23 = vrot.slane %v396_v59, 4  ;;  %v412_v53 = vsel %vm5199_vm2, %v407_v38, %v411_v17  ;;  %v435_v57 = vrot.slane %v433_v44, 5 }
  0x3a   : > { %4508 = vmatprep.subr.bf16.mxu0 %v4996_v45  ;;  %v5370_v20 = vcombine.low %v378_v4, %v388_v16  ;;  %v440_v4 = vrot.slane %v438_v52, 4  ;;  %v447_v59 = vshll.u32 %v5383_v47, 16  ;;  %v430_v16 = vor.u32 %v429_v54, %v425_v46 }
  0x3b   : > { %4317 = vmatpush3.bf16.msra.mxu1 %v5000_v36  ;;  %v402_v49 = vsel %vm5199_vm2, %v397_v23, %v401_v55  ;;  %v419_v36 = vrot.slane %v417_v29, 5  ;;  %v441_v55 = vshll.u32 %v5375_v32, 16  ;;  %v451_v17 = vshrl.u32 %v5383_v47, 16  ;;  %v5007_v29 = vld [vmem:[%s6175_s1 + $0x30] sm:$0xff]  }
  0x3c   : > { %6198 = vst [vmem:[#allocation4_spill] sm:$0xff] %v5370_v20  ;;  %4318 = vmatprep.subr.bf16.mxu1 %v5003_v2  ;;  %4478 = vmatprep.mubr.bf16.mxu0 %v5370_v20  ;;  %v5399_v61 = vcombine.low %v402_v49, %v412_v53  ;;  %v449_v31 = vrot.slane %v447_v59, 5  ;;  %v3676_v38 = vrot.slane %v5177_v21, 9  ;;  %v431_v44 = vrot.slane %v430_v16, 4  ;;  %v5424_v53 = vld [vmem:[%s5154_s10 + $0x70] sm:$0xf] }
  0x3d   : > { %4509 = vmatpush3.bf16.msra.mxu0 %v4996_v45  ;;  %v4999_v45 = vld [vmem:[%s6175_s1 + $0x168] sm:$0xff]   ;;  %v420_v62 = vor.u32 %v419_v36, %v416_v39  ;;  %v443_v8 = vrot.slane %v441_v55, 5  ;;  %v1252_v39 = vrot.slane %v5180_v24, 5  ;;  %v453_v36 = vrot.slane %v451_v17, 4 }
  0x3e   : > { %4287 = vmatmul.mubr.bf16.gmra.mrb[8].mxu1 %v5370_v20  ;;  %4510 = vmatprep.subr.bf16.mxu0 %v4998_v63  ;;  %6199 = vst [vmem:[#allocation5_spill] sm:$0xff] %v5399_v61  ;;  %v459_v52 = vrot.slane %v457_v19, 5  ;;  %v1255_v55 = vrot.slane %v5183_v25, 5  ;;  %v436_v59 = vsel %vm5199_vm2, %v431_v44, %v435_v57  ;;  %v471_v19 = vshll.u32 %v5424_v53, 16 }
  0x3f   : > { %4319 = vmatpush3.bf16.msra.mxu1 %v5003_v2  ;;  %4290 = vmatprep.mubr.bf16.mxu1 %v5399_v61  ;;  %v421_v2 = vrot.slane %v420_v62, 4  ;;  %v444_v49 = vor.u32 %v443_v8, %v440_v4  ;;  %v1253_v24 = vsel %vm5406_vm5, %v3676_v38, %v1252_v39  ;;  %v1254_v54 = vrot.slane %v1252_v39, 4  ;;  %v5432_v62 = vld [vmem:[%s5154_s10 + $0x74] sm:$0x1]  ;;  %v5009_v4 = vld [vmem:[%s6175_s1 + $0x38] sm:$0xff]  }
  0x40   : > { %4320 = vmatprep.subr.bf16.mxu1 %v5005_v34  ;;  %4479 = vmatmul.mubr.bf16.gmra.mrb[8].mxu0 %v5399_v61  ;;  %v454_v8 = vor.u32 %v453_v36, %v449_v31  ;;  %v473_v36 = vrot.slane %v471_v19, 5  ;;  %v1273_v20 = vrot.slane %v5257_v30, 5 }
  0x41   : > { %4511 = vmatpush3.bf16.msra.mxu0 %v4998_v63  ;;  %v5001_v63 = vld [vmem:[%s6175_s1 + $0x170] sm:$0xff]   ;;  %v426_v21 = vsel %vm5199_vm2, %v421_v2, %v425_v46  ;;  %v445_v16 = vrot.slane %v444_v49, 4  ;;  %v462_v46 = vshrl.u32 %v5417_v40, 16  ;;  %v1256_v25 = vsel %vm5406_vm5, %v1254_v54, %v1255_v55  ;;  %v5447_v2 = vld [vmem:[%s5154_s10 + $0x78] sm:$0xf] }
  0x42   : > { %4512 = vmatprep.subr.bf16.mxu0 %v4999_v45  ;;  %v5440_v17 = vcombine.low %v426_v21, %v436_v59  ;;  %v455_v38 = vrot.slane %v454_v8, 4  ;;  %v5454_v39 = vcombine.low %v1253_v24, %v1256_v25  ;;  %v475_v21 = vshrl.u32 %v5424_v53, 16  ;;  %v5461_v54 = vld [vmem:[%s5154_s10 + $0x7c] sm:$0xf] }
  0x43   : > { %4321 = vmatpush3.bf16.msra.mxu1 %v5005_v34  ;;  %v465_v34 = vshll.u32 %v5417_v40, 16  ;;  %v450_v57 = vsel %vm5199_vm2, %v445_v16, %v449_v31  ;;  %v464_v44 = vrot.slane %v462_v46, 4  ;;  %v481_v31 = vshll.u32 %v5432_v62, 16  ;;  %v5468_v16 = vld [vmem:[%s5154_s10 + $0x80] sm:$0x1] }
  0x44   : > { %4322 = vmatprep.subr.bf16.mxu1 %v5007_v29  ;;  %6202 = vst [vmem:[#allocation6_spill] sm:$0xff] %v5440_v17  ;;  %4482 = vmatprep.mubr.bf16.mxu0 %v5440_v17  ;;  %v460_v55 = vsel %vm5199_vm2, %v455_v38, %v459_v52  ;;  %v3677_v59 = vrot.slane %v5205_v41, 9  ;;  %v1259_v24 = vrot.slane %v5208_v42, 5  ;;  %v486_v8 = vshrl.u32 %v5447_v2, 16  ;;  %v5476_v52 = vld [vmem:[%s6175_s1 + $0x80] sm:$0xff]  }
  0x45   : > { %4513 = vmatpush3.bf16.msra.mxu0 %v4999_v45  ;;  %v5002_v45 = vld [vmem:[%s6175_s1 + $0x178] sm:$0xff]   ;;  %v467_v49 = vrot.slane %v465_v34, 5  ;;  %v5471_v46 = vcombine.low %v450_v57, %v460_v55  ;;  %v477_v34 = vrot.slane %v475_v21, 4  ;;  %v483_v19 = vrot.slane %v481_v31, 5  ;;  %v5485_v38 = vld [vmem:[%s5154_s10 + $0x84] sm:$0xf] }
  0x46   : > { %4514 = vmatprep.subr.bf16.mxu0 %v5001_v63  ;;  %4291 = vmatmul.mubr.bf16.gmra.mrb[12].mxu1 %v5440_v17  ;;  %v1260_v41 = vsel %vm5406_vm5, %v3677_v59, %v1259_v24  ;;  %v1261_v42 = vrot.slane %v1259_v24, 4  ;;  %v488_v57 = vrot.slane %v486_v8, 4  ;;  %v495_v21 = vshll.u32 %v5461_v54, 16 }
  0x47   : > { %4323 = vmatpush3.bf16.msra.mxu1 %v5007_v29  ;;  %6203 = vst [vmem:[#allocation7_spill] sm:$0xff] %v5471_v46  ;;  %v468_v25 = vor.u32 %v467_v49, %v464_v44  ;;  %v5004_v29 = vld [vmem:[%s6175_s1 + $0x180] sm:$0xff]   ;;  %4294 = vmatprep.mubr.bf16.mxu1 %v5471_v46  ;;  %v478_v49 = vor.u32 %v477_v34, %v473_v36  ;;  %v499_v31 = vshrl.u32 %v5461_v54, 16  ;;  %v505_v24 = vshll.u32 %v5468_v16, 16 }
  0x48   : > { %4324 = vmatprep.subr.bf16.mxu1 %v5009_v4  ;;  %4483 = vmatmul.mubr.bf16.gmra.mrb[12].mxu0 %v5471_v46  ;;  %v1263_v55 = vsel %vm5406_vm5, %v1261_v42, %v1262_v7  ;;  %v3678_v8 = vrot.slane %v5232_v3, 9  ;;  %v497_v46 = vrot.slane %v495_v21, 5  ;;  %v5505_v3 = vld [vmem:[%s5154_s10 + $0x88] sm:$0xf] }
  0x49   : > { %4515 = vmatpush3.bf16.msra.mxu0 %v5001_v63  ;;  %v489_v63 = vshll.u32 %v5447_v2, 16  ;;  %v469_v44 = vrot.slane %v468_v25, 4  ;;  %4518 = vmatprep.mubr.bf16.mxu0 %v5454_v39  ;;  %v479_v34 = vrot.slane %v478_v49, 4  ;;  %v5500_v26 = vcombine.low %v1260_v41, %v1263_v55 }
  0x4a   : > { %4516 = vmatprep.subr.bf16.mxu0 %v5002_v45  ;;  %v501_v7 = vrot.slane %v499_v31, 4  ;;  %v507_v42 = vrot.slane %v505_v24, 5  ;;  %v510_v41 = vshrl.u32 %v5485_v38, 16  ;;  %v5006_v31 = vld [vmem:[%s6175_s1 + $0x188] sm:$0xff]   ;;  %v5524_v24 = vld [vmem:[%s5154_s10 + $0x90] sm:$0xf] }
  0x4b   : > { %v491_v59 = vrot.slane %v489_v63, 5  ;;  %4325 = vmatpush3.bf16.msra.mxu1 %v5009_v4  ;;  %v474_v25 = vsel %vm5199_vm2, %v469_v44, %v473_v36  ;;  %v1266_v63 = vrot.slane %v5240_v9, 5  ;;  %v484_v4 = vsel %vm5199_vm2, %v479_v34, %v483_v19  ;;  %v5511_v36 = vld [vmem:[%s5154_s10 + $0x8c] sm:$0x1]  ;;  %v5527_v34 = vld [vmem:[%s5154_s10 + $0x94] sm:$0xf] }
  0x4c   : > { %4358 = vmatprep.subr.bf16.mxu1 %v5476_v52  ;;  %v513_v44 = vshll.u32 %v5485_v38, 16  ;;  %v502_v21 = vor.u32 %v501_v7, %v497_v46  ;;  %v512_v55 = vrot.slane %v510_v41, 4  ;;  %v529_v7 = vshll.u32 %v5511_v36, 16 }
  0x4d   : > { %4517 = vmatpush3.bf16.msra.mxu0 %v5002_v45  ;;  %v492_v48 = vor.u32 %v491_v59, %v488_v57  ;;  %v1269_v45 = vrot.slane %v5247_v14, 5  ;;  %v5515_v57 = vcombine.low %v474_v25, %v484_v4  ;;  %v1267_v9 = vsel %vm5406_vm5, %v3678_v8, %v1266_v63 }
  0x4e   : > { %4550 = vmatprep.subr.bf16.mxu0 %v5004_v29  ;;  %v1268_v19 = vrot.slane %v1266_v63, 4  ;;  %v515_v14 = vrot.slane %v513_v44, 5  ;;  %v519_v59 = vshll.u32 %v5505_v3, 16  ;;  %v523_v8 = vshrl.u32 %v5505_v3, 16 }
  0x4f   : > { %6204 = vst [vmem:[#allocation8_spill] sm:$0xff] %v5515_v57  ;;  %v493_v49 = vrot.slane %v492_v48, 4  ;;  %4295 = vmatmul.mubr.bf16.gmra.mrb[16].mxu1 %v5515_v57  ;;  %v503_v48 = vrot.slane %v502_v21, 4  ;;  %v3679_v44 = vrot.slane %v5252_v22, 9  ;;  %v531_v21 = vrot.slane %v529_v7, 5  ;;  %v5008_v22 = vld [vmem:[%s6175_s1 + $0x190] sm:$0xff]  }
  0x50   : > { %4519 = vmatmul.mubr.bf16.vlgmr.msra.gmra.mrb[0].mxu0 %v5500_v26  ;;  %v1270_v63 = vsel %vm5406_vm5, %v1268_v19, %v1269_v45  ;;  %v516_v4 = vor.u32 %v515_v14, %v512_v55  ;;  %v521_v41 = vrot.slane %v519_v59, 5  ;;  %v1276_v45 = vrot.slane %v5266_v35, 5  ;;  %v5563_v59 = vld [vmem:[%s5154_s10 + $0x9c] sm:$0xf] }
  0x51   : > { %v498_v25 = vsel %vm5199_vm2, %v493_v49, %v497_v46  ;;  %4551 = vmatpush3.bf16.msra.mxu0 %v5004_v29  ;;  %v508_v57 = vsel %vm5199_vm2, %v503_v48, %v507_v42  ;;  %v5540_v46 = vcombine.low %v1267_v9, %v1270_v63  ;;  %v525_v49 = vrot.slane %v523_v8, 4  ;;  %v5551_v42 = vld [vmem:[%s5154_s10 + $0x98] sm:$0x1]  ;;  %v5566_v63 = vld [vmem:[%s5154_s10 + $0xa0] sm:$0xf] }
  0x52   : > { %v5542_v17 = vcombine.low %v498_v25, %v508_v57  ;;  %v517_v61 = vrot.slane %v516_v4, 4  ;;  %4552 = vmatprep.subr.bf16.mxu0 %v5006_v31  ;;  %v534_v57 = vshrl.u32 %v5524_v24, 16  ;;  %v537_v9 = vshll.u32 %v5524_v24, 16 }
  0x53   : > { %4522 = vmatprep.mubr.bf16.mxu0 %v5540_v46  ;;  %v526_v29 = vor.u32 %v525_v49, %v521_v41  ;;  %v543_v19 = vshll.u32 %v5527_v34, 16  ;;  %v1274_v35 = vsel %vm5406_vm5, %v3679_v44, %v1273_v20  ;;  %v1275_v55 = vrot.slane %v1273_v20, 4  ;;  %v5573_v20 = vld [vmem:[%s5154_s10 + $0xa4] sm:$0x1] }
  0x54   : > { %6205 = vst [vmem:[#allocation9_spill] sm:$0xff] %v5542_v17  ;;  %4298 = vmatprep.mubr.bf16.mxu1 %v5542_v17  ;;  %v522_v30 = vsel %vm5199_vm2, %v517_v61, %v521_v41  ;;  %v547_v14 = vshrl.u32 %v5527_v34, 16  ;;  %v536_v48 = vrot.slane %v534_v57, 4  ;;  %v539_v8 = vrot.slane %v537_v9, 5 }
  0x55   : > { %v527_v25 = vrot.slane %v526_v29, 4  ;;  %4553 = vmatpush3.bf16.msra.mxu0 %v5006_v31  ;;  %v545_v7 = vrot.slane %v543_v19, 5  ;;  %v1277_v4 = vsel %vm5406_vm5, %v1275_v55, %v1276_v45  ;;  %v553_v61 = vshll.u32 %v5551_v42, 16  ;;  %v5010_v45 = vld [vmem:[%s6175_s1 + $0x198] sm:$0xff]  }
  0x56   : > { %v549_v49 = vrot.slane %v547_v14, 4  ;;  %v3680_v41 = vrot.slane %v5281_v58, 9  ;;  %4554 = vmatprep.subr.bf16.mxu0 %v5008_v22  ;;  %v5577_v44 = vcombine.low %v1274_v35, %v1277_v4  ;;  %v540_v29 = vor.u32 %v539_v8, %v536_v48 }
  0x57   : > { %v532_v31 = vsel %vm5199_vm2, %v527_v25, %v531_v21  ;;  %v1280_v57 = vrot.slane %v5295_v0, 5  ;;  %v555_v58 = vrot.slane %v553_v61, 5  ;;  %v1283_v55 = vrot.slane %v5298_v1, 5  ;;  %v5591_v25 = vld [vmem:[%s5154_s10 + $0xa8] sm:$0xf] }
  0x58   : > { %v5583_v9 = vcombine.low %v522_v30, %v532_v31  ;;  %v550_v19 = vor.u32 %v549_v49, %v545_v7  ;;  %4523 = vmatmul.mubr.bf16.gmra.mrb[4].mxu0 %v5577_v44  ;;  %v541_v14 = vrot.slane %v540_v29, 4  ;;  %v558_v0 = vshrl.u32 %v5563_v59, 16  ;;  %v5014_v30 = vld [vmem:[%s6175_s1 + $0x1a0] sm:$0xff]   ;;  %v5601_v49 = vld [vmem:[%s5154_s10 + $0xac] sm:$0xf] }
  0x59   : > { %v1281_v21 = vsel %vm5406_vm5, %v3680_v41, %v1280_v57  ;;  %v1282_v35 = vrot.slane %v1280_v57, 4  ;;  %v561_v1 = vshll.u32 %v5563_v59, 16  ;;  %v567_v8 = vshll.u32 %v5566_v63, 16  ;;  %4555 = vmatpush3.bf16.msra.mxu0 %v5008_v22 }
  0x5a   : > { %6206 = vst [vmem:[#allocation10_spill] sm:$0xff] %v5583_v9  ;;  %4299 = vmatmul.mubr.bf16.gmra.mrb[20].mxu1 %v5583_v9  ;;  %v551_v48 = vrot.slane %v550_v19, 4  ;;  %v571_v4 = vshrl.u32 %v5566_v63, 16  ;;  %v546_v61 = vsel %vm5199_vm2, %v541_v14, %v545_v7  ;;  %v560_v31 = vrot.slane %v558_v0, 4  ;;  %4556 = vmatprep.subr.bf16.mxu0 %v5010_v45  ;;  %v5616_v14 = vld [vmem:[%s5154_s10 + $0xb0] sm:$0x1] }
  0x5b   : > { %v1284_v41 = vsel %vm5406_vm5, %v1282_v35, %v1283_v55  ;;  %v577_v29 = vshll.u32 %v5573_v20, 16  ;;  %v563_v9 = vrot.slane %v561_v1, 5  ;;  %v569_v17 = vrot.slane %v567_v8, 5 }
  0x5c   : > { %v556_v57 = vsel %vm5199_vm2, %v551_v48, %v555_v58  ;;  %v5610_v19 = vcombine.low %v1281_v21, %v1284_v41  ;;  %v573_v56 = vrot.slane %v571_v4, 4  ;;  %v3681_v7 = vrot.slane %v5312_v27, 9 }
  0x5d   : > { %v5612_v22 = vcombine.low %v546_v61, %v556_v57  ;;  %v579_v18 = vrot.slane %v577_v29, 5  ;;  %v564_v55 = vor.u32 %v563_v9, %v560_v31  ;;  %v1287_v35 = vrot.slane %v5315_v28, 5  ;;  %4557 = vmatpush3.bf16.msra.mxu0 %v5010_v45  ;;  %v5018_v28 = vld [vmem:[%s6175_s1 + $0x1a8] sm:$0xff]  }
  0x5e   : > { %4526 = vmatprep.mubr.bf16.mxu0 %v5610_v19  ;;  %v1290_v0 = vrot.slane %v5321_v33, 5  ;;  %v582_v58 = vshrl.u32 %v5591_v25, 16  ;;  %v574_v21 = vor.u32 %v573_v56, %v569_v17  ;;  %v585_v48 = vshll.u32 %v5591_v25, 16  ;;  %4558 = vmatprep.subr.bf16.mxu0 %v5014_v30 }
  0x5f   : > { %6207 = vst [vmem:[#allocation11_spill] sm:$0xff] %v5612_v22  ;;  %4302 = vmatprep.mubr.bf16.mxu1 %v5612_v22  ;;  %v591_v1 = vshll.u32 %v5601_v49, 16  ;;  %v595_v27 = vshrl.u32 %v5601_v49, 16  ;;  %v565_v9 = vrot.slane %v564_v55, 4  ;;  %v1288_v33 = vsel %vm5406_vm5, %v3681_v7, %v1287_v35  ;;  %v5638_v22 = vld [vmem:[%s5154_s10 + $0xb4] sm:$0xf] }
  0x60   : > { %v1289_v45 = vrot.slane %v1287_v35, 4  ;;  %v584_v8 = vrot.slane %v582_v58, 4  ;;  %v575_v56 = vrot.slane %v574_v21, 4  ;;  %v587_v4 = vrot.slane %v585_v48, 5  ;;  %v5645_v48 = vld [vmem:[%s5154_s10 + $0xb8] sm:$0xf] }
  0x61   : > { %v593_v61 = vrot.slane %v591_v1, 5  ;;  %v597_v41 = vrot.slane %v595_v27, 4  ;;  %v570_v31 = vsel %vm5199_vm2, %v565_v9, %v569_v17  ;;  %v601_v57 = vshll.u32 %v5616_v14, 16  ;;  %4559 = vmatpush3.bf16.msra.mxu0 %v5014_v30  ;;  %v5022_v17 = vld [vmem:[%s6175_s1 + $0x1b0] sm:$0xff]   ;;  %v5655_v27 = vld [vmem:[%s5154_s10 + $0xbc] sm:$0x1] }
  0x62   : > { %v1291_v29 = vsel %vm5406_vm5, %v1289_v45, %v1290_v0  ;;  %v3682_v55 = vrot.slane %v5349_v5, 9  ;;  %v580_v7 = vsel %vm5199_vm2, %v575_v56, %v579_v18  ;;  %v588_v58 = vor.u32 %v587_v4, %v584_v8  ;;  %4560 = vmatprep.subr.bf16.mxu0 %v5018_v28  ;;  %v5026_v4 = vld [vmem:[%s6175_s1 + $0x1b8] sm:$0xff]  }
  0x63   : > { %v5642_v35 = vcombine.low %v1288_v33, %v1291_v29  ;;  %v598_v21 = vor.u32 %v597_v41, %v593_v61  ;;  %v5650_v0 = vcombine.low %v570_v31, %v580_v7  ;;  %v603_v5 = vrot.slane %v601_v57, 5 }
  0x64   : > { %v1294_v1 = vrot.slane %v5352_v6, 5  ;;  %v1297_v30 = vrot.slane %v5355_v10, 5  ;;  %v589_v18 = vrot.slane %v588_v58, 4  ;;  %v606_v33 = vshrl.u32 %v5638_v22, 16 }
  0x65   : > { %6208 = vst [vmem:[#allocation12_spill] sm:$0xff] %v5650_v0  ;;  %4527 = vmatmul.mubr.bf16.gmra.mrb[8].mxu0 %v5642_v35  ;;  %v599_v9 = vrot.slane %v598_v21, 4  ;;  %v609_v45 = vshll.u32 %v5638_v22, 16  ;;  %4303 = vmatmul.mubr.bf16.gmra.mrb[24].mxu1 %v5650_v0  ;;  %v615_v6 = vshll.u32 %v5645_v48, 16  ;;  %v619_v10 = vshrl.u32 %v5645_v48, 16 }
  0x66   : > { %v1295_v8 = vsel %vm5406_vm5, %v3682_v55, %v1294_v1  ;;  %v1296_v56 = vrot.slane %v1294_v1, 4  ;;  %4561 = vmatpush3.bf16.msra.mxu0 %v5018_v28  ;;  %v594_v41 = vsel %vm5199_vm2, %v589_v18, %v593_v61  ;;  %v608_v29 = vrot.slane %v606_v33, 4 }
  0x67   : > { %v604_v31 = vsel %vm5199_vm2, %v599_v9, %v603_v5  ;;  %v611_v57 = vrot.slane %v609_v45, 5  ;;  %4562 = vmatprep.subr.bf16.mxu0 %v5022_v17  ;;  %v617_v58 = vrot.slane %v615_v6, 5  ;;  %v621_v28 = vrot.slane %v619_v10, 4 }
  0x68   : > { %v5672_v55 = vcombine.low %v594_v41, %v604_v31  ;;  %v1298_v7 = vsel %vm5406_vm5, %v1296_v56, %v1297_v30  ;;  %v625_v0 = vshll.u32 %v5655_v27, 16  ;;  %v3683_v61 = vrot.slane %v5375_v32, 9  ;;  %v5687_v30 = vld [vmem:[%s6175_s1 + $0x1c0] sm:$0xff]  }
  0x69   : > { %v5676_v21 = vcombine.low %v1295_v8, %v1298_v7  ;;  %v612_v1 = vor.u32 %v611_v57, %v608_v29  ;;  %v622_v5 = vor.u32 %v621_v28, %v617_v58  ;;  %v1301_v18 = vrot.slane %v5383_v47, 5 }
  0x6a   : > { %4306 = vmatprep.mubr.bf16.mxu1 %v5672_v55  ;;  %v1304_v9 = vrot.slane %v5389_v50, 5  ;;  %v3684_v33 = vrot.slane %v5417_v40, 9  ;;  %4563 = vmatpush3.bf16.msra.mxu0 %v5022_v17  ;;  %v627_v8 = vrot.slane %v625_v0, 5  ;;  %v1308_v56 = vrot.slane %v5424_v53, 5 }
  0x6b   : > { %4530 = vmatprep.mubr.bf16.mxu0 %v5676_v21  ;;  %v613_v45 = vrot.slane %v612_v1, 4  ;;  %v1311_v6 = vrot.slane %v5432_v62, 5  ;;  %4564 = vmatprep.subr.bf16.mxu0 %v5026_v4  ;;  %v623_v10 = vrot.slane %v622_v5, 4  ;;  %v1302_v50 = vsel %vm5406_vm5, %v3683_v61, %v1301_v18 }
  0x6c   : > { %v1303_v41 = vrot.slane %v1301_v18, 4  ;;  %v3685_v17 = vrot.slane %v5447_v2, 9  ;;  %v1309_v29 = vsel %vm5406_vm5, %v3684_v33, %v1308_v56  ;;  %v1310_v57 = vrot.slane %v1308_v56, 4 }
  0x6d   : > { %v618_v31 = vsel %vm5199_vm2, %v613_v45, %v617_v58  ;;  %v1315_v0 = vrot.slane %v5461_v54, 5  ;;  %v628_v62 = vsel %vm5199_vm2, %v623_v10, %v627_v8  ;;  %v1318_v28 = vrot.slane %v5468_v16, 5 }
  0x6e   : > { %v1305_v7 = vsel %vm5406_vm5, %v1303_v41, %v1304_v9  ;;  %v3686_v1 = vrot.slane %v5485_v38, 9  ;;  %4565 = vmatpush3.bf16.msra.mxu0 %v5026_v4  ;;  %v5706_v61 = vcombine.low %v618_v31, %v628_v62  ;;  %v1312_v5 = vsel %vm5406_vm5, %v1310_v57, %v1311_v6  ;;  %v5017_v57 = vld [vmem:[%s6175_s1 + $0x88] sm:$0xff]  }
  0x6f   : > { %v5708_v58 = vcombine.low %v1302_v50, %v1305_v7  ;;  %4598 = vmatprep.subr.bf16.mxu0 %v5687_v30  ;;  %v5713_v18 = vcombine.low %v1309_v29, %v1312_v5  ;;  %v1317_v33 = vrot.slane %v1315_v0, 4  ;;  %v1322_v45 = vrot.slane %v5505_v3, 5 }
  0x70   : > { %v1325_v9 = vrot.slane %v5511_v36, 5  ;;  %4307 = vmatmul.mubr.bf16.gmra.mrb[28].mxu1 %v5706_v61  ;;  %v6209_v16 = vcombine.low %v5163_v12, %v5166_v13  ;;  %v1316_v4 = vsel %vm5406_vm5, %v3685_v17, %v1315_v0  ;;  %v1329_v6 = vrot.slane %v5527_v34, 5 }
  0x71   : > { %4531 = vmatmul.mubr.bf16.gmra.mrb[12].mxu0 %v5708_v58  ;;  %v1319_v8 = vsel %vm5406_vm5, %v1317_v33, %v1318_v28  ;;  %v1324_v56 = vrot.slane %v1322_v45, 4  ;;  %v1336_v36 = vrot.slane %v5566_v63, 5  ;;  %v1323_v10 = vsel %vm5406_vm5, %v3686_v1, %v1322_v45 }
  0x72   : > { %4326 = vmatprep.mubr.bf16.mxu1 %v6209_v16  ;;  %4534 = vmatprep.mubr.bf16.mxu0 %v5713_v18  ;;  %v5733_v13 = vcombine.low %v1316_v4, %v1319_v8  ;;  %v3687_v50 = vrot.slane %v5524_v24, 9  ;;  %v1332_v41 = vrot.slane %v5551_v42, 5  ;;  %v1331_v17 = vrot.slane %v1329_v6, 4 }
  0x73   : > { %v1326_v12 = vsel %vm5406_vm5, %v1324_v56, %v1325_v9  ;;  %v3688_v31 = vrot.slane %v5563_v59, 9  ;;  %v1338_v0 = vrot.slane %v1336_v36, 4  ;;  %v1339_v62 = vrot.slane %v5573_v20, 5 }
  0x74   : > { %v5738_v29 = vcombine.low %v1323_v10, %v1326_v12  ;;  %v1330_v7 = vsel %vm5406_vm5, %v3687_v50, %v1329_v6  ;;  %v1343_v42 = vrot.slane %v5601_v49, 5  ;;  %v5751_v28 = vcombine.low %v5375_v32, %v5383_v47  ;;  %v5021_v47 = vld [vmem:[%s6175_s1 + $0x90] sm:$0xff]   ;;  %v222_v6 = vld [vmem:[%s5154_s10 + $0xc8] sm:$0x1]  ;;  %v5066_v10 = vld [vmem:[%s5154_s10 + $0x40] sm:$0xf] }
  0x75   : > { %v1333_v20 = vsel %vm5406_vm5, %v1331_v17, %v1332_v41  ;;  %v1337_v1 = vsel %vm5406_vm5, %v3688_v31, %v1336_v36  ;;  %v3689_v5 = vrot.slane %v5591_v25, 9  ;;  %v5762_v33 = vcombine.low %v5417_v40, %v5424_v53  ;;  %v5065_v36 = vld [vmem:[%s5154_s10 + $0x3c] sm:$0xf]  ;;  %v5067_v41 = vld [vmem:[%s5154_s10 + $0x48] sm:$0xf] }
  0x76   : > { %v1340_v32 = vsel %vm5406_vm5, %v1338_v0, %v1339_v62  ;;  %v5773_v45 = vcombine.low %v5447_v2, %v5461_v54  ;;  %v5777_v40 = vcombine.low %v5485_v38, %v5505_v3  ;;  %v5781_v53 = vcombine.low %v5524_v24, %v5527_v34  ;;  %v5801_v24 = vld [vmem:[%s5154_s10 + $0xc4] sm:$0xf]  ;;  %v5068_v17 = vld [vmem:[%s5154_s10 + $0x4c] sm:$0xf] }
  0x77   : > { %v5785_v9 = vcombine.low %v5563_v59, %v5566_v63  ;;  %v5789_v16 = vcombine.low %v5591_v25, %v5601_v49  ;;  %v5791_v4 = vcombine.low %v1330_v7, %v1333_v20  ;;  %v1345_v2 = vrot.slane %v1343_v42, 4  ;;  %v5025_v25 = vld [vmem:[%s6175_s1 + $0x98] sm:$0xff]  }
  0x78   : > { %4327 = vmatmul.mubr.bf16.vlgmr.msra.gmra.mrb[0].mxu1 %v5212_v43  ;;  %v1346_v54 = vrot.slane %v5616_v14, 5  ;;  %v5796_v38 = vcombine.low %v5638_v22, %v5645_v48  ;;  %v5798_v3 = vcombine.low %v1337_v1, %v1340_v32  ;;  %v3690_v34 = vrot.slane %v5638_v22, 9  ;;  %v5815_v14 = vld [vmem:[%s5154_s10 + $0xc0] sm:$0xf] }
  0x79   : > { %4535 = vmatmul.mubr.bf16.gmra.mrb[16].mxu0 %v5733_v13  ;;  %4359 = vmatpush3.bf16.msra.mxu1 %v5476_v52  ;;  %v1350_v52 = vrot.slane %v5645_v48, 5  ;;  %v1353_v63 = vrot.slane %v5655_v27, 5  ;;  %v1344_v49 = vsel %vm5406_vm5, %v3689_v5, %v1343_v42  ;;  %v2230_v48 = vrot.slane %v5801_v24, 5  ;;  %v5029_v27 = vld [vmem:[%s6175_s1 + $0xa0] sm:$0xff]  }
  0x7a   : > { %4330 = vmatprep.mubr.bf16.mxu1 %v5288_v60  ;;  %4538 = vmatprep.mubr.bf16.mxu0 %v5738_v29  ;;  %v1347_v22 = vsel %vm5406_vm5, %v1345_v2, %v1346_v54  ;;  %v5830_v12 = vcombine.low %v5065_v36, %v5066_v10  ;;  %v5836_v31 = vcombine.low %v5067_v41, %v5068_v17  ;;  %v1945_v0 = vshll.u32 %v5815_v14, 16  ;;  %v5033_v54 = vld [vmem:[%s6175_s1 + $0xa8] sm:$0xff]   ;;  %v5037_v36 = vld [vmem:[%s6175_s1 + $0xb0] sm:$0xff]   ;;  %v5070_v10 = vld [vmem:[%s5154_s10 + $0x58] sm:$0xf] }
  0x7b   : > { %4360 = vmatprep.subr.bf16.mxu1 %v5017_v57  ;;  %v1352_v59 = vrot.slane %v1350_v52, 4  ;;  %v1351_v8 = vsel %vm5406_vm5, %v3690_v34, %v1350_v52  ;;  %v5832_v50 = vcombine.low %v1344_v49, %v1347_v22  ;;  %v1951_v62 = vshll.u32 %v5801_v24, 16 }
  0x7c   : > { %v1955_v7 = vshrl.u32 %v5801_v24, 16  ;;  %v3781_v20 = vrot.slane %v5815_v14, 9  ;;  %v2232_v1 = vrot.slane %v2230_v48, 4  ;;  %v2233_v5 = vrot.slane %v222_v6, 5 }
  0x7d   : > { %4361 = vmatpush3.bf16.msra.mxu1 %v5017_v57  ;;  %v1354_v56 = vsel %vm5406_vm5, %v1352_v59, %v1353_v63  ;;  %v1942_v57 = vshrl.u32 %v5815_v14, 16  ;;  %v1953_v52 = vrot.slane %v1951_v62, 5  ;;  %v1961_v63 = vshll.u32 %v222_v6, 16  ;;  %v5069_v6 = vld [vmem:[%s5154_s10 + $0x54] sm:$0xf]  ;;  %v5043_v62 = vld [vmem:[%s6175_s1 + $0xc0] sm:$0xff]  }
  0x7e   : > { %4362 = vmatprep.subr.bf16.mxu1 %v5021_v47  ;;  %v5842_v42 = vcombine.low %v1351_v8, %v1354_v56  ;;  %v1957_v2 = vrot.slane %v1955_v7, 4  ;;  %v2234_v49 = vsel %vm5406_vm5, %v2232_v1, %v2233_v5  ;;  %v5861_v41 = vcombine.low %v5069_v6, %v5070_v10  ;;  %v5034_v7 = vld [vmem:[%s6175_s1 + $0x1c8] sm:$0xff]   ;;  %v5042_v1 = vld [vmem:[%s6175_s1 + $0x1d8] sm:$0xff]   ;;  %v5047_v6 = vld [vmem:[%s6175_s1 + $0xd0] sm:$0xff]  }
  0x7f   : > { %v1944_v32 = vrot.slane %v1942_v57, 4  ;;  %v1963_v56 = vrot.slane %v1961_v63, 5  ;;  %v5050_v10 = vld [vmem:[%s6175_s1 + $0xd8] sm:$0xff]  }
  0x80   : > { %4331 = vmatmul.mubr.bf16.gmra.mrb[4].mxu1 %v5359_v11  ;;  %v1958_v59 = vor.u32 %v1957_v2, %v1953_v52  ;;  %v5073_v2 = vld [vmem:[%s5154_s10] sm:$0xf] }
  0x81   : > { %4539 = vmatmul.mubr.bf16.gmra.mrb[20].mxu0 %v5791_v4  ;;  %4334 = vmatprep.mubr.bf16.mxu1 %v5363_v15 }
  0x82   : > { %4542 = vmatprep.mubr.bf16.mxu0 %v5798_v3  ;;  %4363 = vmatpush3.bf16.msra.mxu1 %v5021_v47  ;;  %v1947_v47 = vrot.slane %v1945_v0, 5  ;;  %v1959_v8 = vrot.slane %v1958_v59, 4  ;;  %v5041_v0 = vld [vmem:[%s6175_s1 + $0xb8] sm:$0xff]   ;;  %v5046_v59 = vld [vmem:[%s6175_s1 + $0x1e8] sm:$0xff]  }
  0x83   : > { %4364 = vmatprep.subr.bf16.mxu1 %v5025_v25 }
  0x84   : > { %v1948_v34 = vor.u32 %v1947_v47, %v1944_v32  ;;  %v5044_v32 = vld [vmem:[%s6175_s1 + $0x1e0] sm:$0xff]   ;;  %v5072_v47 = vld [vmem:[%s5154_s10 + $0x8] sm:$0x1] }
  0x86   : > { %4365 = vmatpush3.bf16.msra.mxu1 %v5025_v25  ;;  %v2231_v25 = vsel %vm5406_vm5, %v3781_v20, %v2230_v48  ;;  %v1949_v22 = vrot.slane %v1948_v34, 4  ;;  %v5038_v20 = vld [vmem:[%s6175_s1 + $0x1d0] sm:$0xff]  }
  0x87   : > { %4366 = vmatprep.subr.bf16.mxu1 %v5029_v27  ;;  %v5863_v17 = vcombine.low %v2231_v25, %v2234_v49  ;;  %v5048_v49 = vld [vmem:[%s6175_s1 + $0x1f0] sm:$0xff]  }
  0x88   : > { %4335 = vmatmul.mubr.bf16.gmra.mrb[8].mxu1 %v5830_v12  ;;  %v1954_v48 = vsel %vm5199_vm2, %v1949_v22, %v1953_v52  ;;  %v1248_v52 = vrot.slane %v5072_v47, 5  ;;  %v6212_v47 = vld [vmem:[#allocation4_spill] sm:$0xff] }
  0x89   : > { %4543 = vmatmul.mubr.bf16.gmra.mrb[24].mxu0 %v5832_v50  ;;  %4338 = vmatprep.mubr.bf16.mxu1 %v5836_v31 }
  0x8a   : > { %4546 = vmatprep.mubr.bf16.mxu0 %v5842_v42  ;;  %4367 = vmatpush3.bf16.msra.mxu1 %v5029_v27  ;;  %v1964_v27 = vsel %vm5199_vm2, %v1959_v8, %v1963_v56  ;;  %v5052_v8 = vld [vmem:[%s6175_s1 + $0x1f8] sm:$0xff]   ;;  %v5054_v56 = vld [vmem:[%s6175_s1 + $0x200] sm:$0xff]  }
  0x8b   : > { %4368 = vmatprep.subr.bf16.mxu1 %v5033_v54  ;;  %v5869_v57 = vcombine.low %v1954_v48, %v1964_v27  ;;  %v5950_v48 = vcombine.low %v5815_v14, %v5801_v24  ;;  %v5055_v27 = vld [vmem:[%s6175_s1 + $0xe8] sm:$0xff]   ;;  %v5057_v24 = vld [vmem:[%s6175_s1 + $0xf0] sm:$0xff]  }
  0x8e   : > { %4369 = vmatpush3.bf16.msra.mxu1 %v5033_v54  ;;  %v3675_v54 = vrot.slane %v5073_v2, 9  ;;  %v5061_v2 = vld [vmem:[%s6175_s1 + $0x220] sm:$0xff]  }
  0x8f   : > { %4370 = vmatprep.subr.bf16.mxu1 %v5037_v36 }
  0x90   : > { %4339 = vmatmul.mubr.bf16.gmra.mrb[12].mxu1 %v5861_v41 }
  0x91   : > { %4547 = vmatmul.mubr.bf16.gmra.mrb[28].mxu0 %v5863_v17  ;;  %4342 = vmatprep.mubr.bf16.mxu1 %v5751_v28 }
  0x92   : > { %4566 = vmatprep.mubr.bf16.mxu0 %v5288_v60  ;;  %4371 = vmatpush3.bf16.msra.mxu1 %v5037_v36  ;;  %v5045_v36 = vld [vmem:[%s6175_s1 + $0xc8] sm:$0xff]  }
  0x93   : > { %4372 = vmatprep.subr.bf16.mxu1 %v5041_v0 }
  0x96   : > { %4373 = vmatpush3.bf16.msra.mxu1 %v5041_v0  ;;  %v5960_v0 = vld [vmem:[%s5154_s10 + $0xcc] sm:$0xf] }
  0x97   : > { %4406 = vmatprep.subr.bf16.mxu1 %v5043_v62 }
  0x98   : > { %4343 = vmatmul.mubr.bf16.gmra.mrb[16].mxu1 %v5762_v33 }
  0x99   : > { %4567 = vmatmul.mubr.bf16.vlgmr.msra.gmra.mrb[0].mxu0 %v5359_v11  ;;  %4346 = vmatprep.mubr.bf16.mxu1 %v5773_v45 }
  0x9a   : > { %4599 = vmatpush3.bf16.msra.mxu0 %v5687_v30  ;;  %4570 = vmatprep.mubr.bf16.mxu0 %v5363_v15  ;;  %v5071_v30 = vld [vmem:[%s5154_s10 + $0x4] sm:$0xf] }
  0x9b   : > { %4600 = vmatprep.subr.bf16.mxu0 %v5034_v7  ;;  %v1245_v5 = vrot.slane %v5071_v30, 5  ;;  %v6210_v30 = vld [vmem:[#allocation2_spill] sm:$0xff] }
  0x9d   : > { %v1247_v34 = vrot.slane %v1245_v5, 4  ;;  %v1246_v63 = vsel %vm5406_vm5, %v3675_v54, %v1245_v5  ;;  %v5058_v5 = vld [vmem:[%s6175_s1 + $0x210] sm:$0xff]   ;;  %v5062_v54 = vld [vmem:[%s6175_s1 + $0x228] sm:$0xff]  }
  0x9e   : > { %4601 = vmatpush3.bf16.msra.mxu0 %v5034_v7  ;;  %v5059_v7 = vld [vmem:[%s6175_s1 + $0xf8] sm:$0xff]  }
  0x9f   : > { %4602 = vmatprep.subr.bf16.mxu0 %v5038_v20  ;;  %v1249_v25 = vsel %vm5406_vm5, %v1247_v34, %v1248_v52  ;;  %v6213_v52 = vld [vmem:[#allocation5_spill] sm:$0xff]  ;;  %v6214_v34 = vld [vmem:[#allocation6_spill] sm:$0xff] }
  0xa0   : > { %4347 = vmatmul.mubr.bf16.gmra.mrb[20].mxu1 %v5777_v40  ;;  %v3707_v22 = vcombine.low %v1246_v63, %v1249_v25  ;;  %v5063_v63 = vld [vmem:[%s6175_s1 + $0x230] sm:$0xff]   ;;  %v5064_v25 = vld [vmem:[%s6175_s1 + $0x238] sm:$0xff]  }
  0xa1   : > { %4571 = vmatmul.mubr.bf16.gmra.mrb[4].mxu0 %v5830_v12  ;;  %4350 = vmatprep.mubr.bf16.mxu1 %v5781_v53 }
  0xa2   : > { %4574 = vmatprep.mubr.bf16.mxu0 %v5836_v31  ;;  %4603 = vmatpush3.bf16.msra.mxu0 %v5038_v20  ;;  %v5056_v20 = vld [vmem:[%s6175_s1 + $0x208] sm:$0xff]  }
  0xa3   : > { %4604 = vmatprep.subr.bf16.mxu0 %v5042_v1 }
  0xa6   : > { %4605 = vmatpush3.bf16.msra.mxu0 %v5042_v1  ;;  %v5074_v1 = vld [vmem:[%s6175_s1 + $0x100] sm:$0xff]  }
  0xa7   : > { %4606 = vmatprep.subr.bf16.mxu0 %v5044_v32 }
  0xa8   : > { %4351 = vmatmul.mubr.bf16.gmra.mrb[24].mxu1 %v5785_v9 }
  0xa9   : > { %4575 = vmatmul.mubr.bf16.gmra.mrb[8].mxu0 %v5861_v41  ;;  %4354 = vmatprep.mubr.bf16.mxu1 %v5789_v16 }
  0xaa   : > { %4578 = vmatprep.mubr.bf16.mxu0 %v5751_v28  ;;  %4607 = vmatpush3.bf16.msra.mxu0 %v5044_v32  ;;  %v5060_v32 = vld [vmem:[%s6175_s1 + $0x218] sm:$0xff]  }
  0xab   : > { %4608 = vmatprep.subr.bf16.mxu0 %v5046_v59 }
  0xae   : > { %4609 = vmatpush3.bf16.msra.mxu0 %v5046_v59  ;;  %v6215_v59 = vld [vmem:[#allocation7_spill] sm:$0xff] }
  0xaf   : > { %4610 = vmatprep.subr.bf16.mxu0 %v5048_v49 }
  0xb0   : > { %4355 = vmatmul.mubr.bf16.gmra.mrb[28].mxu1 %v5796_v38 }
  0xb1   : > { %4579 = vmatmul.mubr.bf16.gmra.mrb[12].mxu0 %v5762_v33  ;;  %4374 = vmatprep.mubr.bf16.mxu1 %v3707_v22  ;;  %v6217_v22 = vld [vmem:[#allocation9_spill] sm:$0xff] }
  0xb2   : > { %4582 = vmatprep.mubr.bf16.mxu0 %v5773_v45  ;;  %4611 = vmatpush3.bf16.msra.mxu0 %v5048_v49  ;;  %v6216_v49 = vld [vmem:[#allocation8_spill] sm:$0xff] }
  0xb3   : > { %4612 = vmatprep.subr.bf16.mxu0 %v5052_v8 }
  0xb6   : > { %4613 = vmatpush3.bf16.msra.mxu0 %v5052_v8  ;;  %v6218_v8 = vld [vmem:[#allocation10_spill] sm:$0xff] }
  0xb7   : > { %4646 = vmatprep.subr.bf16.mxu0 %v5054_v56 }
  0xb8   : > { %4375 = vmatmul.mubr.bf16.vlgmr.msra.gmra.mrb[0].mxu1 %v5454_v39  ;;  %v5053_v39 = vld [vmem:[%s6175_s1 + $0xe0] sm:$0xff]  }
  0xb9   : > { %4583 = vmatmul.mubr.bf16.gmra.mrb[16].mxu0 %v5777_v40  ;;  %4407 = vmatpush3.bf16.msra.mxu1 %v5043_v62  ;;  %v5963_v62 = vld [vmem:[%s5154_s10 + $0xd0] sm:$0xf] }
  0xba   : > { %4378 = vmatprep.mubr.bf16.mxu1 %v5500_v26  ;;  %4586 = vmatprep.mubr.bf16.mxu0 %v5781_v53  ;;  %v3823_v14 = vcombine.low %v5960_v0, %v5963_v62 }
  0xbb   : > { %4408 = vmatprep.subr.bf16.mxu1 %v5045_v36 }
  0xbd   : > { %4409 = vmatpush3.bf16.msra.mxu1 %v5045_v36  ;;  %v2765_v36 = vshll.u32 %v5960_v0, 16 }
  0xbe   : > { %4410 = vmatprep.subr.bf16.mxu1 %v5047_v6 }
  0xc0   : > { %4379 = vmatmul.mubr.bf16.gmra.mrb[4].mxu1 %v5540_v46 }
  0xc1   : > { %4587 = vmatmul.mubr.bf16.gmra.mrb[20].mxu0 %v5785_v9  ;;  %4382 = vmatprep.mubr.bf16.mxu1 %v5577_v44 }
  0xc2   : > { %4590 = vmatprep.mubr.bf16.mxu0 %v5789_v16  ;;  %4411 = vmatpush3.bf16.msra.mxu1 %v5047_v6  ;;  %v2775_v6 = vshrl.u32 %v5963_v62, 16 }
  0xc3   : > { %4412 = vmatprep.subr.bf16.mxu1 %v5050_v10 }
  0xc6   : > { %4413 = vmatpush3.bf16.msra.mxu1 %v5050_v10  ;;  %v6219_v10 = vld [vmem:[#allocation11_spill] sm:$0xff] }
  0xc7   : > { %4414 = vmatprep.subr.bf16.mxu1 %v5053_v39 }
  0xc8   : > { %4383 = vmatmul.mubr.bf16.gmra.mrb[8].mxu1 %v5610_v19 }
  0xc9   : > { %4591 = vmatmul.mubr.bf16.gmra.mrb[24].mxu0 %v5796_v38  ;;  %4386 = vmatprep.mubr.bf16.mxu1 %v5642_v35 }
  0xca   : > { %4594 = vmatprep.mubr.bf16.mxu0 %v5950_v48  ;;  %4415 = vmatpush3.bf16.msra.mxu1 %v5053_v39 }
  0xcb   : > { %4416 = vmatprep.subr.bf16.mxu1 %v5055_v27 }
  0xce   : > { %4417 = vmatpush3.bf16.msra.mxu1 %v5055_v27  ;;  %v2767_v27 = vrot.slane %v2765_v36, 5 }
  0xcf   : > { %4418 = vmatprep.subr.bf16.mxu1 %v5057_v24 }
  0xd0   : > { %4387 = vmatmul.mubr.bf16.gmra.mrb[12].mxu1 %v5676_v21 }
  0xd1   : > { %4595 = vmatmul.mubr.bf16.gmra.mrb[28].mxu0 %v3823_v14  ;;  %4390 = vmatprep.mubr.bf16.mxu1 %v5708_v58  ;;  %v2777_v14 = vrot.slane %v2775_v6, 4 }
  0xd2   : > { %4614 = vmatprep.mubr.bf16.mxu0 %v5276_v51  ;;  %4419 = vmatpush3.bf16.msra.mxu1 %v5057_v24  ;;  %v6211_v51 = vld [vmem:[#allocation3_spill] sm:$0xff] }
  0xd3   : > { %4420 = vmatprep.subr.bf16.mxu1 %v5059_v7 }
  0xd6   : > { %4421 = vmatpush3.bf16.msra.mxu1 %v5059_v7  ;;  %v5076_v7 = vld [vmem:[%s6175_s1 + $0x110] sm:$0xff]  }
  0xd7   : > { %4694 = vmatprep.subr.bf16.mxu1 %v5074_v1 }
  0xd8   : > { %4391 = vmatmul.mubr.bf16.gmra.mrb[16].mxu1 %v5713_v18 }
  0xd9   : > { %4615 = vmatmul.mubr.bf16.vlgmr.msra.gmra.mrb[0].mxu0 %v6210_v30  ;;  %4394 = vmatprep.mubr.bf16.mxu1 %v5733_v13 }
  0xda   : > { %4647 = vmatpush3.bf16.msra.mxu0 %v5054_v56  ;;  %4618 = vmatprep.mubr.bf16.mxu0 %v6211_v51  ;;  %v2762_v56 = vshrl.u32 %v5960_v0, 16 }
  0xdb   : > { %4648 = vmatprep.subr.bf16.mxu0 %v5056_v20 }
  0xdc   : > { %v2764_v39 = vrot.slane %v2762_v56, 4 }
  0xde   : > { %4649 = vmatpush3.bf16.msra.mxu0 %v5056_v20  ;;  %v6220_v20 = vld [vmem:[#allocation12_spill] sm:$0xff] }
  0xdf   : > { %4650 = vmatprep.subr.bf16.mxu0 %v5058_v5 }
  0xe0   : > { %4395 = vmatmul.mubr.bf16.gmra.mrb[20].mxu1 %v5738_v29 }
  0xe1   : > { %4619 = vmatmul.mubr.bf16.gmra.mrb[4].mxu0 %v6212_v47  ;;  %4398 = vmatprep.mubr.bf16.mxu1 %v5791_v4 }
  0xe2   : > { %4622 = vmatprep.mubr.bf16.mxu0 %v6213_v52  ;;  %4651 = vmatpush3.bf16.msra.mxu0 %v5058_v5  ;;  %v5077_v5 = vld [vmem:[%s6175_s1 + $0x118] sm:$0xff]  }
  0xe3   : > { %4652 = vmatprep.subr.bf16.mxu0 %v5060_v32 }
  0xe6   : > { %4653 = vmatpush3.bf16.msra.mxu0 %v5060_v32 }
  0xe7   : > { %4654 = vmatprep.subr.bf16.mxu0 %v5061_v2 }
  0xe8   : > { %4399 = vmatmul.mubr.bf16.gmra.mrb[24].mxu1 %v5798_v3 }
  0xe9   : > { %4623 = vmatmul.mubr.bf16.gmra.mrb[8].mxu0 %v6214_v34  ;;  %4402 = vmatprep.mubr.bf16.mxu1 %v5832_v50 }
  0xea   : > { %4626 = vmatprep.mubr.bf16.mxu0 %v6215_v59  ;;  %4655 = vmatpush3.bf16.msra.mxu0 %v5061_v2 }
  0xeb   : > { %4656 = vmatprep.subr.bf16.mxu0 %v5062_v54 }
  0xee   : > { %4657 = vmatpush3.bf16.msra.mxu0 %v5062_v54  ;;  %v5079_v54 = vld [vmem:[%s6175_s1 + $0x128] sm:$0xff]  }
  0xef   : > { %4658 = vmatprep.subr.bf16.mxu0 %v5063_v63 }
  0xf0   : > { %4403 = vmatmul.mubr.bf16.gmra.mrb[28].mxu1 %v5842_v42 }
  0xf1   : > { %4627 = vmatmul.mubr.bf16.gmra.mrb[12].mxu0 %v6216_v49  ;;  %4422 = vmatprep.mubr.bf16.mxu1 %v5212_v43  ;;  %v2771_v43 = vshll.u32 %v5963_v62, 16 }
  0xf2   : > { %4630 = vmatprep.mubr.bf16.mxu0 %v6217_v22  ;;  %4659 = vmatpush3.bf16.msra.mxu0 %v5063_v63 }
  0xf3   : > { %4660 = vmatprep.subr.bf16.mxu0 %v5064_v25  ;;  %v2773_v24 = vrot.slane %v2771_v43, 5 }
  0xf5   : > { %v2778_v30 = vor.u32 %v2777_v14, %v2773_v24 }
  0xf6   : > { %4661 = vmatpush3.bf16.msra.mxu0 %v5064_v25 }
  0xf7   : > { %v2779_v47 = vrot.slane %v2778_v30, 4 }
  0xf8   : > { %4423 = vmatmul.mubr.bf16.vlgmr.msra.gmra.mrb[0].mxu1 %v5288_v60  ;;  %v5075_v60 = vld [vmem:[%s6175_s1 + $0x108] sm:$0xff]  }
  0xf9   : > { %4631 = vmatmul.mubr.bf16.gmra.mrb[16].mxu0 %v6218_v8  ;;  %4702 = vmatpush3.bf16.msra.mxu1 %v5074_v1  ;;  %v2768_v1 = vor.u32 %v2767_v27, %v2764_v39 }
  0xfa   : > { %4426 = vmatprep.mubr.bf16.mxu1 %v5359_v11  ;;  %4634 = vmatprep.mubr.bf16.mxu0 %v6219_v10  ;;  %v6031_v11 = vld [vmem:[%s5154_s10 + $0xd4] sm:$0x1] }
  0xfb   : > { %4695 = vmatprep.subr.bf16.mxu1 %v5075_v60  ;;  %v2781_v51 = vshll.u32 %v6031_v11, 16  ;;  %v2769_v32 = vrot.slane %v2768_v1, 4 }
  0xfd   : > { %4703 = vmatpush3.bf16.msra.mxu1 %v5075_v60  ;;  %v2783_v52 = vrot.slane %v2781_v51, 5 }
  0xfe   : > { %4696 = vmatprep.subr.bf16.mxu1 %v5076_v7 }
  0xff   : > { %v2784_v2 = vsel %vm5199_vm2, %v2779_v47, %v2783_v52 }
 0x100   : > { %4427 = vmatmul.mubr.bf16.gmra.mrb[4].mxu1 %v5363_v15  ;;  %v5078_v15 = vld [vmem:[%s6175_s1 + $0x120] sm:$0xff]  }
 0x101   : > { %4635 = vmatmul.mubr.bf16.gmra.mrb[20].mxu0 %v6220_v20  ;;  %4430 = vmatprep.mubr.bf16.mxu1 %v5830_v12  ;;  %v2774_v12 = vsel %vm5199_vm2, %v2769_v32, %v2773_v24 }
 0x102   : > { %4638 = vmatprep.mubr.bf16.mxu0 %v5672_v55  ;;  %4704 = vmatpush3.bf16.msra.mxu1 %v5076_v7  ;;  %v3848_v34 = vcombine.low %v2774_v12, %v2784_v2 }
 0x103   : > { %4697 = vmatprep.subr.bf16.mxu1 %v5077_v5 }
 0x106   : > { %4705 = vmatpush3.bf16.msra.mxu1 %v5077_v5 }
 0x107   : > { %4698 = vmatprep.subr.bf16.mxu1 %v5078_v15 }
 0x108   : > { %4431 = vmatmul.mubr.bf16.gmra.mrb[8].mxu1 %v5836_v31  ;;  %v5080_v31 = vld [vmem:[%s6175_s1 + $0x130] sm:$0xff]  }
 0x109   : > { %4639 = vmatmul.mubr.bf16.gmra.mrb[24].mxu0 %v5706_v61  ;;  %4434 = vmatprep.mubr.bf16.mxu1 %v5861_v41 }
 0x10a   : > { %4642 = vmatprep.mubr.bf16.mxu0 %v5869_v57  ;;  %4706 = vmatpush3.bf16.msra.mxu1 %v5078_v15 }
 0x10b   : > { %4699 = vmatprep.subr.bf16.mxu1 %v5079_v54 }
 0x10e   : > { %4707 = vmatpush3.bf16.msra.mxu1 %v5079_v54 }
 0x10f   : > { %4700 = vmatprep.subr.bf16.mxu1 %v5080_v31 }
 0x110   : > { %4435 = vmatmul.mubr.bf16.gmra.mrb[12].mxu1 %v5751_v28 }
 0x111   : > { %4643 = vmatmul.mubr.bf16.gmra.mrb[28].mxu0 %v3848_v34  ;;  %4438 = vmatprep.mubr.bf16.mxu1 %v5762_v33 }
 0x112   : > { %4662 = vmatprep.mubr.bf16.mxu0 %v5500_v26  ;;  %4708 = vmatpush3.bf16.msra.mxu1 %v5080_v31  ;;  %v3050_v26 = vrot.slane %v5963_v62, 5 }
 0x113   : > { %4701 = vmatprep.subr.bf16.mxu1 %v5081_v37 }
 0x116   : > { %4709 = vmatpush3.bf16.msra.mxu1 %v5081_v37 }
 0x118   : > { %4439 = vmatmul.mubr.bf16.gmra.mrb[16].mxu1 %v5773_v45 }
 0x119   : > { %4663 = vmatmul.mubr.bf16.vlgmr.msra.gmra.mrb[0].mxu0 %v5540_v46  ;;  %4442 = vmatprep.mubr.bf16.mxu1 %v5777_v40  ;;  %v3857_v46 = vrot.slane %v5960_v0, 9 }
 0x11a   : > { %4666 = vmatprep.mubr.bf16.mxu0 %v5577_v44  ;;  %v3052_v44 = vrot.slane %v3050_v26, 4 }
 0x120   : > { %4443 = vmatmul.mubr.bf16.gmra.mrb[20].mxu1 %v5781_v53 }
 0x121   : > { %4667 = vmatmul.mubr.bf16.gmra.mrb[4].mxu0 %v5610_v19  ;;  %4446 = vmatprep.mubr.bf16.mxu1 %v5785_v9  ;;  %v3053_v19 = vrot.slane %v6031_v11, 5 }
 0x122   : > { %4670 = vmatprep.mubr.bf16.mxu0 %v5642_v35  ;;  %v3051_v35 = vsel %vm5406_vm5, %v3857_v46, %v3050_v26 }
 0x128   : > { %4447 = vmatmul.mubr.bf16.gmra.mrb[24].mxu1 %v5789_v16 }
 0x129   : > { %4671 = vmatmul.mubr.bf16.gmra.mrb[8].mxu0 %v5676_v21  ;;  %4450 = vmatprep.mubr.bf16.mxu1 %v5796_v38  ;;  %v3054_v21 = vsel %vm5406_vm5, %v3052_v44, %v3053_v19 }
 0x12a   : > { %4674 = vmatprep.mubr.bf16.mxu0 %v5708_v58  ;;  %v3874_v58 = vcombine.low %v3051_v35, %v3054_v21 }
 0x130   : > { %4451 = vmatmul.mubr.bf16.gmra.mrb[28].mxu1 %v5950_v48 }
 0x131   : > { %4675 = vmatmul.mubr.bf16.gmra.mrb[12].mxu0 %v5713_v18  ;;  %4486 = vmatprep.mubr.bf16.mxu1 %v6216_v49 }
 0x132   : > { %4678 = vmatprep.mubr.bf16.mxu0 %v5733_v13 }
 0x138   : > { %4487 = vmatmul.mubr.bf16.vlgmr.msra.gmra.mrb[16].mxu1 %v6217_v22 }
 0x139   : > { %4679 = vmatmul.mubr.bf16.gmra.mrb[16].mxu0 %v5738_v29  ;;  %4490 = vmatprep.mubr.bf16.mxu1 %v6218_v8 }
 0x13a   : > { %4682 = vmatprep.mubr.bf16.mxu0 %v5791_v4 }
 0x140   : > { %4491 = vmatmul.mubr.bf16.gmra.mrb[20].mxu1 %v6219_v10 }
 0x141   : > { %4683 = vmatmul.mubr.bf16.gmra.mrb[20].mxu0 %v5798_v3  ;;  %4494 = vmatprep.mubr.bf16.mxu1 %v6220_v20 }
 0x142   : > { %4686 = vmatprep.mubr.bf16.mxu0 %v5832_v50 }
 0x148   : > { %4495 = vmatmul.mubr.bf16.gmra.mrb[24].mxu1 %v5672_v55 }
 0x149   : > { %4687 = vmatmul.mubr.bf16.gmra.mrb[24].mxu0 %v5842_v42  ;;  %4498 = vmatprep.mubr.bf16.mxu1 %v5706_v61  ;;  %v6111_v42 = vld [vmem:[%s6176_s2] ss:$0 sm:$0xff] }
 0x14a   : > { %4690 = vmatprep.mubr.bf16.mxu0 %v5863_v17 }
 0x150   : > { %4499 = vmatmul.mubr.bf16.gmra.mrb[28].mxu1 %v5869_v57 }
 0x151   : > { %4691 = vmatmul.mubr.bf16.gmra.mrb[28].mxu0 %v3874_v58 }
 0x1cb   : > { %v4424_v18 = vpop.f32.mrb[0].mxu1 }
 0x1cc   : > { %v1782_v13 = vpop.f32.mrb[1].mxu1 }
 0x1cd   : > { %v4425_v29 = vpop.f32.mrb[2].mxu1 }
 0x1ce   : > { %v1785_v55 = vpop.f32.mrb[3].mxu1 }
 0x1d3   : > { %v4428_v28 = vpop.f32.mrb[4].mxu1 }
 0x1d4   : > { %v1798_v33 = vpop.f32.mrb[5].mxu1 }
 0x1d5   : > { %v4429_v45 = vpop.f32.mrb[6].mxu1 }
 0x1d6   : > { %v1801_v61 = vpop.f32.mrb[7].mxu1 }
 0x1db   : > { %v4432_v40 = vpop.f32.mrb[8].mxu1 }
 0x1dc   : > { %v1814_v53 = vpop.f32.mrb[9].mxu1 }
 0x1dd   : > { %v4433_v9 = vpop.f32.mrb[10].mxu1 }
 0x1de   : > { %v1817_v16 = vpop.f32.mrb[11].mxu1 }
 0x1e3   : > { %v6100_v4 = vpop.f32.mrb[12].mxu1 }
 0x1e4   : > { %v6102_v23 = vpop.f32.mrb[13].mxu1 }
 0x1e5   : > { %v6104_v38 = vpop.f32.mrb[14].mxu1 }
 0x1e6   : > { %v6106_v3 = vpop.f32.mrb[15].mxu1 }
 0x1ec   : > { %v4664_v50 = vpop.f32.mrb[0].mxu0 }
 0x1ed   : > { %v4710_v41 = vadd.f32 %v4664_v50, %v4424_v18  ;;  %v3158_v17 = vpop.f32.mrb[1].mxu0 }
 0x1ee   : > { %v4711_v57 = vadd.f32 %v3158_v17, %v1782_v13  ;;  %v4665_v48 = vpop.f32.mrb[2].mxu0 }
 0x1ef   : > { %v3326_v0 = vadd.f32 %v4710_v41, %v6111_v42  ;;  %v4712_v62 = vadd.f32 %v4665_v48, %v4425_v29  ;;  %v3161_v59 = vpop.f32.mrb[3].mxu0 }
 0x1f0   : > { %v3324_v63 = vadd.f32 %v4711_v57, %v6111_v42  ;;  %v4713_v25 = vadd.f32 %v3161_v59, %v1785_v55 }
 0x1f1   : > { %v3327_v49 = vadd.f32 %v4712_v62, %v6111_v42  ;;  %v3358_v8 = vmax.f32 %v3326_v0, 0.0 }
 0x1f2   : > { %v3325_v22 = vadd.f32 %v4713_v25, %v6111_v42  ;;  %v3356_v36 = vmax.f32 %v3324_v63, 0.0 }
 0x1f3   : > { %v3359_v56 = vmax.f32 %v3327_v49, 0.0 }
 0x1f4   : > { %v3357_v6 = vmax.f32 %v3325_v22, 0.0  ;;  %v4668_v43 = vpop.f32.mrb[4].mxu0 }
 0x1f5   : > { %v3959_v10 = vpack.c.bf16 %v3359_v56, %v3358_v8  ;;  %v4714_v60 = vadd.f32 %v4668_v43, %v4428_v28  ;;  %v3174_v39 = vpop.f32.mrb[5].mxu0 }
 0x1f6   : > { %v3954_v27 = vpack.c.bf16 %v3357_v6, %v3356_v36  ;;  %v4715_v24 = vadd.f32 %v3174_v39, %v1798_v33  ;;  %v4669_v14 = vpop.f32.mrb[6].mxu0 }
 0x1f7   : > { %4031 = vst [vmem:[%s6121_s11 + $0x8] sm:$0xff] %v3959_v10   ;;  %v3330_v7 = vadd.f32 %v4714_v60, %v6111_v42  ;;  %v4716_v11 = vadd.f32 %v4669_v14, %v4429_v45  ;;  %v3177_v20 = vpop.f32.mrb[7].mxu0 }
 0x1f8   : > { %3955 = vst [vmem:[%s6121_s11] sm:$0xff] %v3954_v27   ;;  %v3328_v1 = vadd.f32 %v4715_v24, %v6111_v42  ;;  %v4717_v30 = vadd.f32 %v3177_v20, %v1801_v61 }
 0x1f9   : > { %v3331_v51 = vadd.f32 %v4716_v11, %v6111_v42  ;;  %v3362_v32 = vmax.f32 %v3330_v7, 0.0 }
 0x1fa   : > { %v3329_v5 = vadd.f32 %v4717_v30, %v6111_v42  ;;  %v3360_v52 = vmax.f32 %v3328_v1, 0.0 }
 0x1fb   : > { %v3363_v47 = vmax.f32 %v3331_v51, 0.0 }
 0x1fc   : > { %v3361_v15 = vmax.f32 %v3329_v5, 0.0  ;;  %v4672_v12 = vpop.f32.mrb[8].mxu0 }
 0x1fd   : > { %v3969_v2 = vpack.c.bf16 %v3363_v47, %v3362_v32  ;;  %v4718_v54 = vadd.f32 %v4672_v12, %v4432_v40  ;;  %v3190_v34 = vpop.f32.mrb[9].mxu0 }
 0x1fe   : > { %v3964_v31 = vpack.c.bf16 %v3361_v15, %v3360_v52  ;;  %v4719_v37 = vadd.f32 %v3190_v34, %v1814_v53  ;;  %v4673_v26 = vpop.f32.mrb[10].mxu0 }
 0x1ff   : > { %4033 = vst [vmem:[%s6121_s11 + $0x18] sm:$0xff] %v3969_v2   ;;  %v3334_v46 = vadd.f32 %v4718_v54, %v6111_v42  ;;  %v4720_v44 = vadd.f32 %v4673_v26, %v4433_v9  ;;  %v3193_v19 = vpop.f32.mrb[11].mxu0 }
 0x200   : > { %4032 = vst [vmem:[%s6121_s11 + $0x10] sm:$0xff] %v3964_v31   ;;  %v3332_v35 = vadd.f32 %v4719_v37, %v6111_v42  ;;  %v4721_v21 = vadd.f32 %v3193_v19, %v1817_v16 }
 0x201   : > { %v3335_v58 = vadd.f32 %v4720_v44, %v6111_v42  ;;  %v3366_v13 = vmax.f32 %v3334_v46, 0.0 }
 0x202   : > { %v3333_v18 = vadd.f32 %v4721_v21, %v6111_v42  ;;  %v3364_v55 = vmax.f32 %v3332_v35, 0.0 }
 0x203   : > { %v3367_v29 = vmax.f32 %v3335_v58, 0.0 }
 0x204   : > { %v3365_v28 = vmax.f32 %v3333_v18, 0.0  ;;  %v4676_v33 = vpop.f32.mrb[12].mxu0 }
 0x205   : > { %v3979_v45 = vpack.c.bf16 %v3367_v29, %v3366_v13  ;;  %v4722_v61 = vadd.f32 %v4676_v33, %v6100_v4  ;;  %v3206_v40 = vpop.f32.mrb[13].mxu0 }
 0x206   : > { %v3974_v53 = vpack.c.bf16 %v3365_v28, %v3364_v55  ;;  %v4723_v9 = vadd.f32 %v3206_v40, %v6102_v23  ;;  %v4677_v50 = vpop.f32.mrb[14].mxu0 }
 0x207   : > { %4035 = vst [vmem:[%s6121_s11 + $0x28] sm:$0xff] %v3979_v45   ;;  %v3338_v16 = vadd.f32 %v4722_v61, %v6111_v42  ;;  %v4724_v41 = vadd.f32 %v4677_v50, %v6104_v38  ;;  %v3209_v17 = vpop.f32.mrb[15].mxu0 }
 0x208   : > { %4034 = vst [vmem:[%s6121_s11 + $0x20] sm:$0xff] %v3974_v53   ;;  %v3336_v57 = vadd.f32 %v4723_v9, %v6111_v42  ;;  %v4725_v48 = vadd.f32 %v3209_v17, %v6106_v3 }
 0x209   : > { %v3339_v0 = vadd.f32 %v4724_v41, %v6111_v42  ;;  %v3370_v62 = vmax.f32 %v3338_v16, 0.0 }
 0x20a   : > { %v3337_v4 = vadd.f32 %v4725_v48, %v6111_v42  ;;  %v3368_v23 = vmax.f32 %v3336_v57, 0.0 }
 0x20b   : > { %v3371_v59 = vmax.f32 %v3339_v0, 0.0  ;;  %v4488_v25 = vpop.f32.mrb[16].mxu1 }
 0x20c   : > { %v3369_v63 = vmax.f32 %v3337_v4, 0.0  ;;  %v4680_v49 = vpop.f32.mrb[16].mxu0  ;;  %v2132_v8 = vpop.f32.mrb[17].mxu1 }
 0x20d   : > { %v3989_v22 = vpack.c.bf16 %v3371_v59, %v3370_v62  ;;  %v4726_v38 = vadd.f32 %v4680_v49, %v4488_v25  ;;  %v3222_v56 = vpop.f32.mrb[17].mxu0  ;;  %v4489_v43 = vpop.f32.mrb[18].mxu1 }
 0x20e   : > { %v3984_v36 = vpack.c.bf16 %v3369_v63, %v3368_v23  ;;  %v4727_v6 = vadd.f32 %v3222_v56, %v2132_v8  ;;  %v4681_v3 = vpop.f32.mrb[18].mxu0  ;;  %v2135_v39 = vpop.f32.mrb[19].mxu1 }
 0x20f   : > { %4037 = vst [vmem:[%s6121_s11 + $0x38] sm:$0xff] %v3989_v22   ;;  %v3342_v10 = vadd.f32 %v4726_v38, %v6111_v42  ;;  %v4728_v60 = vadd.f32 %v4681_v3, %v4489_v43  ;;  %v3225_v27 = vpop.f32.mrb[19].mxu0 }
 0x210   : > { %4036 = vst [vmem:[%s6121_s11 + $0x30] sm:$0xff] %v3984_v36   ;;  %v3340_v24 = vadd.f32 %v4727_v6, %v6111_v42  ;;  %v4729_v14 = vadd.f32 %v3225_v27, %v2135_v39 }
 0x211   : > { %v3343_v7 = vadd.f32 %v4728_v60, %v6111_v42  ;;  %v3374_v20 = vmax.f32 %v3342_v10, 0.0 }
 0x212   : > { %v3341_v11 = vadd.f32 %v4729_v14, %v6111_v42  ;;  %v3372_v30 = vmax.f32 %v3340_v24, 0.0 }
 0x213   : > { %v3375_v1 = vmax.f32 %v3343_v7, 0.0  ;;  %v4492_v5 = vpop.f32.mrb[20].mxu1 }
 0x214   : > { %v3373_v51 = vmax.f32 %v3341_v11, 0.0  ;;  %v4684_v32 = vpop.f32.mrb[20].mxu0  ;;  %v2148_v15 = vpop.f32.mrb[21].mxu1 }
 0x215   : > { %v3999_v47 = vpack.c.bf16 %v3375_v1, %v3374_v20  ;;  %v4730_v52 = vadd.f32 %v4684_v32, %v4492_v5  ;;  %v3238_v12 = vpop.f32.mrb[21].mxu0  ;;  %v4493_v34 = vpop.f32.mrb[22].mxu1 }
 0x216   : > { %v3994_v2 = vpack.c.bf16 %v3373_v51, %v3372_v30  ;;  %v4731_v54 = vadd.f32 %v3238_v12, %v2148_v15  ;;  %v4685_v31 = vpop.f32.mrb[22].mxu0  ;;  %v2151_v46 = vpop.f32.mrb[23].mxu1 }
 0x217   : > { %4039 = vst [vmem:[%s6121_s11 + $0x48] sm:$0xff] %v3999_v47   ;;  %v3346_v37 = vadd.f32 %v4730_v52, %v6111_v42  ;;  %v4732_v26 = vadd.f32 %v4685_v31, %v4493_v34  ;;  %v3241_v44 = vpop.f32.mrb[23].mxu0 }
 0x218   : > { %4038 = vst [vmem:[%s6121_s11 + $0x40] sm:$0xff] %v3994_v2   ;;  %v3344_v19 = vadd.f32 %v4731_v54, %v6111_v42  ;;  %v4733_v35 = vadd.f32 %v3241_v44, %v2151_v46 }
 0x219   : > { %v3347_v21 = vadd.f32 %v4732_v26, %v6111_v42  ;;  %v3378_v18 = vmax.f32 %v3346_v37, 0.0 }
 0x21a   : > { %v3345_v58 = vadd.f32 %v4733_v35, %v6111_v42  ;;  %v3376_v29 = vmax.f32 %v3344_v19, 0.0 }
 0x21b   : > { %v3379_v13 = vmax.f32 %v3347_v21, 0.0  ;;  %v4496_v28 = vpop.f32.mrb[24].mxu1 }
 0x21c   : > { %v3377_v55 = vmax.f32 %v3345_v58, 0.0  ;;  %v4688_v33 = vpop.f32.mrb[24].mxu0  ;;  %v2164_v40 = vpop.f32.mrb[25].mxu1 }
 0x21d   : > { %v4009_v45 = vpack.c.bf16 %v3379_v13, %v3378_v18  ;;  %v4734_v61 = vadd.f32 %v4688_v33, %v4496_v28  ;;  %v3254_v53 = vpop.f32.mrb[25].mxu0  ;;  %v4497_v16 = vpop.f32.mrb[26].mxu1 }
 0x21e   : > { %v4004_v9 = vpack.c.bf16 %v3377_v55, %v3376_v29  ;;  %v4735_v50 = vadd.f32 %v3254_v53, %v2164_v40  ;;  %v4689_v41 = vpop.f32.mrb[26].mxu0  ;;  %v2167_v48 = vpop.f32.mrb[27].mxu1 }
 0x21f   : > { %4041 = vst [vmem:[%s6121_s11 + $0x58] sm:$0xff] %v4009_v45   ;;  %v3350_v17 = vadd.f32 %v4734_v61, %v6111_v42  ;;  %v4736_v57 = vadd.f32 %v4689_v41, %v4497_v16  ;;  %v3257_v0 = vpop.f32.mrb[27].mxu0 }
 0x220   : > { %4040 = vst [vmem:[%s6121_s11 + $0x50] sm:$0xff] %v4004_v9   ;;  %v3348_v4 = vadd.f32 %v4735_v50, %v6111_v42  ;;  %v4737_v62 = vadd.f32 %v3257_v0, %v2167_v48 }
 0x221   : > { %v3351_v59 = vadd.f32 %v4736_v57, %v6111_v42  ;;  %v3382_v63 = vmax.f32 %v3350_v17, 0.0 }
 0x222   : > { %v3349_v23 = vadd.f32 %v4737_v62, %v6111_v42  ;;  %v3380_v49 = vmax.f32 %v3348_v4, 0.0 }
 0x223   : > { %v3383_v25 = vmax.f32 %v3351_v59, 0.0  ;;  %v4500_v38 = vpop.f32.mrb[28].mxu1 }
 0x224   : > { %v3381_v22 = vmax.f32 %v3349_v23, 0.0  ;;  %v4692_v8 = vpop.f32.mrb[28].mxu0  ;;  %v2180_v6 = vpop.f32.mrb[29].mxu1 }
 0x225   : > { %v4019_v56 = vpack.c.bf16 %v3383_v25, %v3382_v63  ;;  %v4738_v36 = vadd.f32 %v4692_v8, %v4500_v38  ;;  %v3270_v43 = vpop.f32.mrb[29].mxu0  ;;  %v4501_v60 = vpop.f32.mrb[30].mxu1 }
 0x226   : > { %v4014_v3 = vpack.c.bf16 %v3381_v22, %v3380_v49  ;;  %v4739_v10 = vadd.f32 %v3270_v43, %v2180_v6  ;;  %v4693_v39 = vpop.f32.mrb[30].mxu0  ;;  %v2183_v14 = vpop.f32.mrb[31].mxu1 }
 0x227   : > { %4043 = vst [vmem:[%s6121_s11 + $0x68] sm:$0xff] %v4019_v56   ;;  %v3354_v27 = vadd.f32 %v4738_v36, %v6111_v42  ;;  %v4740_v24 = vadd.f32 %v4693_v39, %v4501_v60  ;;  %v3273_v7 = vpop.f32.mrb[31].mxu0 }
 0x228   : > { %4042 = vst [vmem:[%s6121_s11 + $0x60] sm:$0xff] %v4014_v3   ;;  %v3352_v11 = vadd.f32 %v4739_v10, %v6111_v42  ;;  %v4741_v20 = vadd.f32 %v3273_v7, %v2183_v14 }
 0x229   : > { %v3355_v1 = vadd.f32 %v4740_v24, %v6111_v42  ;;  %v3386_v51 = vmax.f32 %v3354_v27, 0.0 }
 0x22a   : > { %v3353_v30 = vadd.f32 %v4741_v20, %v6111_v42  ;;  %v3384_v32 = vmax.f32 %v3352_v11, 0.0 }
 0x22b   : > { %v3387_v5 = vmax.f32 %v3355_v1, 0.0 }
 0x22c   : > { %v3385_v47 = vmax.f32 %v3353_v30, 0.0 }
 0x22d   : > { %v4029_v52 = vpack.c.bf16 %v3387_v5, %v3386_v51 }
 0x22e   : > { %v4024_v15 = vpack.c.bf16 %v3385_v47, %v3384_v32 }
 0x22f   : > { %4045 = vst [vmem:[%s6121_s11 + $0x78] sm:$0xff] %v4029_v52  }
 0x230   : > { %4044 = vst [vmem:[%s6121_s11 + $0x70] sm:$0xff] %v4024_v15  }
 0x231 PF: > { %s13_s12 = sadd.s32 1, %s5088_s12  }
 0x232   : > { %p10_p4 = scmp.ge.s32.totalorder %s13_s12, 4  }
 0x234   :  { %12 = sbr.rel (!%p10_p4) target bundleno = 1 (0x1), region = 70 }

// kernel: resnet_forward.6
= control target key start
LH: loop header
LB: loop body
LE: loop exit
PB: predicated region body
PF: predicated region fallthrough
CT: control target
= control target key end

     0   :  { %s5352_s15 = smov 0   ;;  %s6453_s0 = inlined_call_operand.vmem [shape: bf16[2,18,18,128], index: 0, kind: input, shape index: {}]   ;;  %s6454_s1 = inlined_call_operand.vmem [shape: bf16[9,128,128], index: 1, kind: input, shape index: {}]   ;;  %s6455_s2 = inlined_call_operand.vmem [shape: f32[1,128], index: 2, kind: input, shape index: {}]   ;;  %s6456_s3 = inlined_call_operand.vmem [shape: bf16[2,16,16,128], index: 3, kind: input, shape index: {}]   ;;  %s6457_s4 = inlined_call_operand.vmem [shape: bf16[2,16,16,128], index: 4, kind: output, shape index: {}]  }
   0x1 LB: > { %s3758_s16 = sadd.s32 4294967295, %s5325_s15   ;;  %p3762_p0 = scmp.ge.s32.totalorder %s5325_s15, 1  ;;  %s5325_s15 = sphi %s5352_s15, %s14_s15  }
   0x2   : > { %p172_p1 = scmp.lt.s32.totalorder %s5325_s15, 3 }
   0x4   : > { %p173_p2 = pnand %p3762_p0, %p172_p1 }
   0x6   : > { %176 = sbr.rel (%p173_p2) target bundleno = 563 (0x233), region = 36 }
   0xd   : > { %v5212_v0 = vld [vmem:[%s6454_s1 + $0x40] sm:$0xff]   ;;  %p203_p3 = scmp.lt.s32.totalorder %s3758_s16, 1  ;;  %v5214_v2 = vld [vmem:[%s6454_s1 + $0x48] sm:$0xff]   ;;  %v5216_v4 = vld [vmem:[%s6454_s1 + $0x50] sm:$0xff]   ;;  %vm289_vm0 = vsmask.f32 3328 }
   0xe   : > { %v5213_v1 = vld [vmem:[%s6454_s1 + $0x100] sm:$0xff]   ;;  %4499 = vmatprep.subr.bf16.mxu1 %v5212_v0  ;;  %v5215_v3 = vld [vmem:[%s6454_s1 + $0x108] sm:$0xff]   ;;  %v5217_v5 = vld [vmem:[%s6454_s1 + $0x110] sm:$0xff]   ;;  %vm290_vm1 = vsmask.f32 7440  ;;  %vm1287_vm3 = vcmask 1042432  }
   0xf   : > { %4691 = vmatprep.subr.bf16.mxu0 %v5213_v1  ;;  %4500 = vmatpush3.bf16.msra.mxu1 %v5212_v0  ;;  %s6502_s16 = smov (!%p203_p3, %s3758_s16), 1  ;;  %v5218_v6 = vld [vmem:[%s6454_s1 + $0x58] sm:$0xff]   ;;  %v5220_v8 = vld [vmem:[%s6454_s1 + $0x60] sm:$0xff]   ;;  %v5222_v10 = vld [vmem:[%s6454_s1 + $0x68] sm:$0xff]   ;;  %vm1288_vm4 = vcmask 1046532  }
  0x10   : > { %4692 = vmatpush3.bf16.msra.mxu0 %v5213_v1  ;;  %4501 = vmatprep.subr.bf16.mxu1 %v5214_v2  ;;  %v5219_v7 = vld [vmem:[%s6454_s1 + $0x118] sm:$0xff]   ;;  %s5203_s7 = smul.u32 216, %s6502_s16  ;;  %v5221_v9 = vld [vmem:[%s6454_s1 + $0x120] sm:$0xff]   ;;  %v5223_v11 = vld [vmem:[%s6454_s1 + $0x128] sm:$0xff]   ;;  %s4075_s18 = sshll.u32 %s6502_s16, 7 }
  0x11   : > { %4693 = vmatprep.subr.bf16.mxu0 %v5215_v3  ;;  %v5224_v17 = vld [vmem:[%s6454_s1 + $0x70] sm:$0xff]   ;;  %v5226_v36 = vld [vmem:[%s6454_s1 + $0x78] sm:$0xff]   ;;  %vm5441_vm2 = vmor %vm289_vm0, %vm290_vm1  ;;  %s6364_s21 = scalar_lea.vmem %s6456_s3, %s4075_s18  ;;  %s6384_s26 = scalar_lea.vmem %s6457_s4, %s4075_s18 }
  0x12   : > { %s5396_s14 = scalar_lea.vmem %s6453_s0, %s5203_s7  ;;  %v5225_v31 = vld [vmem:[%s6454_s1 + $0x130] sm:$0xff]   ;;  %v5227_v53 = vld [vmem:[%s6454_s1 + $0x138] sm:$0xff]   ;;  %v5228_v1 = vld [vmem:[%s6454_s1] sm:$0xff]  }
  0x13   : > { %4502 = vmatpush3.bf16.msra.mxu1 %v5214_v2  ;;  %v5405_v12 = vld [vmem:[%s5396_s14] sm:$0xf]  ;;  %v5408_v13 = vld [vmem:[%s5396_s14 + $0x4] sm:$0xf]  ;;  %v221_v14 = vld [vmem:[%s5396_s14 + $0x8] sm:$0x1] }
  0x14   : > { %4694 = vmatpush3.bf16.msra.mxu0 %v5215_v3  ;;  %4503 = vmatprep.subr.bf16.mxu1 %v5216_v4  ;;  %v293_v15 = vshrl.u32 %v5405_v12, 16  ;;  %v296_v16 = vshll.u32 %v5405_v12, 16  ;;  %v302_v18 = vshll.u32 %v5408_v13, 16  ;;  %v306_v19 = vshrl.u32 %v5408_v13, 16  ;;  %v5419_v21 = vld [vmem:[%s5396_s14 + $0xc] sm:$0xf]  ;;  %vm5648_vm5 = vmor %vm1287_vm3, %vm1288_vm4 }
  0x15   : > { %4695 = vmatprep.subr.bf16.mxu0 %v5217_v5  ;;  %v312_v20 = vshll.u32 %v221_v14, 16  ;;  %v5422_v24 = vld [vmem:[%s5396_s14 + $0x10] sm:$0xf]  ;;  %v5425_v25 = vld [vmem:[%s5396_s14 + $0x14] sm:$0x1]  ;;  %v317_v30 = vshrl.u32 %v5419_v21, 16 }
  0x16   : > { %v295_v22 = vrot.slane %v293_v15, 4  ;;  %v298_v23 = vrot.slane %v296_v16, 5  ;;  %v304_v27 = vrot.slane %v302_v18, 5  ;;  %v308_v28 = vrot.slane %v306_v19, 4  ;;  %v5447_v41 = vld [vmem:[%s5396_s14 + $0x18] sm:$0xf] }
  0x17   : > { %4504 = vmatpush3.bf16.msra.mxu1 %v5216_v4  ;;  %v314_v29 = vrot.slane %v312_v20, 5  ;;  %v320_v33 = vshll.u32 %v5419_v21, 16  ;;  %v326_v34 = vshll.u32 %v5422_v24, 16  ;;  %v330_v35 = vshrl.u32 %v5422_v24, 16  ;;  %v5450_v42 = vld [vmem:[%s5396_s14 + $0x1c] sm:$0xf] }
  0x18   : > { %4696 = vmatpush3.bf16.msra.mxu0 %v5217_v5  ;;  %4505 = vmatprep.subr.bf16.mxu1 %v5218_v6  ;;  %v299_v32 = vor.u32 %v298_v23, %v295_v22  ;;  %v309_v38 = vor.u32 %v308_v28, %v304_v27  ;;  %v319_v39 = vrot.slane %v317_v30, 4  ;;  %v336_v40 = vshll.u32 %v5425_v25, 16  ;;  %v5457_v48 = vld [vmem:[%s5396_s14 + $0x20] sm:$0x1]  ;;  %v5474_v3 = vld [vmem:[%s5396_s14 + $0x24] sm:$0xf] }
  0x19   : > { %4697 = vmatprep.subr.bf16.mxu0 %v5219_v7  ;;  %v5454_v43 = vcombine.low %v5419_v21, %v5422_v24  ;;  %v322_v45 = vrot.slane %v320_v33, 5  ;;  %v328_v46 = vrot.slane %v326_v34, 5  ;;  %v332_v47 = vrot.slane %v330_v35, 4  ;;  %v5489_v14 = vld [vmem:[%s5396_s14 + $0x2c] sm:$0x1]  ;;  %v5318_v37 = vld [vmem:[%s6454_s1 + $0x138] sm:$0xff]  }
  0x1a   : > { %v300_v44 = vrot.slane %v299_v32, 4  ;;  %v310_v49 = vrot.slane %v309_v38, 4  ;;  %v338_v50 = vrot.slane %v336_v40, 5  ;;  %v341_v51 = vshrl.u32 %v5447_v41, 16  ;;  %v5494_v22 = vld [vmem:[%s5396_s14 + $0x30] sm:$0xf] }
  0x1b   : > { %4506 = vmatpush3.bf16.msra.mxu1 %v5218_v6  ;;  %v344_v52 = vshll.u32 %v5447_v41, 16  ;;  %v323_v55 = vor.u32 %v322_v45, %v319_v39  ;;  %v333_v56 = vor.u32 %v332_v47, %v328_v46  ;;  %v350_v57 = vshll.u32 %v5450_v42, 16  ;;  %v5499_v30 = vld [vmem:[%s5396_s14 + $0x34] sm:$0xf]  ;;  %v5231_v34 = vld [vmem:[%s6454_s1 + $0x8] sm:$0xff]  }
  0x1c   : > { %4698 = vmatpush3.bf16.msra.mxu0 %v5219_v7  ;;  %4507 = vmatprep.subr.bf16.mxu1 %v5220_v8  ;;  %v305_v54 = vsel %vm5441_vm2, %v300_v44, %v304_v27  ;;  %v315_v58 = vsel %vm5441_vm2, %v310_v49, %v314_v29  ;;  %v343_v59 = vrot.slane %v341_v51, 4  ;;  %v354_v61 = vshrl.u32 %v5450_v42, 16  ;;  %v5508_v35 = vld [vmem:[%s5396_s14 + $0x38] sm:$0x1] }
  0x1d   : > { %4699 = vmatprep.subr.bf16.mxu0 %v5221_v9  ;;  %v346_v60 = vrot.slane %v344_v52, 5  ;;  %v3784_v62 = vcombine.low %v305_v54, %v315_v58  ;;  %v324_v63 = vrot.slane %v323_v55, 4  ;;  %v334_v0 = vrot.slane %v333_v56, 4  ;;  %v5523_v58 = vld [vmem:[%s5396_s14 + $0x3c] sm:$0xf] }
  0x1e   : > { %v352_v2 = vrot.slane %v350_v57, 5  ;;  %v356_v5 = vrot.slane %v354_v61, 4  ;;  %v360_v6 = vshll.u32 %v5457_v48, 16  ;;  %v1309_v7 = vrot.slane %v5457_v48, 5 }
  0x1f   : > { %4508 = vmatpush3.bf16.msra.mxu1 %v5220_v8  ;;  %v347_v4 = vor.u32 %v346_v60, %v343_v59  ;;  %v5229_v8 = vld [vmem:[%s6454_s1 + $0x140] sm:$0xff]   ;;  %4515 = vmatprep.mubr.bf16.mxu1 %v3784_v62  ;;  %v365_v15 = vshrl.u32 %v5474_v3, 16  ;;  %v368_v16 = vshll.u32 %v5474_v3, 16  ;;  %v384_v33 = vshll.u32 %v5489_v14, 16  ;;  %v5234_v59 = vld [vmem:[%s6454_s1 + $0x10] sm:$0xff]  }
  0x20   : > { %4700 = vmatpush3.bf16.msra.mxu0 %v5221_v9  ;;  %4509 = vmatprep.subr.bf16.mxu1 %v5222_v10  ;;  %v5482_v9 = vld [vmem:[%s5396_s14 + $0x28] sm:$0xf]  ;;  %v357_v19 = vor.u32 %v356_v5, %v352_v2  ;;  %v362_v20 = vrot.slane %v360_v6, 5  ;;  %v392_v44 = vshll.u32 %v5494_v22, 16  ;;  %v402_v56 = vshrl.u32 %v5499_v30, 16 }
  0x21   : > { %4701 = vmatprep.subr.bf16.mxu0 %v5223_v11  ;;  %v348_v18 = vrot.slane %v347_v4, 4  ;;  %v367_v23 = vrot.slane %v365_v15, 4  ;;  %v370_v27 = vrot.slane %v368_v16, 5  ;;  %v374_v28 = vshll.u32 %v5482_v9, 16  ;;  %v5232_v16 = vld [vmem:[%s6454_s1 + $0x150] sm:$0xff]  }
  0x22   : > { %v378_v29 = vshrl.u32 %v5482_v9, 16  ;;  %v358_v32 = vrot.slane %v357_v19, 4  ;;  %v386_v47 = vrot.slane %v384_v33, 5  ;;  %v394_v54 = vrot.slane %v392_v44, 5  ;;  %v5563_v33 = vld [vmem:[%s5396_s14 + $0x50] sm:$0x1] }
  0x23   : > { %4510 = vmatpush3.bf16.msra.mxu1 %v5222_v10  ;;  %v329_v10 = vsel %vm5441_vm2, %v324_v63, %v328_v46  ;;  %v371_v38 = vor.u32 %v370_v27, %v367_v23  ;;  %v376_v39 = vrot.slane %v374_v28, 5  ;;  %v5230_v46 = vld [vmem:[%s6454_s1 + $0x148] sm:$0xff]   ;;  %v408_v57 = vshll.u32 %v5508_v35, 16 }
  0x24   : > { %4702 = vmatpush3.bf16.msra.mxu0 %v5223_v11  ;;  %4511 = vmatprep.subr.bf16.mxu1 %v5224_v17  ;;  %v339_v11 = vsel %vm5441_vm2, %v334_v0, %v338_v50  ;;  %v380_v40 = vrot.slane %v378_v29, 4  ;;  %v363_v45 = vsel %vm5441_vm2, %v358_v32, %v362_v20  ;;  %v398_v50 = vshll.u32 %v5499_v30, 16  ;;  %v5537_v0 = vld [vmem:[%s5396_s14 + $0x40] sm:$0xf]  ;;  %v5554_v27 = vld [vmem:[%s5396_s14 + $0x48] sm:$0xf] }
  0x25   : > { %4703 = vmatprep.subr.bf16.mxu0 %v5225_v31  ;;  %v372_v52 = vrot.slane %v371_v38, 4  ;;  %v5530_v60 = vcombine.low %v5447_v41, %v5450_v42  ;;  %v404_v4 = vrot.slane %v402_v56, 4  ;;  %v410_v5 = vrot.slane %v408_v57, 5  ;;  %v5557_v28 = vld [vmem:[%s5396_s14 + $0x4c] sm:$0xf] }
  0x26   : > { %v400_v55 = vrot.slane %v398_v50, 5  ;;  %v416_v6 = vshll.u32 %v5523_v58, 16  ;;  %v446_v44 = vshll.u32 %v5557_v28, 16  ;;  %v450_v50 = vshrl.u32 %v5557_v28, 16 }
  0x27   : > { %4512 = vmatpush3.bf16.msra.mxu1 %v5224_v17  ;;  %v3785_v17 = vcombine.low %v329_v10, %v339_v11  ;;  %v377_v61 = vsel %vm5441_vm2, %v372_v52, %v376_v39  ;;  %v422_v10 = vshll.u32 %v5537_v0, 16 }
  0x28   : > { %4704 = vmatpush3.bf16.msra.mxu0 %v5225_v31  ;;  %4513 = vmatprep.subr.bf16.mxu1 %v5226_v36  ;;  %v353_v31 = vsel %vm5441_vm2, %v348_v18, %v352_v2  ;;  %v413_v2 = vshrl.u32 %v5523_v58, 16  ;;  %v405_v19 = vor.u32 %v404_v4, %v400_v55  ;;  %v418_v20 = vrot.slane %v416_v6, 5  ;;  %v5594_v6 = vld [vmem:[%s5396_s14 + $0x58] sm:$0xf] }
  0x29   : > { %4705 = vmatprep.subr.bf16.mxu0 %v5227_v53  ;;  %4707 = vmatprep.mubr.bf16.mxu0 %v3785_v17  ;;  %v5518_v51 = vcombine.low %v353_v31, %v363_v45  ;;  %v424_v23 = vrot.slane %v422_v10, 5  ;;  %v5233_v45 = vld [vmem:[%s6454_s1 + $0x158] sm:$0xff]  }
  0x2a   : > { %v406_v38 = vrot.slane %v405_v19, 4  ;;  %v5597_v10 = vld [vmem:[%s5396_s14 + $0x5c] sm:$0x1] }
  0x2b   : > { %4514 = vmatpush3.bf16.msra.mxu1 %v5226_v36  ;;  %v389_v36 = vshrl.u32 %v5494_v22, 16 }
  0x2c   : > { %4706 = vmatpush3.bf16.msra.mxu0 %v5227_v53  ;;  %4547 = vmatprep.subr.bf16.mxu1 %v5228_v1  ;;  %v381_v53 = vor.u32 %v380_v40, %v376_v39  ;;  %v440_v40 = vshll.u32 %v5554_v27, 16  ;;  %v411_v52 = vsel %vm5441_vm2, %v406_v38, %v410_v5  ;;  %v5591_v5 = vld [vmem:[%s5396_s14 + $0x54] sm:$0xf] }
  0x2d   : > { %4739 = vmatprep.subr.bf16.mxu0 %v5229_v8  ;;  %v391_v49 = vrot.slane %v389_v36, 4  ;;  %v5237_v36 = vld [vmem:[%s6454_s1 + $0x18] sm:$0xff]   ;;  %v461_v19 = vshrl.u32 %v5591_v5, 16 }
  0x2e   : > { %4516 = vmatmul.mubr.bf16.vlgmr.msra.gmra.mrb[0].mxu1 %v3785_v17  ;;  %v382_v62 = vrot.slane %v381_v53, 4  ;;  %v426_v17 = vshrl.u32 %v5537_v0, 16 }
  0x2f   : > { %4548 = vmatpush3.bf16.msra.mxu1 %v5228_v1  ;;  %4708 = vmatmul.mubr.bf16.vlgmr.msra.gmra.mrb[0].mxu0 %v5518_v51  ;;  %v395_v63 = vor.u32 %v394_v54, %v391_v49  ;;  %v5540_v1 = vld [vmem:[%s5396_s14 + $0x44] sm:$0x1]  ;;  %v442_v54 = vrot.slane %v440_v40, 5  ;;  %v474_v40 = vshrl.u32 %v5594_v6, 16 }
  0x30   : > { %4549 = vmatprep.subr.bf16.mxu1 %v5231_v34  ;;  %4519 = vmatprep.mubr.bf16.mxu1 %v5518_v51  ;;  %v387_v11 = vsel %vm5441_vm2, %v382_v62, %v386_v47  ;;  %v428_v31 = vrot.slane %v426_v17, 4  ;;  %v432_v32 = vshll.u32 %v5540_v1, 16  ;;  %v456_v62 = vshll.u32 %v5563_v33, 16 }
  0x31   : > { %4740 = vmatpush3.bf16.msra.mxu0 %v5229_v8  ;;  %v396_v15 = vrot.slane %v395_v63, 4  ;;  %v415_v8 = vrot.slane %v413_v2, 4  ;;  %v5551_v18 = vcombine.low %v377_v61, %v387_v11  ;;  %v452_v61 = vrot.slane %v450_v50, 4  ;;  %v5235_v63 = vld [vmem:[%s6454_s1 + $0x160] sm:$0xff]   ;;  %v5631_v50 = vld [vmem:[%s5396_s14 + $0x68] sm:$0x1] }
  0x32   : > { %4741 = vmatprep.subr.bf16.mxu0 %v5230_v46  ;;  %v429_v47 = vor.u32 %v428_v31, %v424_v23  ;;  %v434_v49 = vrot.slane %v432_v32, 5  ;;  %v5240_v2 = vld [vmem:[%s6454_s1 + $0x20] sm:$0xff]   ;;  %v5601_v11 = vcombine.low %v5474_v3, %v5482_v9  ;;  %v458_v17 = vrot.slane %v456_v62, 5 }
  0x33   : > { %4550 = vmatpush3.bf16.msra.mxu1 %v5231_v34  ;;  %6476 = vst [vmem:[#allocation2_spill] sm:$0xff] %v5551_v18  ;;  %v401_v29 = vsel %vm5441_vm2, %v396_v15, %v400_v55  ;;  %v437_v34 = vshrl.u32 %v5554_v27, 16  ;;  %4711 = vmatprep.mubr.bf16.mxu0 %v5551_v18  ;;  %v419_v39 = vor.u32 %v418_v20, %v415_v8  ;;  %v448_v55 = vrot.slane %v446_v44, 5  ;;  %v5617_v32 = vld [vmem:[%s5396_s14 + $0x60] sm:$0xf] }
  0x34   : > { %4551 = vmatprep.subr.bf16.mxu1 %v5234_v59  ;;  %v5579_v56 = vcombine.low %v401_v29, %v411_v52  ;;  %v430_v57 = vrot.slane %v429_v47, 4  ;;  %v5605_v15 = vcombine.low %v5494_v22, %v5499_v30  ;;  %v464_v29 = vshll.u32 %v5591_v5, 16  ;;  %v5625_v47 = vld [vmem:[%s5396_s14 + $0x64] sm:$0xf] }
  0x35   : > { %4742 = vmatpush3.bf16.msra.mxu0 %v5230_v46  ;;  %v439_v46 = vrot.slane %v437_v34, 4  ;;  %v420_v53 = vrot.slane %v419_v39, 4  ;;  %v453_v8 = vor.u32 %v452_v61, %v448_v55  ;;  %v470_v31 = vshll.u32 %v5594_v6, 16  ;;  %v5242_v34 = vld [vmem:[%s6454_s1 + $0x28] sm:$0xff]  }
  0x36   : > { %4520 = vmatmul.mubr.bf16.gmra.mrb[4].mxu1 %v5551_v18  ;;  %4743 = vmatprep.subr.bf16.mxu0 %v5232_v16  ;;  %6477 = vst [vmem:[#allocation3_spill] sm:$0xff] %v5579_v56  ;;  %v463_v39 = vrot.slane %v461_v19, 4  ;;  %v480_v44 = vshll.u32 %v5597_v10, 16  ;;  %v485_v52 = vshrl.u32 %v5617_v32, 16  ;;  %v504_v19 = vshll.u32 %v5631_v50, 16 }
  0x37   : > { %4552 = vmatpush3.bf16.msra.mxu1 %v5234_v59  ;;  %v425_v4 = vsel %vm5441_vm2, %v420_v53, %v424_v23  ;;  %v443_v59 = vor.u32 %v442_v54, %v439_v46  ;;  %4712 = vmatmul.mubr.bf16.gmra.mrb[4].mxu0 %v5579_v56  ;;  %v454_v38 = vrot.slane %v453_v8, 4  ;;  %v472_v46 = vrot.slane %v470_v31, 5 }
  0x38   : > { %4553 = vmatprep.subr.bf16.mxu1 %v5237_v36  ;;  %4523 = vmatprep.mubr.bf16.mxu1 %v5579_v56  ;;  %v476_v54 = vrot.slane %v474_v40, 4  ;;  %v5659_v40 = vld [vmem:[%s5396_s14 + $0x6c] sm:$0xf] }
  0x39   : > { %4744 = vmatpush3.bf16.msra.mxu0 %v5232_v16  ;;  %v435_v16 = vsel %vm5441_vm2, %v430_v57, %v434_v49  ;;  %v444_v23 = vrot.slane %v443_v59, 4  ;;  %v459_v53 = vsel %vm5441_vm2, %v454_v38, %v458_v17  ;;  %v482_v57 = vrot.slane %v480_v44, 5 }
  0x3a   : > { %4745 = vmatprep.subr.bf16.mxu0 %v5233_v45  ;;  %v5612_v20 = vcombine.low %v425_v4, %v435_v16  ;;  %v487_v4 = vrot.slane %v485_v52, 4  ;;  %v494_v59 = vshll.u32 %v5625_v47, 16  ;;  %v477_v16 = vor.u32 %v476_v54, %v472_v46 }
  0x3b   : > { %4554 = vmatpush3.bf16.msra.mxu1 %v5237_v36  ;;  %v449_v49 = vsel %vm5441_vm2, %v444_v23, %v448_v55  ;;  %v466_v36 = vrot.slane %v464_v29, 5  ;;  %v488_v55 = vshll.u32 %v5617_v32, 16  ;;  %v498_v17 = vshrl.u32 %v5625_v47, 16  ;;  %v5244_v29 = vld [vmem:[%s6454_s1 + $0x30] sm:$0xff]  }
  0x3c   : > { %6478 = vst [vmem:[#allocation4_spill] sm:$0xff] %v5612_v20  ;;  %4555 = vmatprep.subr.bf16.mxu1 %v5240_v2  ;;  %4715 = vmatprep.mubr.bf16.mxu0 %v5612_v20  ;;  %v5641_v61 = vcombine.low %v449_v49, %v459_v53  ;;  %v496_v31 = vrot.slane %v494_v59, 5  ;;  %v3833_v38 = vrot.slane %v5419_v21, 9  ;;  %v478_v44 = vrot.slane %v477_v16, 4  ;;  %v5666_v53 = vld [vmem:[%s5396_s14 + $0x70] sm:$0xf] }
  0x3d   : > { %4746 = vmatpush3.bf16.msra.mxu0 %v5233_v45  ;;  %v5236_v45 = vld [vmem:[%s6454_s1 + $0x168] sm:$0xff]   ;;  %v467_v62 = vor.u32 %v466_v36, %v463_v39  ;;  %v490_v8 = vrot.slane %v488_v55, 5  ;;  %v1299_v39 = vrot.slane %v5422_v24, 5  ;;  %v500_v36 = vrot.slane %v498_v17, 4 }
  0x3e   : > { %4524 = vmatmul.mubr.bf16.gmra.mrb[8].mxu1 %v5612_v20  ;;  %4747 = vmatprep.subr.bf16.mxu0 %v5235_v63  ;;  %6479 = vst [vmem:[#allocation5_spill] sm:$0xff] %v5641_v61  ;;  %v506_v52 = vrot.slane %v504_v19, 5  ;;  %v1302_v55 = vrot.slane %v5425_v25, 5  ;;  %v483_v59 = vsel %vm5441_vm2, %v478_v44, %v482_v57  ;;  %v518_v19 = vshll.u32 %v5666_v53, 16 }
  0x3f   : > { %4556 = vmatpush3.bf16.msra.mxu1 %v5240_v2  ;;  %4527 = vmatprep.mubr.bf16.mxu1 %v5641_v61  ;;  %v468_v2 = vrot.slane %v467_v62, 4  ;;  %v491_v49 = vor.u32 %v490_v8, %v487_v4  ;;  %v1300_v24 = vsel %vm5648_vm5, %v3833_v38, %v1299_v39  ;;  %v1301_v54 = vrot.slane %v1299_v39, 4  ;;  %v5674_v62 = vld [vmem:[%s5396_s14 + $0x74] sm:$0x1]  ;;  %v5246_v4 = vld [vmem:[%s6454_s1 + $0x38] sm:$0xff]  }
  0x40   : > { %4557 = vmatprep.subr.bf16.mxu1 %v5242_v34  ;;  %4716 = vmatmul.mubr.bf16.gmra.mrb[8].mxu0 %v5641_v61  ;;  %v501_v8 = vor.u32 %v500_v36, %v496_v31  ;;  %v520_v36 = vrot.slane %v518_v19, 5  ;;  %v1320_v20 = vrot.slane %v5499_v30, 5 }
  0x41   : > { %4748 = vmatpush3.bf16.msra.mxu0 %v5235_v63  ;;  %v5238_v63 = vld [vmem:[%s6454_s1 + $0x170] sm:$0xff]   ;;  %v473_v21 = vsel %vm5441_vm2, %v468_v2, %v472_v46  ;;  %v492_v16 = vrot.slane %v491_v49, 4  ;;  %v509_v46 = vshrl.u32 %v5659_v40, 16  ;;  %v1303_v25 = vsel %vm5648_vm5, %v1301_v54, %v1302_v55  ;;  %v5689_v2 = vld [vmem:[%s5396_s14 + $0x78] sm:$0xf] }
  0x42   : > { %4749 = vmatprep.subr.bf16.mxu0 %v5236_v45  ;;  %v5682_v17 = vcombine.low %v473_v21, %v483_v59  ;;  %v502_v38 = vrot.slane %v501_v8, 4  ;;  %v5696_v39 = vcombine.low %v1300_v24, %v1303_v25  ;;  %v522_v21 = vshrl.u32 %v5666_v53, 16  ;;  %v5703_v54 = vld [vmem:[%s5396_s14 + $0x7c] sm:$0xf] }
  0x43   : > { %4558 = vmatpush3.bf16.msra.mxu1 %v5242_v34  ;;  %v512_v34 = vshll.u32 %v5659_v40, 16  ;;  %v497_v57 = vsel %vm5441_vm2, %v492_v16, %v496_v31  ;;  %v511_v44 = vrot.slane %v509_v46, 4  ;;  %v528_v31 = vshll.u32 %v5674_v62, 16  ;;  %v5710_v16 = vld [vmem:[%s5396_s14 + $0x80] sm:$0x1] }
  0x44   : > { %4559 = vmatprep.subr.bf16.mxu1 %v5244_v29  ;;  %6482 = vst [vmem:[#allocation6_spill] sm:$0xff] %v5682_v17  ;;  %4719 = vmatprep.mubr.bf16.mxu0 %v5682_v17  ;;  %v507_v55 = vsel %vm5441_vm2, %v502_v38, %v506_v52  ;;  %v3834_v59 = vrot.slane %v5447_v41, 9  ;;  %v1306_v24 = vrot.slane %v5450_v42, 5  ;;  %v533_v8 = vshrl.u32 %v5689_v2, 16  ;;  %v5718_v52 = vld [vmem:[%s6454_s1 + $0x80] sm:$0xff]  }
  0x45   : > { %4750 = vmatpush3.bf16.msra.mxu0 %v5236_v45  ;;  %v5239_v45 = vld [vmem:[%s6454_s1 + $0x178] sm:$0xff]   ;;  %v514_v49 = vrot.slane %v512_v34, 5  ;;  %v5713_v46 = vcombine.low %v497_v57, %v507_v55  ;;  %v524_v34 = vrot.slane %v522_v21, 4  ;;  %v530_v19 = vrot.slane %v528_v31, 5  ;;  %v5727_v38 = vld [vmem:[%s5396_s14 + $0x84] sm:$0xf] }
  0x46   : > { %4751 = vmatprep.subr.bf16.mxu0 %v5238_v63  ;;  %4528 = vmatmul.mubr.bf16.gmra.mrb[12].mxu1 %v5682_v17  ;;  %v1307_v41 = vsel %vm5648_vm5, %v3834_v59, %v1306_v24  ;;  %v1308_v42 = vrot.slane %v1306_v24, 4  ;;  %v535_v57 = vrot.slane %v533_v8, 4  ;;  %v542_v21 = vshll.u32 %v5703_v54, 16 }
  0x47   : > { %4560 = vmatpush3.bf16.msra.mxu1 %v5244_v29  ;;  %6483 = vst [vmem:[#allocation7_spill] sm:$0xff] %v5713_v46  ;;  %v515_v25 = vor.u32 %v514_v49, %v511_v44  ;;  %v5241_v29 = vld [vmem:[%s6454_s1 + $0x180] sm:$0xff]   ;;  %4531 = vmatprep.mubr.bf16.mxu1 %v5713_v46  ;;  %v525_v49 = vor.u32 %v524_v34, %v520_v36  ;;  %v546_v31 = vshrl.u32 %v5703_v54, 16  ;;  %v552_v24 = vshll.u32 %v5710_v16, 16 }
  0x48   : > { %4561 = vmatprep.subr.bf16.mxu1 %v5246_v4  ;;  %4720 = vmatmul.mubr.bf16.gmra.mrb[12].mxu0 %v5713_v46  ;;  %v1310_v55 = vsel %vm5648_vm5, %v1308_v42, %v1309_v7  ;;  %v3835_v8 = vrot.slane %v5474_v3, 9  ;;  %v544_v46 = vrot.slane %v542_v21, 5  ;;  %v5747_v3 = vld [vmem:[%s5396_s14 + $0x88] sm:$0xf] }
  0x49   : > { %4752 = vmatpush3.bf16.msra.mxu0 %v5238_v63  ;;  %v536_v63 = vshll.u32 %v5689_v2, 16  ;;  %v516_v44 = vrot.slane %v515_v25, 4  ;;  %4755 = vmatprep.mubr.bf16.mxu0 %v5696_v39  ;;  %v526_v34 = vrot.slane %v525_v49, 4  ;;  %v5742_v26 = vcombine.low %v1307_v41, %v1310_v55 }
  0x4a   : > { %4753 = vmatprep.subr.bf16.mxu0 %v5239_v45  ;;  %v548_v7 = vrot.slane %v546_v31, 4  ;;  %v554_v42 = vrot.slane %v552_v24, 5  ;;  %v557_v41 = vshrl.u32 %v5727_v38, 16  ;;  %v5243_v31 = vld [vmem:[%s6454_s1 + $0x188] sm:$0xff]   ;;  %v5766_v24 = vld [vmem:[%s5396_s14 + $0x90] sm:$0xf] }
  0x4b   : > { %v538_v59 = vrot.slane %v536_v63, 5  ;;  %4562 = vmatpush3.bf16.msra.mxu1 %v5246_v4  ;;  %v521_v25 = vsel %vm5441_vm2, %v516_v44, %v520_v36  ;;  %v1313_v63 = vrot.slane %v5482_v9, 5  ;;  %v531_v4 = vsel %vm5441_vm2, %v526_v34, %v530_v19  ;;  %v5753_v36 = vld [vmem:[%s5396_s14 + $0x8c] sm:$0x1]  ;;  %v5769_v34 = vld [vmem:[%s5396_s14 + $0x94] sm:$0xf] }
  0x4c   : > { %4595 = vmatprep.subr.bf16.mxu1 %v5718_v52  ;;  %v560_v44 = vshll.u32 %v5727_v38, 16  ;;  %v549_v21 = vor.u32 %v548_v7, %v544_v46  ;;  %v559_v55 = vrot.slane %v557_v41, 4  ;;  %v576_v7 = vshll.u32 %v5753_v36, 16 }
  0x4d   : > { %4754 = vmatpush3.bf16.msra.mxu0 %v5239_v45  ;;  %v539_v48 = vor.u32 %v538_v59, %v535_v57  ;;  %v1316_v45 = vrot.slane %v5489_v14, 5  ;;  %v5757_v57 = vcombine.low %v521_v25, %v531_v4  ;;  %v1314_v9 = vsel %vm5648_vm5, %v3835_v8, %v1313_v63 }
  0x4e   : > { %4787 = vmatprep.subr.bf16.mxu0 %v5241_v29  ;;  %v1315_v19 = vrot.slane %v1313_v63, 4  ;;  %v562_v14 = vrot.slane %v560_v44, 5  ;;  %v566_v59 = vshll.u32 %v5747_v3, 16  ;;  %v570_v8 = vshrl.u32 %v5747_v3, 16 }
  0x4f   : > { %6484 = vst [vmem:[#allocation8_spill] sm:$0xff] %v5757_v57  ;;  %v540_v49 = vrot.slane %v539_v48, 4  ;;  %4532 = vmatmul.mubr.bf16.gmra.mrb[16].mxu1 %v5757_v57  ;;  %v550_v48 = vrot.slane %v549_v21, 4  ;;  %v3836_v44 = vrot.slane %v5494_v22, 9  ;;  %v578_v21 = vrot.slane %v576_v7, 5  ;;  %v5245_v22 = vld [vmem:[%s6454_s1 + $0x190] sm:$0xff]  }
  0x50   : > { %4756 = vmatmul.mubr.bf16.vlgmr.msra.gmra.mrb[0].mxu0 %v5742_v26  ;;  %v1317_v63 = vsel %vm5648_vm5, %v1315_v19, %v1316_v45  ;;  %v563_v4 = vor.u32 %v562_v14, %v559_v55  ;;  %v568_v41 = vrot.slane %v566_v59, 5  ;;  %v1323_v45 = vrot.slane %v5508_v35, 5  ;;  %v5805_v59 = vld [vmem:[%s5396_s14 + $0x9c] sm:$0xf] }
  0x51   : > { %v545_v25 = vsel %vm5441_vm2, %v540_v49, %v544_v46  ;;  %4788 = vmatpush3.bf16.msra.mxu0 %v5241_v29  ;;  %v555_v57 = vsel %vm5441_vm2, %v550_v48, %v554_v42  ;;  %v5782_v46 = vcombine.low %v1314_v9, %v1317_v63  ;;  %v572_v49 = vrot.slane %v570_v8, 4  ;;  %v5793_v42 = vld [vmem:[%s5396_s14 + $0x98] sm:$0x1]  ;;  %v5808_v63 = vld [vmem:[%s5396_s14 + $0xa0] sm:$0xf] }
  0x52   : > { %v5784_v17 = vcombine.low %v545_v25, %v555_v57  ;;  %v564_v61 = vrot.slane %v563_v4, 4  ;;  %4789 = vmatprep.subr.bf16.mxu0 %v5243_v31  ;;  %v581_v57 = vshrl.u32 %v5766_v24, 16  ;;  %v584_v9 = vshll.u32 %v5766_v24, 16 }
  0x53   : > { %4759 = vmatprep.mubr.bf16.mxu0 %v5782_v46  ;;  %v573_v29 = vor.u32 %v572_v49, %v568_v41  ;;  %v590_v19 = vshll.u32 %v5769_v34, 16  ;;  %v1321_v35 = vsel %vm5648_vm5, %v3836_v44, %v1320_v20  ;;  %v1322_v55 = vrot.slane %v1320_v20, 4  ;;  %v5815_v20 = vld [vmem:[%s5396_s14 + $0xa4] sm:$0x1] }
  0x54   : > { %6485 = vst [vmem:[#allocation9_spill] sm:$0xff] %v5784_v17  ;;  %4535 = vmatprep.mubr.bf16.mxu1 %v5784_v17  ;;  %v569_v30 = vsel %vm5441_vm2, %v564_v61, %v568_v41  ;;  %v594_v14 = vshrl.u32 %v5769_v34, 16  ;;  %v583_v48 = vrot.slane %v581_v57, 4  ;;  %v586_v8 = vrot.slane %v584_v9, 5 }
  0x55   : > { %v574_v25 = vrot.slane %v573_v29, 4  ;;  %4790 = vmatpush3.bf16.msra.mxu0 %v5243_v31  ;;  %v592_v7 = vrot.slane %v590_v19, 5  ;;  %v1324_v4 = vsel %vm5648_vm5, %v1322_v55, %v1323_v45  ;;  %v600_v61 = vshll.u32 %v5793_v42, 16  ;;  %v5247_v45 = vld [vmem:[%s6454_s1 + $0x198] sm:$0xff]  }
  0x56   : > { %v596_v49 = vrot.slane %v594_v14, 4  ;;  %v3837_v41 = vrot.slane %v5523_v58, 9  ;;  %4791 = vmatprep.subr.bf16.mxu0 %v5245_v22  ;;  %v5819_v44 = vcombine.low %v1321_v35, %v1324_v4  ;;  %v587_v29 = vor.u32 %v586_v8, %v583_v48 }
  0x57   : > { %v579_v31 = vsel %vm5441_vm2, %v574_v25, %v578_v21  ;;  %v1327_v57 = vrot.slane %v5537_v0, 5  ;;  %v602_v58 = vrot.slane %v600_v61, 5  ;;  %v1330_v55 = vrot.slane %v5540_v1, 5  ;;  %v5833_v25 = vld [vmem:[%s5396_s14 + $0xa8] sm:$0xf] }
  0x58   : > { %v5825_v9 = vcombine.low %v569_v30, %v579_v31  ;;  %v597_v19 = vor.u32 %v596_v49, %v592_v7  ;;  %4760 = vmatmul.mubr.bf16.gmra.mrb[4].mxu0 %v5819_v44  ;;  %v588_v14 = vrot.slane %v587_v29, 4  ;;  %v605_v0 = vshrl.u32 %v5805_v59, 16  ;;  %v5251_v30 = vld [vmem:[%s6454_s1 + $0x1a0] sm:$0xff]   ;;  %v5843_v49 = vld [vmem:[%s5396_s14 + $0xac] sm:$0xf] }
  0x59   : > { %v1328_v21 = vsel %vm5648_vm5, %v3837_v41, %v1327_v57  ;;  %v1329_v35 = vrot.slane %v1327_v57, 4  ;;  %v608_v1 = vshll.u32 %v5805_v59, 16  ;;  %v614_v8 = vshll.u32 %v5808_v63, 16  ;;  %4792 = vmatpush3.bf16.msra.mxu0 %v5245_v22 }
  0x5a   : > { %6486 = vst [vmem:[#allocation10_spill] sm:$0xff] %v5825_v9  ;;  %4536 = vmatmul.mubr.bf16.gmra.mrb[20].mxu1 %v5825_v9  ;;  %v598_v48 = vrot.slane %v597_v19, 4  ;;  %v618_v4 = vshrl.u32 %v5808_v63, 16  ;;  %v593_v61 = vsel %vm5441_vm2, %v588_v14, %v592_v7  ;;  %v607_v31 = vrot.slane %v605_v0, 4  ;;  %4793 = vmatprep.subr.bf16.mxu0 %v5247_v45  ;;  %v5858_v14 = vld [vmem:[%s5396_s14 + $0xb0] sm:$0x1] }
  0x5b   : > { %v1331_v41 = vsel %vm5648_vm5, %v1329_v35, %v1330_v55  ;;  %v624_v29 = vshll.u32 %v5815_v20, 16  ;;  %v610_v9 = vrot.slane %v608_v1, 5  ;;  %v616_v17 = vrot.slane %v614_v8, 5 }
  0x5c   : > { %v603_v57 = vsel %vm5441_vm2, %v598_v48, %v602_v58  ;;  %v5852_v19 = vcombine.low %v1328_v21, %v1331_v41  ;;  %v620_v56 = vrot.slane %v618_v4, 4  ;;  %v3838_v7 = vrot.slane %v5554_v27, 9 }
  0x5d   : > { %v5854_v22 = vcombine.low %v593_v61, %v603_v57  ;;  %v626_v18 = vrot.slane %v624_v29, 5  ;;  %v611_v55 = vor.u32 %v610_v9, %v607_v31  ;;  %v1334_v35 = vrot.slane %v5557_v28, 5  ;;  %4794 = vmatpush3.bf16.msra.mxu0 %v5247_v45  ;;  %v5255_v28 = vld [vmem:[%s6454_s1 + $0x1a8] sm:$0xff]  }
  0x5e   : > { %4763 = vmatprep.mubr.bf16.mxu0 %v5852_v19  ;;  %v1337_v0 = vrot.slane %v5563_v33, 5  ;;  %v629_v58 = vshrl.u32 %v5833_v25, 16  ;;  %v621_v21 = vor.u32 %v620_v56, %v616_v17  ;;  %v632_v48 = vshll.u32 %v5833_v25, 16  ;;  %4795 = vmatprep.subr.bf16.mxu0 %v5251_v30 }
  0x5f   : > { %6487 = vst [vmem:[#allocation11_spill] sm:$0xff] %v5854_v22  ;;  %4539 = vmatprep.mubr.bf16.mxu1 %v5854_v22  ;;  %v638_v1 = vshll.u32 %v5843_v49, 16  ;;  %v642_v27 = vshrl.u32 %v5843_v49, 16  ;;  %v612_v9 = vrot.slane %v611_v55, 4  ;;  %v1335_v33 = vsel %vm5648_vm5, %v3838_v7, %v1334_v35  ;;  %v5880_v22 = vld [vmem:[%s5396_s14 + $0xb4] sm:$0xf] }
  0x60   : > { %v1336_v45 = vrot.slane %v1334_v35, 4  ;;  %v631_v8 = vrot.slane %v629_v58, 4  ;;  %v622_v56 = vrot.slane %v621_v21, 4  ;;  %v634_v4 = vrot.slane %v632_v48, 5  ;;  %v5887_v48 = vld [vmem:[%s5396_s14 + $0xb8] sm:$0xf] }
  0x61   : > { %v640_v61 = vrot.slane %v638_v1, 5  ;;  %v644_v41 = vrot.slane %v642_v27, 4  ;;  %v617_v31 = vsel %vm5441_vm2, %v612_v9, %v616_v17  ;;  %v648_v57 = vshll.u32 %v5858_v14, 16  ;;  %4796 = vmatpush3.bf16.msra.mxu0 %v5251_v30  ;;  %v5259_v17 = vld [vmem:[%s6454_s1 + $0x1b0] sm:$0xff]   ;;  %v5897_v27 = vld [vmem:[%s5396_s14 + $0xbc] sm:$0x1] }
  0x62   : > { %v1338_v29 = vsel %vm5648_vm5, %v1336_v45, %v1337_v0  ;;  %v3839_v55 = vrot.slane %v5591_v5, 9  ;;  %v627_v7 = vsel %vm5441_vm2, %v622_v56, %v626_v18  ;;  %v635_v58 = vor.u32 %v634_v4, %v631_v8  ;;  %4797 = vmatprep.subr.bf16.mxu0 %v5255_v28  ;;  %v5263_v4 = vld [vmem:[%s6454_s1 + $0x1b8] sm:$0xff]  }
  0x63   : > { %v5884_v35 = vcombine.low %v1335_v33, %v1338_v29  ;;  %v645_v21 = vor.u32 %v644_v41, %v640_v61  ;;  %v5892_v0 = vcombine.low %v617_v31, %v627_v7  ;;  %v650_v5 = vrot.slane %v648_v57, 5 }
  0x64   : > { %v1341_v1 = vrot.slane %v5594_v6, 5  ;;  %v1344_v30 = vrot.slane %v5597_v10, 5  ;;  %v636_v18 = vrot.slane %v635_v58, 4  ;;  %v653_v33 = vshrl.u32 %v5880_v22, 16 }
  0x65   : > { %6488 = vst [vmem:[#allocation12_spill] sm:$0xff] %v5892_v0  ;;  %4764 = vmatmul.mubr.bf16.gmra.mrb[8].mxu0 %v5884_v35  ;;  %v646_v9 = vrot.slane %v645_v21, 4  ;;  %v656_v45 = vshll.u32 %v5880_v22, 16  ;;  %4540 = vmatmul.mubr.bf16.gmra.mrb[24].mxu1 %v5892_v0  ;;  %v662_v6 = vshll.u32 %v5887_v48, 16  ;;  %v666_v10 = vshrl.u32 %v5887_v48, 16 }
  0x66   : > { %v1342_v8 = vsel %vm5648_vm5, %v3839_v55, %v1341_v1  ;;  %v1343_v56 = vrot.slane %v1341_v1, 4  ;;  %4798 = vmatpush3.bf16.msra.mxu0 %v5255_v28  ;;  %v641_v41 = vsel %vm5441_vm2, %v636_v18, %v640_v61  ;;  %v655_v29 = vrot.slane %v653_v33, 4 }
  0x67   : > { %v651_v31 = vsel %vm5441_vm2, %v646_v9, %v650_v5  ;;  %v658_v57 = vrot.slane %v656_v45, 5  ;;  %4799 = vmatprep.subr.bf16.mxu0 %v5259_v17  ;;  %v664_v58 = vrot.slane %v662_v6, 5  ;;  %v668_v28 = vrot.slane %v666_v10, 4 }
  0x68   : > { %v5914_v55 = vcombine.low %v641_v41, %v651_v31  ;;  %v1345_v7 = vsel %vm5648_vm5, %v1343_v56, %v1344_v30  ;;  %v672_v0 = vshll.u32 %v5897_v27, 16  ;;  %v3840_v61 = vrot.slane %v5617_v32, 9  ;;  %v5929_v30 = vld [vmem:[%s6454_s1 + $0x1c0] sm:$0xff]  }
  0x69   : > { %v5918_v21 = vcombine.low %v1342_v8, %v1345_v7  ;;  %v659_v1 = vor.u32 %v658_v57, %v655_v29  ;;  %v669_v5 = vor.u32 %v668_v28, %v664_v58  ;;  %v1348_v18 = vrot.slane %v5625_v47, 5 }
  0x6a   : > { %4543 = vmatprep.mubr.bf16.mxu1 %v5914_v55  ;;  %v1351_v9 = vrot.slane %v5631_v50, 5  ;;  %v3841_v33 = vrot.slane %v5659_v40, 9  ;;  %4800 = vmatpush3.bf16.msra.mxu0 %v5259_v17  ;;  %v674_v8 = vrot.slane %v672_v0, 5  ;;  %v1355_v56 = vrot.slane %v5666_v53, 5 }
  0x6b   : > { %4767 = vmatprep.mubr.bf16.mxu0 %v5918_v21  ;;  %v660_v45 = vrot.slane %v659_v1, 4  ;;  %v1358_v6 = vrot.slane %v5674_v62, 5  ;;  %4801 = vmatprep.subr.bf16.mxu0 %v5263_v4  ;;  %v670_v10 = vrot.slane %v669_v5, 4  ;;  %v1349_v50 = vsel %vm5648_vm5, %v3840_v61, %v1348_v18 }
  0x6c   : > { %v1350_v41 = vrot.slane %v1348_v18, 4  ;;  %v3842_v17 = vrot.slane %v5689_v2, 9  ;;  %v1356_v29 = vsel %vm5648_vm5, %v3841_v33, %v1355_v56  ;;  %v1357_v57 = vrot.slane %v1355_v56, 4 }
  0x6d   : > { %v665_v31 = vsel %vm5441_vm2, %v660_v45, %v664_v58  ;;  %v1362_v0 = vrot.slane %v5703_v54, 5  ;;  %v675_v62 = vsel %vm5441_vm2, %v670_v10, %v674_v8  ;;  %v1365_v28 = vrot.slane %v5710_v16, 5 }
  0x6e   : > { %v1352_v7 = vsel %vm5648_vm5, %v1350_v41, %v1351_v9  ;;  %v3843_v1 = vrot.slane %v5727_v38, 9  ;;  %4802 = vmatpush3.bf16.msra.mxu0 %v5263_v4  ;;  %v5948_v61 = vcombine.low %v665_v31, %v675_v62  ;;  %v1359_v5 = vsel %vm5648_vm5, %v1357_v57, %v1358_v6  ;;  %v5254_v57 = vld [vmem:[%s6454_s1 + $0x88] sm:$0xff]  }
  0x6f   : > { %v5950_v58 = vcombine.low %v1349_v50, %v1352_v7  ;;  %4835 = vmatprep.subr.bf16.mxu0 %v5929_v30  ;;  %v5955_v18 = vcombine.low %v1356_v29, %v1359_v5  ;;  %v1364_v33 = vrot.slane %v1362_v0, 4  ;;  %v1369_v45 = vrot.slane %v5747_v3, 5 }
  0x70   : > { %v1372_v9 = vrot.slane %v5753_v36, 5  ;;  %4544 = vmatmul.mubr.bf16.gmra.mrb[28].mxu1 %v5948_v61  ;;  %v6489_v16 = vcombine.low %v5405_v12, %v5408_v13  ;;  %v1363_v4 = vsel %vm5648_vm5, %v3842_v17, %v1362_v0  ;;  %v1376_v6 = vrot.slane %v5769_v34, 5 }
  0x71   : > { %4768 = vmatmul.mubr.bf16.gmra.mrb[12].mxu0 %v5950_v58  ;;  %v1366_v8 = vsel %vm5648_vm5, %v1364_v33, %v1365_v28  ;;  %v1371_v56 = vrot.slane %v1369_v45, 4  ;;  %v1383_v36 = vrot.slane %v5808_v63, 5  ;;  %v1370_v10 = vsel %vm5648_vm5, %v3843_v1, %v1369_v45 }
  0x72   : > { %4563 = vmatprep.mubr.bf16.mxu1 %v6489_v16  ;;  %4771 = vmatprep.mubr.bf16.mxu0 %v5955_v18  ;;  %v5975_v13 = vcombine.low %v1363_v4, %v1366_v8  ;;  %v3844_v50 = vrot.slane %v5766_v24, 9  ;;  %v1379_v41 = vrot.slane %v5793_v42, 5  ;;  %v1378_v17 = vrot.slane %v1376_v6, 4 }
  0x73   : > { %v1373_v12 = vsel %vm5648_vm5, %v1371_v56, %v1372_v9  ;;  %v3845_v31 = vrot.slane %v5805_v59, 9  ;;  %v1385_v0 = vrot.slane %v1383_v36, 4  ;;  %v1386_v62 = vrot.slane %v5815_v20, 5 }
  0x74   : > { %v5980_v29 = vcombine.low %v1370_v10, %v1373_v12  ;;  %v1377_v7 = vsel %vm5648_vm5, %v3844_v50, %v1376_v6  ;;  %v1390_v42 = vrot.slane %v5843_v49, 5  ;;  %v5993_v28 = vcombine.low %v5617_v32, %v5625_v47  ;;  %v5258_v47 = vld [vmem:[%s6454_s1 + $0x90] sm:$0xff]   ;;  %v269_v6 = vld [vmem:[%s5396_s14 + $0xc8] sm:$0x1]  ;;  %v5303_v10 = vld [vmem:[%s5396_s14 + $0x40] sm:$0xf] }
  0x75   : > { %v1380_v20 = vsel %vm5648_vm5, %v1378_v17, %v1379_v41  ;;  %v1384_v1 = vsel %vm5648_vm5, %v3845_v31, %v1383_v36  ;;  %v3846_v5 = vrot.slane %v5833_v25, 9  ;;  %v6004_v33 = vcombine.low %v5659_v40, %v5666_v53  ;;  %v5302_v36 = vld [vmem:[%s5396_s14 + $0x3c] sm:$0xf]  ;;  %v5304_v41 = vld [vmem:[%s5396_s14 + $0x48] sm:$0xf] }
  0x76   : > { %v1387_v32 = vsel %vm5648_vm5, %v1385_v0, %v1386_v62  ;;  %v6015_v45 = vcombine.low %v5689_v2, %v5703_v54  ;;  %v6019_v40 = vcombine.low %v5727_v38, %v5747_v3  ;;  %v6023_v53 = vcombine.low %v5766_v24, %v5769_v34  ;;  %v6043_v24 = vld [vmem:[%s5396_s14 + $0xc4] sm:$0xf]  ;;  %v5305_v17 = vld [vmem:[%s5396_s14 + $0x4c] sm:$0xf] }
  0x77   : > { %v6027_v9 = vcombine.low %v5805_v59, %v5808_v63  ;;  %v6031_v16 = vcombine.low %v5833_v25, %v5843_v49  ;;  %v6033_v4 = vcombine.low %v1377_v7, %v1380_v20  ;;  %v1392_v2 = vrot.slane %v1390_v42, 4  ;;  %v5262_v25 = vld [vmem:[%s6454_s1 + $0x98] sm:$0xff]  }
  0x78   : > { %4564 = vmatmul.mubr.bf16.vlgmr.msra.gmra.mrb[0].mxu1 %v5454_v43  ;;  %v1393_v54 = vrot.slane %v5858_v14, 5  ;;  %v6038_v38 = vcombine.low %v5880_v22, %v5887_v48  ;;  %v6040_v3 = vcombine.low %v1384_v1, %v1387_v32  ;;  %v3847_v34 = vrot.slane %v5880_v22, 9  ;;  %v6057_v14 = vld [vmem:[%s5396_s14 + $0xc0] sm:$0xf] }
  0x79   : > { %4772 = vmatmul.mubr.bf16.gmra.mrb[16].mxu0 %v5975_v13  ;;  %4596 = vmatpush3.bf16.msra.mxu1 %v5718_v52  ;;  %v1397_v52 = vrot.slane %v5887_v48, 5  ;;  %v1400_v63 = vrot.slane %v5897_v27, 5  ;;  %v1391_v49 = vsel %vm5648_vm5, %v3846_v5, %v1390_v42  ;;  %v2277_v48 = vrot.slane %v6043_v24, 5  ;;  %v5266_v27 = vld [vmem:[%s6454_s1 + $0xa0] sm:$0xff]  }
  0x7a   : > { %4567 = vmatprep.mubr.bf16.mxu1 %v5530_v60  ;;  %4775 = vmatprep.mubr.bf16.mxu0 %v5980_v29  ;;  %v1394_v22 = vsel %vm5648_vm5, %v1392_v2, %v1393_v54  ;;  %v6072_v12 = vcombine.low %v5302_v36, %v5303_v10  ;;  %v6078_v31 = vcombine.low %v5304_v41, %v5305_v17  ;;  %v1992_v0 = vshll.u32 %v6057_v14, 16  ;;  %v5270_v54 = vld [vmem:[%s6454_s1 + $0xa8] sm:$0xff]   ;;  %v5274_v36 = vld [vmem:[%s6454_s1 + $0xb0] sm:$0xff]   ;;  %v5307_v10 = vld [vmem:[%s5396_s14 + $0x58] sm:$0xf] }
  0x7b   : > { %4597 = vmatprep.subr.bf16.mxu1 %v5254_v57  ;;  %v1399_v59 = vrot.slane %v1397_v52, 4  ;;  %v1398_v8 = vsel %vm5648_vm5, %v3847_v34, %v1397_v52  ;;  %v6074_v50 = vcombine.low %v1391_v49, %v1394_v22  ;;  %v1998_v62 = vshll.u32 %v6043_v24, 16 }
  0x7c   : > { %v2002_v7 = vshrl.u32 %v6043_v24, 16  ;;  %v3938_v20 = vrot.slane %v6057_v14, 9  ;;  %v2279_v1 = vrot.slane %v2277_v48, 4  ;;  %v2280_v5 = vrot.slane %v269_v6, 5 }
  0x7d   : > { %4598 = vmatpush3.bf16.msra.mxu1 %v5254_v57  ;;  %v1401_v56 = vsel %vm5648_vm5, %v1399_v59, %v1400_v63  ;;  %v1989_v57 = vshrl.u32 %v6057_v14, 16  ;;  %v2000_v52 = vrot.slane %v1998_v62, 5  ;;  %v2008_v63 = vshll.u32 %v269_v6, 16  ;;  %v5306_v6 = vld [vmem:[%s5396_s14 + $0x54] sm:$0xf]  ;;  %v5280_v62 = vld [vmem:[%s6454_s1 + $0xc0] sm:$0xff]  }
  0x7e   : > { %4599 = vmatprep.subr.bf16.mxu1 %v5258_v47  ;;  %v6084_v42 = vcombine.low %v1398_v8, %v1401_v56  ;;  %v2004_v2 = vrot.slane %v2002_v7, 4  ;;  %v2281_v49 = vsel %vm5648_vm5, %v2279_v1, %v2280_v5  ;;  %v6103_v41 = vcombine.low %v5306_v6, %v5307_v10  ;;  %v5271_v7 = vld [vmem:[%s6454_s1 + $0x1c8] sm:$0xff]   ;;  %v5279_v1 = vld [vmem:[%s6454_s1 + $0x1d8] sm:$0xff]   ;;  %v5284_v6 = vld [vmem:[%s6454_s1 + $0xd0] sm:$0xff]  }
  0x7f   : > { %v1991_v32 = vrot.slane %v1989_v57, 4  ;;  %v2010_v56 = vrot.slane %v2008_v63, 5  ;;  %v5287_v10 = vld [vmem:[%s6454_s1 + $0xd8] sm:$0xff]  }
  0x80   : > { %4568 = vmatmul.mubr.bf16.gmra.mrb[4].mxu1 %v5601_v11  ;;  %v2005_v59 = vor.u32 %v2004_v2, %v2000_v52  ;;  %v5310_v2 = vld [vmem:[%s5396_s14] sm:$0xf] }
  0x81   : > { %4776 = vmatmul.mubr.bf16.gmra.mrb[20].mxu0 %v6033_v4  ;;  %4571 = vmatprep.mubr.bf16.mxu1 %v5605_v15 }
  0x82   : > { %4779 = vmatprep.mubr.bf16.mxu0 %v6040_v3  ;;  %4600 = vmatpush3.bf16.msra.mxu1 %v5258_v47  ;;  %v1994_v47 = vrot.slane %v1992_v0, 5  ;;  %v2006_v8 = vrot.slane %v2005_v59, 4  ;;  %v5278_v0 = vld [vmem:[%s6454_s1 + $0xb8] sm:$0xff]   ;;  %v5283_v59 = vld [vmem:[%s6454_s1 + $0x1e8] sm:$0xff]  }
  0x83   : > { %4601 = vmatprep.subr.bf16.mxu1 %v5262_v25 }
  0x84   : > { %v1995_v34 = vor.u32 %v1994_v47, %v1991_v32  ;;  %v5281_v32 = vld [vmem:[%s6454_s1 + $0x1e0] sm:$0xff]   ;;  %v5309_v47 = vld [vmem:[%s5396_s14 + $0x8] sm:$0x1] }
  0x86   : > { %4602 = vmatpush3.bf16.msra.mxu1 %v5262_v25  ;;  %v2278_v25 = vsel %vm5648_vm5, %v3938_v20, %v2277_v48  ;;  %v1996_v22 = vrot.slane %v1995_v34, 4  ;;  %v5275_v20 = vld [vmem:[%s6454_s1 + $0x1d0] sm:$0xff]  }
  0x87   : > { %4603 = vmatprep.subr.bf16.mxu1 %v5266_v27  ;;  %v6105_v17 = vcombine.low %v2278_v25, %v2281_v49  ;;  %v5285_v49 = vld [vmem:[%s6454_s1 + $0x1f0] sm:$0xff]  }
  0x88   : > { %4572 = vmatmul.mubr.bf16.gmra.mrb[8].mxu1 %v6072_v12  ;;  %v2001_v48 = vsel %vm5441_vm2, %v1996_v22, %v2000_v52  ;;  %v1295_v52 = vrot.slane %v5309_v47, 5  ;;  %v6492_v47 = vld [vmem:[#allocation4_spill] sm:$0xff] }
  0x89   : > { %4780 = vmatmul.mubr.bf16.gmra.mrb[24].mxu0 %v6074_v50  ;;  %4575 = vmatprep.mubr.bf16.mxu1 %v6078_v31 }
  0x8a   : > { %4783 = vmatprep.mubr.bf16.mxu0 %v6084_v42  ;;  %4604 = vmatpush3.bf16.msra.mxu1 %v5266_v27  ;;  %v2011_v27 = vsel %vm5441_vm2, %v2006_v8, %v2010_v56  ;;  %v5289_v8 = vld [vmem:[%s6454_s1 + $0x1f8] sm:$0xff]   ;;  %v5291_v56 = vld [vmem:[%s6454_s1 + $0x200] sm:$0xff]  }
  0x8b   : > { %4605 = vmatprep.subr.bf16.mxu1 %v5270_v54  ;;  %v6111_v57 = vcombine.low %v2001_v48, %v2011_v27  ;;  %v6192_v48 = vcombine.low %v6057_v14, %v6043_v24  ;;  %v5292_v27 = vld [vmem:[%s6454_s1 + $0xe8] sm:$0xff]   ;;  %v5294_v24 = vld [vmem:[%s6454_s1 + $0xf0] sm:$0xff]  }
  0x8e   : > { %4606 = vmatpush3.bf16.msra.mxu1 %v5270_v54  ;;  %v3832_v54 = vrot.slane %v5310_v2, 9  ;;  %v5298_v2 = vld [vmem:[%s6454_s1 + $0x220] sm:$0xff]  }
  0x8f   : > { %4607 = vmatprep.subr.bf16.mxu1 %v5274_v36 }
  0x90   : > { %4576 = vmatmul.mubr.bf16.gmra.mrb[12].mxu1 %v6103_v41 }
  0x91   : > { %4784 = vmatmul.mubr.bf16.gmra.mrb[28].mxu0 %v6105_v17  ;;  %4579 = vmatprep.mubr.bf16.mxu1 %v5993_v28 }
  0x92   : > { %4803 = vmatprep.mubr.bf16.mxu0 %v5530_v60  ;;  %4608 = vmatpush3.bf16.msra.mxu1 %v5274_v36  ;;  %v5282_v36 = vld [vmem:[%s6454_s1 + $0xc8] sm:$0xff]  }
  0x93   : > { %4609 = vmatprep.subr.bf16.mxu1 %v5278_v0 }
  0x96   : > { %4610 = vmatpush3.bf16.msra.mxu1 %v5278_v0  ;;  %v6202_v0 = vld [vmem:[%s5396_s14 + $0xcc] sm:$0xf] }
  0x97   : > { %4643 = vmatprep.subr.bf16.mxu1 %v5280_v62 }
  0x98   : > { %4580 = vmatmul.mubr.bf16.gmra.mrb[16].mxu1 %v6004_v33 }
  0x99   : > { %4804 = vmatmul.mubr.bf16.vlgmr.msra.gmra.mrb[0].mxu0 %v5601_v11  ;;  %4583 = vmatprep.mubr.bf16.mxu1 %v6015_v45 }
  0x9a   : > { %4836 = vmatpush3.bf16.msra.mxu0 %v5929_v30  ;;  %4807 = vmatprep.mubr.bf16.mxu0 %v5605_v15  ;;  %v5308_v30 = vld [vmem:[%s5396_s14 + $0x4] sm:$0xf] }
  0x9b   : > { %4837 = vmatprep.subr.bf16.mxu0 %v5271_v7  ;;  %v1292_v5 = vrot.slane %v5308_v30, 5  ;;  %v6490_v30 = vld [vmem:[#allocation2_spill] sm:$0xff] }
  0x9d   : > { %v1294_v34 = vrot.slane %v1292_v5, 4  ;;  %v1293_v63 = vsel %vm5648_vm5, %v3832_v54, %v1292_v5  ;;  %v5295_v5 = vld [vmem:[%s6454_s1 + $0x210] sm:$0xff]   ;;  %v5299_v54 = vld [vmem:[%s6454_s1 + $0x228] sm:$0xff]  }
  0x9e   : > { %4838 = vmatpush3.bf16.msra.mxu0 %v5271_v7  ;;  %v5296_v7 = vld [vmem:[%s6454_s1 + $0xf8] sm:$0xff]  }
  0x9f   : > { %4839 = vmatprep.subr.bf16.mxu0 %v5275_v20  ;;  %v1296_v25 = vsel %vm5648_vm5, %v1294_v34, %v1295_v52  ;;  %v6493_v52 = vld [vmem:[#allocation5_spill] sm:$0xff]  ;;  %v6494_v34 = vld [vmem:[#allocation6_spill] sm:$0xff] }
  0xa0   : > { %4584 = vmatmul.mubr.bf16.gmra.mrb[20].mxu1 %v6019_v40  ;;  %v3864_v22 = vcombine.low %v1293_v63, %v1296_v25  ;;  %v5300_v63 = vld [vmem:[%s6454_s1 + $0x230] sm:$0xff]   ;;  %v5301_v25 = vld [vmem:[%s6454_s1 + $0x238] sm:$0xff]  }
  0xa1   : > { %4808 = vmatmul.mubr.bf16.gmra.mrb[4].mxu0 %v6072_v12  ;;  %4587 = vmatprep.mubr.bf16.mxu1 %v6023_v53 }
  0xa2   : > { %4811 = vmatprep.mubr.bf16.mxu0 %v6078_v31  ;;  %4840 = vmatpush3.bf16.msra.mxu0 %v5275_v20  ;;  %v5293_v20 = vld [vmem:[%s6454_s1 + $0x208] sm:$0xff]  }
  0xa3   : > { %4841 = vmatprep.subr.bf16.mxu0 %v5279_v1 }
  0xa6   : > { %4842 = vmatpush3.bf16.msra.mxu0 %v5279_v1  ;;  %v5311_v1 = vld [vmem:[%s6454_s1 + $0x100] sm:$0xff]  }
  0xa7   : > { %4843 = vmatprep.subr.bf16.mxu0 %v5281_v32 }
  0xa8   : > { %4588 = vmatmul.mubr.bf16.gmra.mrb[24].mxu1 %v6027_v9 }
  0xa9   : > { %4812 = vmatmul.mubr.bf16.gmra.mrb[8].mxu0 %v6103_v41  ;;  %4591 = vmatprep.mubr.bf16.mxu1 %v6031_v16 }
  0xaa   : > { %4815 = vmatprep.mubr.bf16.mxu0 %v5993_v28  ;;  %4844 = vmatpush3.bf16.msra.mxu0 %v5281_v32  ;;  %v5297_v32 = vld [vmem:[%s6454_s1 + $0x218] sm:$0xff]  }
  0xab   : > { %4845 = vmatprep.subr.bf16.mxu0 %v5283_v59 }
  0xae   : > { %4846 = vmatpush3.bf16.msra.mxu0 %v5283_v59  ;;  %v6495_v59 = vld [vmem:[#allocation7_spill] sm:$0xff] }
  0xaf   : > { %4847 = vmatprep.subr.bf16.mxu0 %v5285_v49 }
  0xb0   : > { %4592 = vmatmul.mubr.bf16.gmra.mrb[28].mxu1 %v6038_v38 }
  0xb1   : > { %4816 = vmatmul.mubr.bf16.gmra.mrb[12].mxu0 %v6004_v33  ;;  %4611 = vmatprep.mubr.bf16.mxu1 %v3864_v22  ;;  %v6497_v22 = vld [vmem:[#allocation9_spill] sm:$0xff] }
  0xb2   : > { %4819 = vmatprep.mubr.bf16.mxu0 %v6015_v45  ;;  %4848 = vmatpush3.bf16.msra.mxu0 %v5285_v49  ;;  %v6496_v49 = vld [vmem:[#allocation8_spill] sm:$0xff] }
  0xb3   : > { %4849 = vmatprep.subr.bf16.mxu0 %v5289_v8 }
  0xb6   : > { %4850 = vmatpush3.bf16.msra.mxu0 %v5289_v8  ;;  %v6498_v8 = vld [vmem:[#allocation10_spill] sm:$0xff] }
  0xb7   : > { %4883 = vmatprep.subr.bf16.mxu0 %v5291_v56 }
  0xb8   : > { %4612 = vmatmul.mubr.bf16.vlgmr.msra.gmra.mrb[0].mxu1 %v5696_v39  ;;  %v5290_v39 = vld [vmem:[%s6454_s1 + $0xe0] sm:$0xff]  }
  0xb9   : > { %4820 = vmatmul.mubr.bf16.gmra.mrb[16].mxu0 %v6019_v40  ;;  %4644 = vmatpush3.bf16.msra.mxu1 %v5280_v62  ;;  %v6205_v62 = vld [vmem:[%s5396_s14 + $0xd0] sm:$0xf] }
  0xba   : > { %4615 = vmatprep.mubr.bf16.mxu1 %v5742_v26  ;;  %4823 = vmatprep.mubr.bf16.mxu0 %v6023_v53  ;;  %v3980_v14 = vcombine.low %v6202_v0, %v6205_v62 }
  0xbb   : > { %4645 = vmatprep.subr.bf16.mxu1 %v5282_v36 }
  0xbd   : > { %4646 = vmatpush3.bf16.msra.mxu1 %v5282_v36  ;;  %v2812_v36 = vshll.u32 %v6202_v0, 16 }
  0xbe   : > { %4647 = vmatprep.subr.bf16.mxu1 %v5284_v6 }
  0xc0   : > { %4616 = vmatmul.mubr.bf16.gmra.mrb[4].mxu1 %v5782_v46 }
  0xc1   : > { %4824 = vmatmul.mubr.bf16.gmra.mrb[20].mxu0 %v6027_v9  ;;  %4619 = vmatprep.mubr.bf16.mxu1 %v5819_v44 }
  0xc2   : > { %4827 = vmatprep.mubr.bf16.mxu0 %v6031_v16  ;;  %4648 = vmatpush3.bf16.msra.mxu1 %v5284_v6  ;;  %v2822_v6 = vshrl.u32 %v6205_v62, 16 }
  0xc3   : > { %4649 = vmatprep.subr.bf16.mxu1 %v5287_v10 }
  0xc6   : > { %4650 = vmatpush3.bf16.msra.mxu1 %v5287_v10  ;;  %v6499_v10 = vld [vmem:[#allocation11_spill] sm:$0xff] }
  0xc7   : > { %4651 = vmatprep.subr.bf16.mxu1 %v5290_v39 }
  0xc8   : > { %4620 = vmatmul.mubr.bf16.gmra.mrb[8].mxu1 %v5852_v19 }
  0xc9   : > { %4828 = vmatmul.mubr.bf16.gmra.mrb[24].mxu0 %v6038_v38  ;;  %4623 = vmatprep.mubr.bf16.mxu1 %v5884_v35 }
  0xca   : > { %4831 = vmatprep.mubr.bf16.mxu0 %v6192_v48  ;;  %4652 = vmatpush3.bf16.msra.mxu1 %v5290_v39 }
  0xcb   : > { %4653 = vmatprep.subr.bf16.mxu1 %v5292_v27 }
  0xce   : > { %4654 = vmatpush3.bf16.msra.mxu1 %v5292_v27  ;;  %v2814_v27 = vrot.slane %v2812_v36, 5 }
  0xcf   : > { %4655 = vmatprep.subr.bf16.mxu1 %v5294_v24 }
  0xd0   : > { %4624 = vmatmul.mubr.bf16.gmra.mrb[12].mxu1 %v5918_v21 }
  0xd1   : > { %4832 = vmatmul.mubr.bf16.gmra.mrb[28].mxu0 %v3980_v14  ;;  %4627 = vmatprep.mubr.bf16.mxu1 %v5950_v58  ;;  %v2824_v14 = vrot.slane %v2822_v6, 4 }
  0xd2   : > { %4851 = vmatprep.mubr.bf16.mxu0 %v5518_v51  ;;  %4656 = vmatpush3.bf16.msra.mxu1 %v5294_v24  ;;  %v6491_v51 = vld [vmem:[#allocation3_spill] sm:$0xff] }
  0xd3   : > { %4657 = vmatprep.subr.bf16.mxu1 %v5296_v7 }
  0xd6   : > { %4658 = vmatpush3.bf16.msra.mxu1 %v5296_v7  ;;  %v5313_v7 = vld [vmem:[%s6454_s1 + $0x110] sm:$0xff]  }
  0xd7   : > { %4931 = vmatprep.subr.bf16.mxu1 %v5311_v1 }
  0xd8   : > { %4628 = vmatmul.mubr.bf16.gmra.mrb[16].mxu1 %v5955_v18 }
  0xd9   : > { %4852 = vmatmul.mubr.bf16.vlgmr.msra.gmra.mrb[0].mxu0 %v6490_v30  ;;  %4631 = vmatprep.mubr.bf16.mxu1 %v5975_v13 }
  0xda   : > { %4884 = vmatpush3.bf16.msra.mxu0 %v5291_v56  ;;  %4855 = vmatprep.mubr.bf16.mxu0 %v6491_v51  ;;  %v2809_v56 = vshrl.u32 %v6202_v0, 16 }
  0xdb   : > { %4885 = vmatprep.subr.bf16.mxu0 %v5293_v20 }
  0xdc   : > { %v2811_v39 = vrot.slane %v2809_v56, 4 }
  0xde   : > { %4886 = vmatpush3.bf16.msra.mxu0 %v5293_v20  ;;  %v6500_v20 = vld [vmem:[#allocation12_spill] sm:$0xff] }
  0xdf   : > { %4887 = vmatprep.subr.bf16.mxu0 %v5295_v5 }
  0xe0   : > { %4632 = vmatmul.mubr.bf16.gmra.mrb[20].mxu1 %v5980_v29 }
  0xe1   : > { %4856 = vmatmul.mubr.bf16.gmra.mrb[4].mxu0 %v6492_v47  ;;  %4635 = vmatprep.mubr.bf16.mxu1 %v6033_v4 }
  0xe2   : > { %4859 = vmatprep.mubr.bf16.mxu0 %v6493_v52  ;;  %4888 = vmatpush3.bf16.msra.mxu0 %v5295_v5  ;;  %v5314_v5 = vld [vmem:[%s6454_s1 + $0x118] sm:$0xff]  }
  0xe3   : > { %4889 = vmatprep.subr.bf16.mxu0 %v5297_v32 }
  0xe6   : > { %4890 = vmatpush3.bf16.msra.mxu0 %v5297_v32 }
  0xe7   : > { %4891 = vmatprep.subr.bf16.mxu0 %v5298_v2 }
  0xe8   : > { %4636 = vmatmul.mubr.bf16.gmra.mrb[24].mxu1 %v6040_v3 }
  0xe9   : > { %4860 = vmatmul.mubr.bf16.gmra.mrb[8].mxu0 %v6494_v34  ;;  %4639 = vmatprep.mubr.bf16.mxu1 %v6074_v50 }
  0xea   : > { %4863 = vmatprep.mubr.bf16.mxu0 %v6495_v59  ;;  %4892 = vmatpush3.bf16.msra.mxu0 %v5298_v2 }
  0xeb   : > { %4893 = vmatprep.subr.bf16.mxu0 %v5299_v54 }
  0xee   : > { %4894 = vmatpush3.bf16.msra.mxu0 %v5299_v54  ;;  %v5316_v54 = vld [vmem:[%s6454_s1 + $0x128] sm:$0xff]  }
  0xef   : > { %4895 = vmatprep.subr.bf16.mxu0 %v5300_v63 }
  0xf0   : > { %4640 = vmatmul.mubr.bf16.gmra.mrb[28].mxu1 %v6084_v42 }
  0xf1   : > { %4864 = vmatmul.mubr.bf16.gmra.mrb[12].mxu0 %v6496_v49  ;;  %4659 = vmatprep.mubr.bf16.mxu1 %v5454_v43  ;;  %v2818_v43 = vshll.u32 %v6205_v62, 16 }
  0xf2   : > { %4867 = vmatprep.mubr.bf16.mxu0 %v6497_v22  ;;  %4896 = vmatpush3.bf16.msra.mxu0 %v5300_v63 }
  0xf3   : > { %4897 = vmatprep.subr.bf16.mxu0 %v5301_v25  ;;  %v2820_v24 = vrot.slane %v2818_v43, 5 }
  0xf5   : > { %v2825_v30 = vor.u32 %v2824_v14, %v2820_v24  ;;  %v4254_v14 = vld [vmem:[%s6364_s21 + $0x10] sm:$0xff]  }
  0xf6   : > { %4898 = vmatpush3.bf16.msra.mxu0 %v5301_v25 }
  0xf7   : > { %v2826_v47 = vrot.slane %v2825_v30, 4 }
  0xf8   : > { %4660 = vmatmul.mubr.bf16.vlgmr.msra.gmra.mrb[0].mxu1 %v5530_v60  ;;  %v5312_v60 = vld [vmem:[%s6454_s1 + $0x108] sm:$0xff]  }
  0xf9   : > { %4868 = vmatmul.mubr.bf16.gmra.mrb[16].mxu0 %v6498_v8  ;;  %4939 = vmatpush3.bf16.msra.mxu1 %v5311_v1  ;;  %v2815_v1 = vor.u32 %v2814_v27, %v2811_v39  ;;  %v4255_v27 = vld [vmem:[%s6364_s21 + $0x18] sm:$0xff]  }
  0xfa   : > { %4663 = vmatprep.mubr.bf16.mxu1 %v5601_v11  ;;  %4871 = vmatprep.mubr.bf16.mxu0 %v6499_v10  ;;  %v6273_v11 = vld [vmem:[%s5396_s14 + $0xd4] sm:$0x1] }
  0xfb   : > { %4932 = vmatprep.subr.bf16.mxu1 %v5312_v60  ;;  %v2828_v51 = vshll.u32 %v6273_v11, 16  ;;  %v2816_v32 = vrot.slane %v2815_v1, 4 }
  0xfd   : > { %4940 = vmatpush3.bf16.msra.mxu1 %v5312_v60  ;;  %v2830_v52 = vrot.slane %v2828_v51, 5  ;;  %v4123_v51 = vunpack.c.l.bf16 %v4255_v27 }
  0xfe   : > { %4933 = vmatprep.subr.bf16.mxu1 %v5313_v7 }
  0xff   : > { %v2831_v2 = vsel %vm5441_vm2, %v2826_v47, %v2830_v52 }
 0x100   : > { %4664 = vmatmul.mubr.bf16.gmra.mrb[4].mxu1 %v5605_v15  ;;  %v5315_v15 = vld [vmem:[%s6454_s1 + $0x120] sm:$0xff]  }
 0x101   : > { %4872 = vmatmul.mubr.bf16.gmra.mrb[20].mxu0 %v6500_v20  ;;  %4667 = vmatprep.mubr.bf16.mxu1 %v6072_v12  ;;  %v2821_v12 = vsel %vm5441_vm2, %v2816_v32, %v2820_v24 }
 0x102   : > { %4875 = vmatprep.mubr.bf16.mxu0 %v5914_v55  ;;  %4941 = vmatpush3.bf16.msra.mxu1 %v5313_v7  ;;  %v4005_v34 = vcombine.low %v2821_v12, %v2831_v2 }
 0x103   : > { %4934 = vmatprep.subr.bf16.mxu1 %v5314_v5 }
 0x106   : > { %4942 = vmatpush3.bf16.msra.mxu1 %v5314_v5 }
 0x107   : > { %4935 = vmatprep.subr.bf16.mxu1 %v5315_v15 }
 0x108   : > { %4668 = vmatmul.mubr.bf16.gmra.mrb[8].mxu1 %v6078_v31  ;;  %v5317_v31 = vld [vmem:[%s6454_s1 + $0x130] sm:$0xff]  }
 0x109   : > { %4876 = vmatmul.mubr.bf16.gmra.mrb[24].mxu0 %v5948_v61  ;;  %4671 = vmatprep.mubr.bf16.mxu1 %v6103_v41 }
 0x10a   : > { %4879 = vmatprep.mubr.bf16.mxu0 %v6111_v57  ;;  %4943 = vmatpush3.bf16.msra.mxu1 %v5315_v15  ;;  %v4119_v15 = vunpack.c.l.bf16 %v4254_v14 }
 0x10b   : > { %4936 = vmatprep.subr.bf16.mxu1 %v5316_v54 }
 0x10e   : > { %4944 = vmatpush3.bf16.msra.mxu1 %v5316_v54 }
 0x10f   : > { %4937 = vmatprep.subr.bf16.mxu1 %v5317_v31 }
 0x110   : > { %4672 = vmatmul.mubr.bf16.gmra.mrb[12].mxu1 %v5993_v28 }
 0x111   : > { %4880 = vmatmul.mubr.bf16.gmra.mrb[28].mxu0 %v4005_v34  ;;  %4675 = vmatprep.mubr.bf16.mxu1 %v6004_v33 }
 0x112   : > { %4899 = vmatprep.mubr.bf16.mxu0 %v5742_v26  ;;  %4945 = vmatpush3.bf16.msra.mxu1 %v5317_v31  ;;  %v3097_v26 = vrot.slane %v6205_v62, 5  ;;  %v4124_v31 = vunpack.c.h.bf16 %v4255_v27 }
 0x113   : > { %4938 = vmatprep.subr.bf16.mxu1 %v5318_v37 }
 0x116   : > { %4946 = vmatpush3.bf16.msra.mxu1 %v5318_v37 }
 0x118   : > { %4676 = vmatmul.mubr.bf16.gmra.mrb[16].mxu1 %v6015_v45 }
 0x119   : > { %4900 = vmatmul.mubr.bf16.vlgmr.msra.gmra.mrb[0].mxu0 %v5782_v46  ;;  %4679 = vmatprep.mubr.bf16.mxu1 %v6019_v40  ;;  %v4014_v46 = vrot.slane %v6202_v0, 9 }
 0x11a   : > { %4903 = vmatprep.mubr.bf16.mxu0 %v5819_v44  ;;  %v3099_v44 = vrot.slane %v3097_v26, 4 }
 0x120   : > { %4680 = vmatmul.mubr.bf16.gmra.mrb[20].mxu1 %v6023_v53 }
 0x121   : > { %4904 = vmatmul.mubr.bf16.gmra.mrb[4].mxu0 %v5852_v19  ;;  %4683 = vmatprep.mubr.bf16.mxu1 %v6027_v9  ;;  %v3100_v19 = vrot.slane %v6273_v11, 5 }
 0x122   : > { %4907 = vmatprep.mubr.bf16.mxu0 %v5884_v35  ;;  %v3098_v35 = vsel %vm5648_vm5, %v4014_v46, %v3097_v26 }
 0x128   : > { %4684 = vmatmul.mubr.bf16.gmra.mrb[24].mxu1 %v6031_v16 }
 0x129   : > { %4908 = vmatmul.mubr.bf16.gmra.mrb[8].mxu0 %v5918_v21  ;;  %4687 = vmatprep.mubr.bf16.mxu1 %v6038_v38  ;;  %v3101_v21 = vsel %vm5648_vm5, %v3099_v44, %v3100_v19  ;;  %v4120_v19 = vunpack.c.h.bf16 %v4254_v14 }
 0x12a   : > { %4911 = vmatprep.mubr.bf16.mxu0 %v5950_v58  ;;  %v4031_v58 = vcombine.low %v3098_v35, %v3101_v21 }
 0x130   : > { %4688 = vmatmul.mubr.bf16.gmra.mrb[28].mxu1 %v6192_v48 }
 0x131   : > { %4912 = vmatmul.mubr.bf16.gmra.mrb[12].mxu0 %v5955_v18  ;;  %4723 = vmatprep.mubr.bf16.mxu1 %v6496_v49 }
 0x132   : > { %4915 = vmatprep.mubr.bf16.mxu0 %v5975_v13 }
 0x138   : > { %4724 = vmatmul.mubr.bf16.vlgmr.msra.gmra.mrb[16].mxu1 %v6497_v22 }
 0x139   : > { %4916 = vmatmul.mubr.bf16.gmra.mrb[16].mxu0 %v5980_v29  ;;  %4727 = vmatprep.mubr.bf16.mxu1 %v6498_v8 }
 0x13a   : > { %4919 = vmatprep.mubr.bf16.mxu0 %v6033_v4 }
 0x140   : > { %4728 = vmatmul.mubr.bf16.gmra.mrb[20].mxu1 %v6499_v10 }
 0x141   : > { %4920 = vmatmul.mubr.bf16.gmra.mrb[20].mxu0 %v6040_v3  ;;  %4731 = vmatprep.mubr.bf16.mxu1 %v6500_v20 }
 0x142   : > { %4923 = vmatprep.mubr.bf16.mxu0 %v6074_v50  ;;  %v4253_v50 = vld [vmem:[%s6364_s21 + $0x8] sm:$0xff]  }
 0x143   : > { %v4115_v48 = vunpack.c.l.bf16 %v4253_v50  ;;  %v4116_v22 = vunpack.c.h.bf16 %v4253_v50 }
 0x148   : > { %4732 = vmatmul.mubr.bf16.gmra.mrb[24].mxu1 %v5914_v55 }
 0x149   : > { %4924 = vmatmul.mubr.bf16.gmra.mrb[24].mxu0 %v6084_v42  ;;  %4735 = vmatprep.mubr.bf16.mxu1 %v5948_v61  ;;  %v4110_v42 = vld [vmem:[%s6364_s21] sm:$0xff]  }
 0x14a   : > { %4927 = vmatprep.mubr.bf16.mxu0 %v6105_v17  ;;  %v6371_v17 = vld [vmem:[%s6455_s2] ss:$0 sm:$0xff]  ;;  %v4111_v59 = vunpack.c.l.bf16 %v4110_v42  ;;  %v4112_v6 = vunpack.c.h.bf16 %v4110_v42 }
 0x150   : > { %4736 = vmatmul.mubr.bf16.gmra.mrb[28].mxu1 %v6111_v57 }
 0x151   : > { %4928 = vmatmul.mubr.bf16.gmra.mrb[28].mxu0 %v4031_v58 }
 0x1cb   : > { %v4661_v18 = vpop.f32.mrb[0].mxu1 }
 0x1cc   : > { %v1829_v13 = vpop.f32.mrb[1].mxu1 }
 0x1cd   : > { %v4662_v55 = vpop.f32.mrb[2].mxu1 }
 0x1ce   : > { %v1832_v29 = vpop.f32.mrb[3].mxu1 }
 0x1d3   : > { %v4665_v28 = vpop.f32.mrb[4].mxu1 }
 0x1d4   : > { %v1845_v61 = vpop.f32.mrb[5].mxu1 }
 0x1d5   : > { %v4666_v33 = vpop.f32.mrb[6].mxu1 }
 0x1d6   : > { %v1848_v45 = vpop.f32.mrb[7].mxu1 }
 0x1db   : > { %v6342_v40 = vpop.f32.mrb[8].mxu1 }
 0x1dc   : > { %v6344_v53 = vpop.f32.mrb[9].mxu1 }
 0x1dd   : > { %v6346_v23 = vpop.f32.mrb[10].mxu1 }
 0x1de   : > { %v6348_v9 = vpop.f32.mrb[11].mxu1 }
 0x1e3   : > { %v6350_v16 = vpop.f32.mrb[12].mxu1 }
 0x1e4   : > { %v6353_v4 = vpop.f32.mrb[13].mxu1 }
 0x1e5   : > { %v6355_v38 = vpop.f32.mrb[14].mxu1 }
 0x1e6   : > { %v6357_v3 = vpop.f32.mrb[15].mxu1 }
 0x1ec   : > { %v4901_v41 = vpop.f32.mrb[0].mxu0 }
 0x1ed   : > { %v4947_v57 = vadd.f32 %v4901_v41, %v4661_v18  ;;  %v3205_v0 = vpop.f32.mrb[1].mxu0 }
 0x1ee   : > { %v4948_v62 = vadd.f32 %v3205_v0, %v1829_v13  ;;  %v4902_v63 = vpop.f32.mrb[2].mxu0  ;;  %v4257_v13 = vld [vmem:[%s6364_s21 + $0x28] sm:$0xff]  }
 0x1ef   : > { %v3373_v25 = vadd.f32 %v4947_v57, %v6371_v17  ;;  %v4949_v49 = vadd.f32 %v4902_v63, %v4662_v55  ;;  %v3208_v8 = vpop.f32.mrb[3].mxu0  ;;  %v4131_v41 = vunpack.c.l.bf16 %v4257_v13 }
 0x1f0   : > { %v3371_v56 = vadd.f32 %v4948_v62, %v6371_v17  ;;  %v4950_v36 = vadd.f32 %v3208_v8, %v1832_v29  ;;  %v4256_v29 = vld [vmem:[%s6364_s21 + $0x20] sm:$0xff]  }
 0x1f1   : > { %v3469_v43 = vadd.f32 %v4115_v48, %v3373_v25  ;;  %v3374_v10 = vadd.f32 %v4949_v49, %v6371_v17  ;;  %v4127_v62 = vunpack.c.l.bf16 %v4256_v29 }
 0x1f2   : > { %v3467_v60 = vadd.f32 %v4111_v59, %v3371_v56  ;;  %v3372_v39 = vadd.f32 %v4950_v36, %v6371_v17 }
 0x1f3   : > { %v3470_v24 = vadd.f32 %v4116_v22, %v3374_v10  ;;  %v3501_v20 = vmax.f32 %v3469_v43, 0.0  ;;  %v4132_v22 = vunpack.c.h.bf16 %v4257_v13 }
 0x1f4   : > { %v3468_v7 = vadd.f32 %v4112_v6, %v3372_v39  ;;  %v4905_v11 = vpop.f32.mrb[4].mxu0  ;;  %v3499_v32 = vmax.f32 %v3467_v60, 0.0  ;;  %v4128_v6 = vunpack.c.h.bf16 %v4256_v29  ;;  %v4259_v39 = vld [vmem:[%s6364_s21 + $0x38] sm:$0xff]  }
 0x1f5   : > { %v3502_v1 = vmax.f32 %v3470_v24, 0.0  ;;  %v4951_v30 = vadd.f32 %v4905_v11, %v4665_v28  ;;  %v3221_v5 = vpop.f32.mrb[5].mxu0  ;;  %v4258_v24 = vld [vmem:[%s6364_s21 + $0x30] sm:$0xff]  }
 0x1f6   : > { %v3500_v47 = vmax.f32 %v3468_v7, 0.0  ;;  %v4952_v52 = vadd.f32 %v3221_v5, %v1845_v61  ;;  %v4906_v12 = vpop.f32.mrb[6].mxu0 }
 0x1f7   : > { %v4181_v2 = vpack.c.bf16 %v3502_v1, %v3501_v20  ;;  %v3377_v54 = vadd.f32 %v4951_v30, %v6371_v17  ;;  %v4953_v34 = vadd.f32 %v4906_v12, %v4666_v33  ;;  %v3224_v37 = vpop.f32.mrb[7].mxu0  ;;  %v4139_v1 = vunpack.c.l.bf16 %v4259_v39 }
 0x1f8   : > { %v4176_v26 = vpack.c.bf16 %v3500_v47, %v3499_v32  ;;  %v3375_v46 = vadd.f32 %v4952_v52, %v6371_v17  ;;  %v4954_v44 = vadd.f32 %v3224_v37, %v1848_v45  ;;  %v4135_v32 = vunpack.c.l.bf16 %v4258_v24 }
 0x1f9   : > { %4268 = vst [vmem:[%s6384_s26 + $0x8] sm:$0xff] %v4181_v2   ;;  %v3473_v35 = vadd.f32 %v4123_v51, %v3377_v54  ;;  %v3378_v21 = vadd.f32 %v4953_v34, %v6371_v17  ;;  %v4140_v2 = vunpack.c.h.bf16 %v4259_v39  ;;  %v4136_v37 = vunpack.c.h.bf16 %v4258_v24 }
 0x1fa   : > { %4177 = vst [vmem:[%s6384_s26] sm:$0xff] %v4176_v26   ;;  %v3471_v58 = vadd.f32 %v4119_v15, %v3375_v46  ;;  %v3376_v18 = vadd.f32 %v4954_v44, %v6371_v17 }
 0x1fb   : > { %v3474_v55 = vadd.f32 %v4124_v31, %v3378_v21  ;;  %v3505_v33 = vmax.f32 %v3473_v35, 0.0  ;;  %v4260_v21 = vld [vmem:[%s6364_s21 + $0x40] sm:$0xff]  }
 0x1fc   : > { %v3472_v28 = vadd.f32 %v4120_v19, %v3376_v18  ;;  %v4909_v61 = vpop.f32.mrb[8].mxu0  ;;  %v3503_v57 = vmax.f32 %v3471_v58, 0.0  ;;  %v4261_v19 = vld [vmem:[%s6364_s21 + $0x48] sm:$0xff]  }
 0x1fd   : > { %v3506_v50 = vmax.f32 %v3474_v55, 0.0  ;;  %v4955_v42 = vadd.f32 %v4909_v61, %v6342_v40  ;;  %v3237_v45 = vpop.f32.mrb[9].mxu0 }
 0x1fe   : > { %v3504_v48 = vmax.f32 %v3472_v28, 0.0  ;;  %v4956_v0 = vadd.f32 %v3237_v45, %v6344_v53  ;;  %v4910_v59 = vpop.f32.mrb[10].mxu0  ;;  %v4147_v28 = vunpack.c.l.bf16 %v4261_v19 }
 0x1ff   : > { %v4191_v63 = vpack.c.bf16 %v3506_v50, %v3505_v33  ;;  %v3381_v25 = vadd.f32 %v4955_v42, %v6371_v17  ;;  %v4957_v49 = vadd.f32 %v4910_v59, %v6346_v23  ;;  %v3240_v8 = vpop.f32.mrb[11].mxu0  ;;  %v4148_v59 = vunpack.c.h.bf16 %v4261_v19 }
 0x200   : > { %v4186_v40 = vpack.c.bf16 %v3504_v48, %v3503_v57  ;;  %v3379_v56 = vadd.f32 %v4956_v0, %v6371_v17  ;;  %v4958_v36 = vadd.f32 %v3240_v8, %v6348_v9 }
 0x201   : > { %4270 = vst [vmem:[%s6384_s26 + $0x18] sm:$0xff] %v4191_v63   ;;  %v3477_v43 = vadd.f32 %v4131_v41, %v3381_v25  ;;  %v3382_v53 = vadd.f32 %v4957_v49, %v6371_v17  ;;  %v4143_v41 = vunpack.c.l.bf16 %v4260_v21 }
 0x202   : > { %4269 = vst [vmem:[%s6384_s26 + $0x10] sm:$0xff] %v4186_v40   ;;  %v3475_v10 = vadd.f32 %v4127_v62, %v3379_v56  ;;  %v3380_v60 = vadd.f32 %v4958_v36, %v6371_v17  ;;  %v4144_v40 = vunpack.c.h.bf16 %v4260_v21 }
 0x203   : > { %v3478_v27 = vadd.f32 %v4132_v22, %v3382_v53  ;;  %v3509_v7 = vmax.f32 %v3477_v43, 0.0  ;;  %v4263_v53 = vld [vmem:[%s6364_s21 + $0x58] sm:$0xff]  }
 0x204   : > { %v3476_v23 = vadd.f32 %v4128_v6, %v3380_v60  ;;  %v4913_v14 = vpop.f32.mrb[12].mxu0  ;;  %v3507_v30 = vmax.f32 %v3475_v10, 0.0  ;;  %v4262_v60 = vld [vmem:[%s6364_s21 + $0x50] sm:$0xff]  }
 0x205   : > { %v3510_v11 = vmax.f32 %v3478_v27, 0.0  ;;  %v4959_v20 = vadd.f32 %v4913_v14, %v6350_v16  ;;  %v3253_v9 = vpop.f32.mrb[13].mxu0 }
 0x206   : > { %v3508_v51 = vmax.f32 %v3476_v23, 0.0  ;;  %v4960_v5 = vadd.f32 %v3253_v9, %v6353_v4  ;;  %v4914_v47 = vpop.f32.mrb[14].mxu0 }
 0x207   : > { %v4201_v52 = vpack.c.bf16 %v3510_v11, %v3509_v7  ;;  %v3385_v15 = vadd.f32 %v4959_v20, %v6371_v17  ;;  %v4961_v12 = vadd.f32 %v4914_v47, %v6355_v38  ;;  %v3256_v54 = vpop.f32.mrb[15].mxu0  ;;  %v4155_v11 = vunpack.c.l.bf16 %v4263_v53 }
 0x208   : > { %v4196_v16 = vpack.c.bf16 %v3508_v51, %v3507_v30  ;;  %v3383_v34 = vadd.f32 %v4960_v5, %v6371_v17  ;;  %v4962_v31 = vadd.f32 %v3256_v54, %v6357_v3  ;;  %v4151_v5 = vunpack.c.l.bf16 %v4262_v60 }
 0x209   : > { %4272 = vst [vmem:[%s6384_s26 + $0x28] sm:$0xff] %v4201_v52   ;;  %v3481_v26 = vadd.f32 %v4139_v1, %v3385_v15  ;;  %v3386_v4 = vadd.f32 %v4961_v12, %v6371_v17 }
 0x20a   : > { %4271 = vst [vmem:[%s6384_s26 + $0x20] sm:$0xff] %v4196_v16   ;;  %v3479_v46 = vadd.f32 %v4135_v32, %v3383_v34  ;;  %v3384_v44 = vadd.f32 %v4962_v31, %v6371_v17 }
 0x20b   : > { %v3482_v35 = vadd.f32 %v4140_v2, %v3386_v4  ;;  %v4725_v58 = vpop.f32.mrb[16].mxu1  ;;  %v3513_v13 = vmax.f32 %v3481_v26, 0.0  ;;  %v4156_v2 = vunpack.c.h.bf16 %v4263_v53  ;;  %v4152_v26 = vunpack.c.h.bf16 %v4262_v60 }
 0x20c   : > { %v3480_v38 = vadd.f32 %v4136_v37, %v3384_v44  ;;  %v4917_v18 = vpop.f32.mrb[16].mxu0  ;;  %v2179_v3 = vpop.f32.mrb[17].mxu1  ;;  %v3511_v33 = vmax.f32 %v3479_v46, 0.0 }
 0x20d   : > { %v3514_v55 = vmax.f32 %v3482_v35, 0.0  ;;  %v4963_v29 = vadd.f32 %v4917_v18, %v4725_v58  ;;  %v3269_v61 = vpop.f32.mrb[17].mxu0  ;;  %v4726_v45 = vpop.f32.mrb[18].mxu1  ;;  %v4265_v35 = vld [vmem:[%s6364_s21 + $0x68] sm:$0xff]  }
 0x20e   : > { %v3512_v50 = vmax.f32 %v3480_v38, 0.0  ;;  %v4964_v42 = vadd.f32 %v3269_v61, %v2179_v3  ;;  %v4918_v57 = vpop.f32.mrb[18].mxu0  ;;  %v2182_v63 = vpop.f32.mrb[19].mxu1  ;;  %v4264_v38 = vld [vmem:[%s6364_s21 + $0x60] sm:$0xff]   ;;  %v4163_v3 = vunpack.c.l.bf16 %v4265_v35 }
 0x20f   : > { %v4211_v48 = vpack.c.bf16 %v3514_v55, %v3513_v13  ;;  %v3389_v0 = vadd.f32 %v4963_v29, %v6371_v17  ;;  %v4965_v62 = vadd.f32 %v4918_v57, %v4726_v45  ;;  %v3272_v25 = vpop.f32.mrb[19].mxu0  ;;  %v4159_v45 = vunpack.c.l.bf16 %v4264_v38 }
 0x210   : > { %v4206_v49 = vpack.c.bf16 %v3512_v50, %v3511_v33  ;;  %v3387_v22 = vadd.f32 %v4964_v42, %v6371_v17  ;;  %v4966_v8 = vadd.f32 %v3272_v25, %v2182_v63  ;;  %v4164_v63 = vunpack.c.h.bf16 %v4265_v35 }
 0x211   : > { %4274 = vst [vmem:[%s6384_s26 + $0x38] sm:$0xff] %v4211_v48   ;;  %v3485_v56 = vadd.f32 %v4147_v28, %v3389_v0  ;;  %v3390_v36 = vadd.f32 %v4965_v62, %v6371_v17 }
 0x212   : > { %4273 = vst [vmem:[%s6384_s26 + $0x30] sm:$0xff] %v4206_v49   ;;  %v3483_v6 = vadd.f32 %v4143_v41, %v3387_v22  ;;  %v3388_v43 = vadd.f32 %v4966_v8, %v6371_v17 }
 0x213   : > { %v3486_v10 = vadd.f32 %v4148_v59, %v3390_v36  ;;  %v4729_v27 = vpop.f32.mrb[20].mxu1  ;;  %v3517_v23 = vmax.f32 %v3485_v56, 0.0  ;;  %v4160_v56 = vunpack.c.h.bf16 %v4264_v38 }
 0x214   : > { %v3484_v39 = vadd.f32 %v4144_v40, %v3388_v43  ;;  %v4921_v24 = vpop.f32.mrb[20].mxu0  ;;  %v2195_v20 = vpop.f32.mrb[21].mxu1  ;;  %v3515_v9 = vmax.f32 %v3483_v6, 0.0 }
 0x215   : > { %v3518_v14 = vmax.f32 %v3486_v10, 0.0  ;;  %v4967_v7 = vadd.f32 %v4921_v24, %v4729_v27  ;;  %v3285_v1 = vpop.f32.mrb[21].mxu0  ;;  %v4730_v32 = vpop.f32.mrb[22].mxu1  ;;  %v4267_v10 = vld [vmem:[%s6364_s21 + $0x78] sm:$0xff]  }
 0x216   : > { %v3516_v30 = vmax.f32 %v3484_v39, 0.0  ;;  %v4968_v51 = vadd.f32 %v3285_v1, %v2195_v20  ;;  %v4922_v47 = vpop.f32.mrb[22].mxu0  ;;  %v2198_v54 = vpop.f32.mrb[23].mxu1  ;;  %v4266_v39 = vld [vmem:[%s6364_s21 + $0x70] sm:$0xff]   ;;  %v4171_v20 = vunpack.c.l.bf16 %v4267_v10 }
 0x217   : > { %v4221_v52 = vpack.c.bf16 %v3518_v14, %v3517_v23  ;;  %v3393_v15 = vadd.f32 %v4967_v7, %v6371_v17  ;;  %v4969_v12 = vadd.f32 %v4922_v47, %v4730_v32  ;;  %v3288_v16 = vpop.f32.mrb[23].mxu0  ;;  %v4167_v32 = vunpack.c.l.bf16 %v4266_v39 }
 0x218   : > { %v4216_v34 = vpack.c.bf16 %v3516_v30, %v3515_v9  ;;  %v3391_v31 = vadd.f32 %v4968_v51, %v6371_v17  ;;  %v4970_v37 = vadd.f32 %v3288_v16, %v2198_v54  ;;  %v4172_v54 = vunpack.c.h.bf16 %v4267_v10 }
 0x219   : > { %4276 = vst [vmem:[%s6384_s26 + $0x48] sm:$0xff] %v4221_v52   ;;  %v3489_v4 = vadd.f32 %v4155_v11, %v3393_v15  ;;  %v3394_v46 = vadd.f32 %v4969_v12, %v6371_v17 }
 0x21a   : > { %4275 = vst [vmem:[%s6384_s26 + $0x40] sm:$0xff] %v4216_v34   ;;  %v3487_v44 = vadd.f32 %v4151_v5, %v3391_v31  ;;  %v3392_v19 = vadd.f32 %v4970_v37, %v6371_v17 }
 0x21b   : > { %v3490_v21 = vadd.f32 %v4156_v2, %v3394_v46  ;;  %v4733_v18 = vpop.f32.mrb[24].mxu1  ;;  %v3521_v55 = vmax.f32 %v3489_v4, 0.0  ;;  %v4168_v4 = vunpack.c.h.bf16 %v4266_v39 }
 0x21c   : > { %v3488_v58 = vadd.f32 %v4152_v26, %v3392_v19  ;;  %v4925_v13 = vpop.f32.mrb[24].mxu0  ;;  %v2211_v61 = vpop.f32.mrb[25].mxu1  ;;  %v3519_v50 = vmax.f32 %v3487_v44, 0.0 }
 0x21d   : > { %v3522_v29 = vmax.f32 %v3490_v21, 0.0  ;;  %v4971_v28 = vadd.f32 %v4925_v13, %v4733_v18  ;;  %v3301_v33 = vpop.f32.mrb[25].mxu0  ;;  %v4734_v57 = vpop.f32.mrb[26].mxu1 }
 0x21e   : > { %v3520_v42 = vmax.f32 %v3488_v58, 0.0  ;;  %v4972_v41 = vadd.f32 %v3301_v33, %v2211_v61  ;;  %v4926_v48 = vpop.f32.mrb[26].mxu0  ;;  %v2214_v25 = vpop.f32.mrb[27].mxu1 }
 0x21f   : > { %v4231_v0 = vpack.c.bf16 %v3522_v29, %v3521_v55  ;;  %v3397_v62 = vadd.f32 %v4971_v28, %v6371_v17  ;;  %v4973_v59 = vadd.f32 %v4926_v48, %v4734_v57  ;;  %v3304_v49 = vpop.f32.mrb[27].mxu0 }
 0x220   : > { %v4226_v22 = vpack.c.bf16 %v3520_v42, %v3519_v50  ;;  %v3395_v8 = vadd.f32 %v4972_v41, %v6371_v17  ;;  %v4974_v40 = vadd.f32 %v3304_v49, %v2214_v25 }
 0x221   : > { %4278 = vst [vmem:[%s6384_s26 + $0x58] sm:$0xff] %v4231_v0   ;;  %v3493_v36 = vadd.f32 %v4163_v3, %v3397_v62  ;;  %v3398_v6 = vadd.f32 %v4973_v59, %v6371_v17 }
 0x222   : > { %4277 = vst [vmem:[%s6384_s26 + $0x50] sm:$0xff] %v4226_v22   ;;  %v3491_v43 = vadd.f32 %v4159_v45, %v3395_v8  ;;  %v3396_v53 = vadd.f32 %v4974_v40, %v6371_v17 }
 0x223   : > { %v3494_v60 = vadd.f32 %v4164_v63, %v3398_v6  ;;  %v4737_v24 = vpop.f32.mrb[28].mxu1  ;;  %v3525_v14 = vmax.f32 %v3493_v36, 0.0 }
 0x224   : > { %v3492_v27 = vadd.f32 %v4160_v56, %v3396_v53  ;;  %v4929_v23 = vpop.f32.mrb[28].mxu0  ;;  %v2227_v1 = vpop.f32.mrb[29].mxu1  ;;  %v3523_v30 = vmax.f32 %v3491_v43, 0.0 }
 0x225   : > { %v3526_v7 = vmax.f32 %v3494_v60, 0.0  ;;  %v4975_v11 = vadd.f32 %v4929_v23, %v4737_v24  ;;  %v3317_v9 = vpop.f32.mrb[29].mxu0  ;;  %v4738_v47 = vpop.f32.mrb[30].mxu1 }
 0x226   : > { %v3524_v51 = vmax.f32 %v3492_v27, 0.0  ;;  %v4976_v5 = vadd.f32 %v3317_v9, %v2227_v1  ;;  %v4930_v52 = vpop.f32.mrb[30].mxu0  ;;  %v2230_v16 = vpop.f32.mrb[31].mxu1 }
 0x227   : > { %v4241_v15 = vpack.c.bf16 %v3526_v7, %v3525_v14  ;;  %v3401_v12 = vadd.f32 %v4975_v11, %v6371_v17  ;;  %v4977_v2 = vadd.f32 %v4930_v52, %v4738_v47  ;;  %v3320_v34 = vpop.f32.mrb[31].mxu0 }
 0x228   : > { %v4236_v31 = vpack.c.bf16 %v3524_v51, %v3523_v30  ;;  %v3399_v37 = vadd.f32 %v4976_v5, %v6371_v17  ;;  %v4978_v26 = vadd.f32 %v3320_v34, %v2230_v16 }
 0x229   : > { %4280 = vst [vmem:[%s6384_s26 + $0x68] sm:$0xff] %v4241_v15   ;;  %v3497_v46 = vadd.f32 %v4171_v20, %v3401_v12  ;;  %v3402_v44 = vadd.f32 %v4977_v2, %v6371_v17 }
 0x22a   : > { %4279 = vst [vmem:[%s6384_s26 + $0x60] sm:$0xff] %v4236_v31   ;;  %v3495_v19 = vadd.f32 %v4167_v32, %v3399_v37  ;;  %v3400_v35 = vadd.f32 %v4978_v26, %v6371_v17 }
 0x22b   : > { %v3498_v21 = vadd.f32 %v4172_v54, %v3402_v44  ;;  %v3529_v58 = vmax.f32 %v3497_v46, 0.0 }
 0x22c   : > { %v3496_v38 = vadd.f32 %v4168_v4, %v3400_v35  ;;  %v3527_v13 = vmax.f32 %v3495_v19, 0.0 }
 0x22d   : > { %v3530_v18 = vmax.f32 %v3498_v21, 0.0 }
 0x22e   : > { %v3528_v55 = vmax.f32 %v3496_v38, 0.0 }
 0x22f   : > { %v4251_v29 = vpack.c.bf16 %v3530_v18, %v3529_v58 }
 0x230   : > { %v4246_v28 = vpack.c.bf16 %v3528_v55, %v3527_v13 }
 0x231   : > { %4282 = vst [vmem:[%s6384_s26 + $0x78] sm:$0xff] %v4251_v29  }
 0x232   : > { %4281 = vst [vmem:[%s6384_s26 + $0x70] sm:$0xff] %v4246_v28  }
 0x233 PF: > { %s14_s15 = sadd.s32 1, %s5325_s15  }
 0x234   : > { %p11_p4 = scmp.ge.s32.totalorder %s14_s15, 4  }
 0x236   :  { %13 = sbr.rel (!%p11_p4) target bundleno = 1 (0x1), region = 77 }

</bundles_post_ra>
